<compile_context>
chip_gen: v7x
topology: tpu7x:2x2x1
jax: 0.10.0
libtpu: 0.0.40
codegen_flags: <defaults>
</compile_context>

<pallas_src>
import math

import jax
import jax.numpy as jnp
from jax.experimental import pallas as pl
from jax.experimental.pallas import tpu as pltpu


# ----------------------------------------------------------------------------
# Shared in-kernel helpers
# ----------------------------------------------------------------------------
def _elu_f32(x):
    # ELU(alpha=1). Both branches are safe: exp overflow -> inf is never selected.
    return jnp.where(x > 0.0, x, jnp.exp(x) - 1.0)


# ----------------------------------------------------------------------------
# Pallas kernel 1: fused conv-as-matmul + bias + ELU, both towers per call
#   x_ref: (1, M, K) bf16   w_ref: (1, K, N) bf16   b_ref: (1, 1, N) f32
# ----------------------------------------------------------------------------
def _conv_towers_kernel(x_ref, w_ref, b_ref, o_ref):
    acc = jnp.dot(x_ref[0], w_ref[0], preferred_element_type=jnp.float32)
    acc = acc + b_ref[0]                      # (1, N) broadcasts over (M, N)
    o_ref[0] = _elu_f32(acc).astype(o_ref.dtype)


def conv_towers(patches, w, b):
    """patches: [T, M, K] bf16, w: [T, K, N] bf16, b: [T, 1, N] f32 -> [T, M, N] bf16."""
    T, M, K = patches.shape
    N = w.shape[-1]
    return pl.pallas_call(
        _conv_towers_kernel,
        out_shape=jax.ShapeDtypeStruct((T, M, N), jnp.bfloat16),
        grid=(T,),
        in_specs=[
            pl.BlockSpec((1, M, K), lambda t: (t, 0, 0)),
            pl.BlockSpec((1, K, N), lambda t: (t, 0, 0)),
            pl.BlockSpec((1, 1, N), lambda t: (t, 0, 0)),
        ],
        out_specs=pl.BlockSpec((1, M, N), lambda t: (t, 0, 0)),
        compiler_params=pltpu.CompilerParams(
            dimension_semantics=("parallel",)),   # towers are independent
    )(patches, w, b)


# ----------------------------------------------------------------------------
# Pallas kernel 2: fused FC heads.
#   target:    Linear(., 512)
#   predictor: Linear(., 512) -> ELU -> Linear(512, 512) -> ELU -> Linear(512, 512)
# All intermediate [B, 512] activations stay on-chip; bf16 dot operands, f32 accum.
# ----------------------------------------------------------------------------
def _fused_heads_kernel(ht_ref, hp_ref, wt_ref, bt_ref,
                        w0_ref, b0_ref, w1_ref, b1_ref, w2_ref, b2_ref,
                        zt_ref, zp_ref):
    # --- target head ---
    zt = jnp.dot(ht_ref[...], wt_ref[...], preferred_element_type=jnp.float32)
    zt_ref[...] = zt + bt_ref[...]

    # --- predictor head ---
    h = jnp.dot(hp_ref[...], w0_ref[...], preferred_element_type=jnp.float32) + b0_ref[...]
    h = _elu_f32(h)
    h = jnp.dot(h.astype(jnp.bfloat16), w1_ref[...],
                preferred_element_type=jnp.float32) + b1_ref[...]
    h = _elu_f32(h)
    h = jnp.dot(h.astype(jnp.bfloat16), w2_ref[...],
                preferred_element_type=jnp.float32) + b2_ref[...]
    zp_ref[...] = h


def fused_heads(ht, hp, wt, bt, w0, b0, w1, b1, w2, b2):
    B = ht.shape[0]
    N = wt.shape[-1]
    vmem = pl.BlockSpec(memory_space=pltpu.MemorySpace.VMEM)
    return pl.pallas_call(
        _fused_heads_kernel,
        out_shape=(jax.ShapeDtypeStruct((B, N), jnp.float32),
                   jax.ShapeDtypeStruct((B, N), jnp.float32)),
        in_specs=[vmem] * 10,
        out_specs=(vmem, vmem),
    )(ht, hp, wt, bt, w0, b0, w1, b1, w2, b2)


# ----------------------------------------------------------------------------
# Glue: im2col patch extraction (layout plumbing, plain JAX)
# ----------------------------------------------------------------------------
def im2col(x_nhwc, ksize, stride, pad):
    B, H, W, C = x_nhwc.shape
    xp = jnp.pad(x_nhwc, ((0, 0), (pad, pad), (pad, pad), (0, 0)))
    Ho = (H + 2 * pad - ksize) // stride + 1
    Wo = (W + 2 * pad - ksize) // stride + 1
    cols = []
    for di in range(ksize):
        for dj in range(ksize):
            cols.append(xp[:, di:di + stride * Ho:stride,
                           dj:dj + stride * Wo:stride, :])
    patches = jnp.stack(cols, axis=3)                 # [B, Ho, Wo, k*k, C]
    patches = patches.reshape(B * Ho * Wo, ksize * ksize * C)
    return patches, (B, Ho, Wo)


# ----------------------------------------------------------------------------
# Parameter initialization (deterministic, orthogonal with gain sqrt(2))
# ----------------------------------------------------------------------------
def init_params(key, input_shape):
    H, W = input_shape[1], input_shape[2]
    Hc, Wc = H // 8, W // 8
    fc_size = Hc * Wc
    gain = math.sqrt(2.0)
    ortho = jax.nn.initializers.orthogonal(scale=gain)

    conv_shapes = [  # HWIO
        (3, 3, 1, 16),
        (3, 3, 16, 32),
        (3, 3, 32, 64),
        (3, 3, 64, 64),
    ]

    def chw_to_hwc_rows(w_rows):
        # PyTorch Flatten on NCHW uses (c, h, w) row order; permute to (h, w, c)
        # once at init so the runtime flatten of the NHWC activation is a reshape.
        return (w_rows.reshape(64, Hc, Wc, -1)
                .transpose(1, 2, 0, 3)
                .reshape(Hc * Wc * 64, -1))

    def make_tower(key, n_extra_fc):
        params = {"conv_w": [], "conv_b": [], "fc_w": [], "fc_b": []}
        keys = jax.random.split(key, 4 + 1 + n_extra_fc)
        for i, shp in enumerate(conv_shapes):
            params["conv_w"].append(ortho(keys[i], shp, jnp.float32))
            params["conv_b"].append(jnp.zeros((shp[-1],), jnp.float32))
        w0 = ortho(keys[4], (64 * fc_size, 512), jnp.float32)   # rows in CHW order
        params["fc_w"].append(chw_to_hwc_rows(w0))              # permuted to HWC order
        params["fc_b"].append(jnp.zeros((512,), jnp.float32))
        for j in range(n_extra_fc):
            params["fc_w"].append(ortho(keys[5 + j], (512, 512), jnp.float32))
            params["fc_b"].append(jnp.zeros((512,), jnp.float32))
        return params

    k_t, k_p = jax.random.split(key)
    target = make_tower(k_t, n_extra_fc=0)       # conv stack + Linear(., 512)
    predictor = make_tower(k_p, n_extra_fc=2)    # + ELU, Linear, ELU, Linear
    return {"target": target, "predictor": predictor}


# ----------------------------------------------------------------------------
# Forward pass
# ----------------------------------------------------------------------------
def forward(params, state_nchw):
    pt, pp = params["target"], params["predictor"]
    B = state_nchw.shape[0]

    # state[:, 0, :, :].unsqueeze(1) -> NHWC, bf16 matmul operands
    x = state_nchw[:, 0:1, :, :]                                   # [B, 1, H, W]
    x_nhwc = jnp.transpose(x, (0, 2, 3, 1)).astype(jnp.bfloat16)   # [B, H, W, 1]

    # ---- conv1: shared input; towers fused along Cout (16 + 16 -> 32 lanes) ----
    kh, kw, cin, cout = pt["conv_w"][0].shape
    patches, (_, Ho, Wo) = im2col(x_nhwc, kh, stride=2, pad=1)     # [B*Ho*Wo, 9] bf16
    w_cat = jnp.concatenate([pt["conv_w"][0], pp["conv_w"][0]], axis=-1)
    b_cat = jnp.concatenate([pt["conv_b"][0], pp["conv_b"][0]], axis=-1)
    y = conv_towers(patches[None],
                    w_cat.reshape(1, kh * kw * cin, 2 * cout).astype(jnp.bfloat16),
                    b_cat.reshape(1, 1, 2 * cout))
    y = y[0].reshape(B, Ho, Wo, 2 * cout)
    h_t, h_p = y[..., :cout], y[..., cout:]

    # ---- conv2..conv4: both towers per call (tower = grid axis) ----
    for li, stride in ((1, 2), (2, 2), (3, 1)):
        kh, kw, cin, cout = pt["conv_w"][li].shape
        patches_t, (_, Ho, Wo) = im2col(h_t, kh, stride=stride, pad=1)
        patches_p, _ = im2col(h_p, kh, stride=stride, pad=1)
        patches = jnp.stack([patches_t, patches_p], axis=0)        # [2, M, K] bf16
        w = jnp.stack([pt["conv_w"][li].reshape(kh * kw * cin, cout),
                       pp["conv_w"][li].reshape(kh * kw * cin, cout)],
                      axis=0).astype(jnp.bfloat16)
        b = jnp.stack([pt["conv_b"][li], pp["conv_b"][li]],
                      axis=0).reshape(2, 1, cout)
        y = conv_towers(patches, w, b)
        h_t = y[0].reshape(B, Ho, Wo, cout)
        h_p = y[1].reshape(B, Ho, Wo, cout)

    # ---- flatten (HWC order; fc_w[0] rows were permuted from CHW at init) ----
    ht = h_t.reshape(B, -1)
    hp = h_p.reshape(B, -1)

    # ---- fused FC heads (1 Pallas call for all 4 linear layers) ----
    z_target, z_predictor = fused_heads(
        ht, hp,
        pt["fc_w"][0].astype(jnp.bfloat16), pt["fc_b"][0].reshape(1, -1),
        pp["fc_w"][0].astype(jnp.bfloat16), pp["fc_b"][0].reshape(1, -1),
        pp["fc_w"][1].astype(jnp.bfloat16), pp["fc_b"][1].reshape(1, -1),
        pp["fc_w"][2].astype(jnp.bfloat16), pp["fc_b"][2].reshape(1, -1),
    )
    return z_target, z_predictor


# ----------------------------------------------------------------------------
if __name__ == "__main__":
    key = jax.random.PRNGKey(0)
    B, C, H, W = 2, 4, 16, 16          # input_shape = (C, H, W) in the module
    input_shape = (C, H, W)

    k_params, k_data = jax.random.split(key)
    params = init_params(k_params, input_shape)
    state = jax.random.normal(k_data, (B, C, H, W), dtype=jnp.float32)

    z_target, z_predictor = jax.jit(forward)(params, state)
    jax.block_until_ready((z_target, z_predictor))

    assert z_target.shape == (B, 512), z_target.shape
    assert z_predictor.shape == (B, 512), z_predictor.shape
    assert z_target.dtype == jnp.float32
    assert z_predictor.dtype == jnp.float32
    print("KERNEL_OK")
</pallas_src>

<mosaic_0001>
module attributes {stable_mosaic.version = 11 : i64} {
  func.func @_conv_towers_kernel(%arg0: i32, %arg1: memref<1x128x9xbf16, #tpu.memory_space<vmem>>, %arg2: memref<1x9x32xbf16, #tpu.memory_space<vmem>>, %arg3: memref<1x1x32xf32, #tpu.memory_space<vmem>>, %arg4: memref<1x128x32xbf16, #tpu.memory_space<vmem>>) attributes {dimension_semantics = [#tpu.dimension_semantics<parallel>], iteration_bounds = array<i64: 1>, scalar_prefetch = 0 : i64, scratch_operands = 0 : i64, tpu.core_type = #tpu.core_type<tc>, window_params = [{transform_indices = @transform_0, window_bounds = array<i64: 1, 128, 9>}, {transform_indices = @transform_1, window_bounds = array<i64: 1, 9, 32>}, {transform_indices = @transform_2, window_bounds = array<i64: 1, 1, 32>}, {transform_indices = @transform_3, window_bounds = array<i64: 1, 128, 32>}]} {
    %c0 = arith.constant 0 : index
    %c0_0 = arith.constant 0 : index
    %c0_1 = arith.constant 0 : index
    %0 = vector.load %arg1[%c0, %c0_0, %c0_1] : memref<1x128x9xbf16, #tpu.memory_space<vmem>>, vector<1x128x9xbf16>
    %1 = vector.shape_cast %0 : vector<1x128x9xbf16> to vector<128x9xbf16>
    %c0_2 = arith.constant 0 : index
    %c0_3 = arith.constant 0 : index
    %c0_4 = arith.constant 0 : index
    %2 = vector.load %arg2[%c0_2, %c0_3, %c0_4] : memref<1x9x32xbf16, #tpu.memory_space<vmem>>, vector<1x9x32xbf16>
    %3 = vector.shape_cast %2 : vector<1x9x32xbf16> to vector<9x32xbf16>
    %cst = arith.constant dense<0.000000e+00> : vector<128x32xf32>
    %4 = tpu.matmul %1, %3, %cst {dimension_numbers = #tpu.dot_dimension_numbers<[1], [0], [0], [1], [0, 0, 1, 1], [], []>} : vector<128x9xbf16>, vector<9x32xbf16>, vector<128x32xf32> -> vector<128x32xf32>
    %c0_5 = arith.constant 0 : index
    %c0_6 = arith.constant 0 : index
    %c0_7 = arith.constant 0 : index
    %5 = vector.load %arg3[%c0_5, %c0_6, %c0_7] : memref<1x1x32xf32, #tpu.memory_space<vmem>>, vector<1x1x32xf32>
    %6 = vector.shape_cast %5 : vector<1x1x32xf32> to vector<1x32xf32>
    %7 = vector.broadcast %6 : vector<1x32xf32> to vector<128x32xf32>
    %8 = arith.addf %4, %7 : vector<128x32xf32>
    %cst_8 = arith.constant 0.000000e+00 : f32
    %9 = vector.broadcast %cst_8 : f32 to vector<128x32xf32>
    %10 = arith.cmpf ogt, %8, %9 : vector<128x32xf32>
    %11 = math.exp %8 : vector<128x32xf32>
    %cst_9 = arith.constant 1.000000e+00 : f32
    %12 = vector.broadcast %cst_9 : f32 to vector<128x32xf32>
    %13 = arith.subf %11, %12 : vector<128x32xf32>
    %14 = arith.select %10, %8, %13 : vector<128x32xi1>, vector<128x32xf32>
    %15 = arith.truncf %14 : vector<128x32xf32> to vector<128x32xbf16>
    %c0_10 = arith.constant 0 : index
    %c0_11 = arith.constant 0 : index
    %c0_12 = arith.constant 0 : index
    %16 = vector.load %arg4[%c0_10, %c0_11, %c0_12] : memref<1x128x32xbf16, #tpu.memory_space<vmem>>, vector<1x128x32xbf16>
    %17 = vector.shape_cast %16 : vector<1x128x32xbf16> to vector<128x32xbf16>
    %18 = vector.shape_cast %15 : vector<128x32xbf16> to vector<1x128x32xbf16>
    tpu.vector_store %arg4[%c0_10, %c0_11, %c0_12], %18 {strides = array<i32>} : memref<1x128x32xbf16, #tpu.memory_space<vmem>>, vector<1x128x32xbf16>,
    return
  }
  func.func @transform_0(%arg0: i32) -> (i32, i32, i32) {
    %c0_i32 = arith.constant 0 : i32
    %c0_i32_0 = arith.constant 0 : i32
    %c0_i32_1 = arith.constant 0 : i32
    return %arg0, %c0_i32, %c0_i32_0 : i32, i32, i32
  }
  func.func @transform_1(%arg0: i32) -> (i32, i32, i32) {
    %c0_i32 = arith.constant 0 : i32
    %c0_i32_0 = arith.constant 0 : i32
    %c0_i32_1 = arith.constant 0 : i32
    return %arg0, %c0_i32, %c0_i32_0 : i32, i32, i32
  }
  func.func @transform_2(%arg0: i32) -> (i32, i32, i32) {
    %c0_i32 = arith.constant 0 : i32
    %c0_i32_0 = arith.constant 0 : i32
    %c0_i32_1 = arith.constant 0 : i32
    return %arg0, %c0_i32, %c0_i32_0 : i32, i32, i32
  }
  func.func @transform_3(%arg0: i32) -> (i32, i32, i32) {
    %c0_i32 = arith.constant 0 : i32
    %c0_i32_0 = arith.constant 0 : i32
    %c0_i32_1 = arith.constant 0 : i32
    return %arg0, %c0_i32, %c0_i32_0 : i32, i32, i32
  }
}

module attributes {stable_mosaic.version = 11 : i64} {
  func.func @_conv_towers_kernel(%arg0: i32, %arg1: memref<1x32x144xbf16, #tpu.memory_space<vmem>>, %arg2: memref<1x144x32xbf16, #tpu.memory_space<vmem>>, %arg3: memref<1x1x32xf32, #tpu.memory_space<vmem>>, %arg4: memref<1x32x32xbf16, #tpu.memory_space<vmem>>) attributes {dimension_semantics = [#tpu.dimension_semantics<parallel>], iteration_bounds = array<i64: 2>, scalar_prefetch = 0 : i64, scratch_operands = 0 : i64, tpu.core_type = #tpu.core_type<tc>, window_params = [{transform_indices = @transform_0, window_bounds = array<i64: 1, 32, 144>}, {transform_indices = @transform_1, window_bounds = array<i64: 1, 144, 32>}, {transform_indices = @transform_2, window_bounds = array<i64: 1, 1, 32>}, {transform_indices = @transform_3, window_bounds = array<i64: 1, 32, 32>}]} {
    %c0 = arith.constant 0 : index
    %c0_0 = arith.constant 0 : index
    %c0_1 = arith.constant 0 : index
    %0 = vector.load %arg1[%c0, %c0_0, %c0_1] : memref<1x32x144xbf16, #tpu.memory_space<vmem>>, vector<1x32x144xbf16>
    %1 = vector.shape_cast %0 : vector<1x32x144xbf16> to vector<32x144xbf16>
    %c0_2 = arith.constant 0 : index
    %c0_3 = arith.constant 0 : index
    %c0_4 = arith.constant 0 : index
    %2 = vector.load %arg2[%c0_2, %c0_3, %c0_4] : memref<1x144x32xbf16, #tpu.memory_space<vmem>>, vector<1x144x32xbf16>
    %3 = vector.shape_cast %2 : vector<1x144x32xbf16> to vector<144x32xbf16>
    %cst = arith.constant dense<0.000000e+00> : vector<32x32xf32>
    %4 = tpu.matmul %1, %3, %cst {dimension_numbers = #tpu.dot_dimension_numbers<[1], [0], [0], [1], [0, 0, 1, 1], [], []>} : vector<32x144xbf16>, vector<144x32xbf16>, vector<32x32xf32> -> vector<32x32xf32>
    %c0_5 = arith.constant 0 : index
    %c0_6 = arith.constant 0 : index
    %c0_7 = arith.constant 0 : index
    %5 = vector.load %arg3[%c0_5, %c0_6, %c0_7] : memref<1x1x32xf32, #tpu.memory_space<vmem>>, vector<1x1x32xf32>
    %6 = vector.shape_cast %5 : vector<1x1x32xf32> to vector<1x32xf32>
    %7 = vector.broadcast %6 : vector<1x32xf32> to vector<32x32xf32>
    %8 = arith.addf %4, %7 : vector<32x32xf32>
    %cst_8 = arith.constant 0.000000e+00 : f32
    %9 = vector.broadcast %cst_8 : f32 to vector<32x32xf32>
    %10 = arith.cmpf ogt, %8, %9 : vector<32x32xf32>
    %11 = math.exp %8 : vector<32x32xf32>
    %cst_9 = arith.constant 1.000000e+00 : f32
    %12 = vector.broadcast %cst_9 : f32 to vector<32x32xf32>
    %13 = arith.subf %11, %12 : vector<32x32xf32>
    %14 = arith.select %10, %8, %13 : vector<32x32xi1>, vector<32x32xf32>
    %15 = arith.truncf %14 : vector<32x32xf32> to vector<32x32xbf16>
    %c0_10 = arith.constant 0 : index
    %c0_11 = arith.constant 0 : index
    %c0_12 = arith.constant 0 : index
    %16 = vector.load %arg4[%c0_10, %c0_11, %c0_12] : memref<1x32x32xbf16, #tpu.memory_space<vmem>>, vector<1x32x32xbf16>
    %17 = vector.shape_cast %16 : vector<1x32x32xbf16> to vector<32x32xbf16>
    %18 = vector.shape_cast %15 : vector<32x32xbf16> to vector<1x32x32xbf16>
    tpu.vector_store %arg4[%c0_10, %c0_11, %c0_12], %18 {strides = array<i32>} : memref<1x32x32xbf16, #tpu.memory_space<vmem>>, vector<1x32x32xbf16>,
    return
  }
  func.func @transform_0(%arg0: i32) -> (i32, i32, i32) {
    %c0_i32 = arith.constant 0 : i32
    %c0_i32_0 = arith.constant 0 : i32
    %c0_i32_1 = arith.constant 0 : i32
    return %arg0, %c0_i32, %c0_i32_0 : i32, i32, i32
  }
  func.func @transform_1(%arg0: i32) -> (i32, i32, i32) {
    %c0_i32 = arith.constant 0 : i32
    %c0_i32_0 = arith.constant 0 : i32
    %c0_i32_1 = arith.constant 0 : i32
    return %arg0, %c0_i32, %c0_i32_0 : i32, i32, i32
  }
  func.func @transform_2(%arg0: i32) -> (i32, i32, i32) {
    %c0_i32 = arith.constant 0 : i32
    %c0_i32_0 = arith.constant 0 : i32
    %c0_i32_1 = arith.constant 0 : i32
    return %arg0, %c0_i32, %c0_i32_0 : i32, i32, i32
  }
  func.func @transform_3(%arg0: i32) -> (i32, i32, i32) {
    %c0_i32 = arith.constant 0 : i32
    %c0_i32_0 = arith.constant 0 : i32
    %c0_i32_1 = arith.constant 0 : i32
    return %arg0, %c0_i32, %c0_i32_0 : i32, i32, i32
  }
}

module attributes {stable_mosaic.version = 11 : i64} {
  func.func @_conv_towers_kernel(%arg0: i32, %arg1: memref<1x8x288xbf16, #tpu.memory_space<vmem>>, %arg2: memref<1x288x64xbf16, #tpu.memory_space<vmem>>, %arg3: memref<1x1x64xf32, #tpu.memory_space<vmem>>, %arg4: memref<1x8x64xbf16, #tpu.memory_space<vmem>>) attributes {dimension_semantics = [#tpu.dimension_semantics<parallel>], iteration_bounds = array<i64: 2>, scalar_prefetch = 0 : i64, scratch_operands = 0 : i64, tpu.core_type = #tpu.core_type<tc>, window_params = [{transform_indices = @transform_0, window_bounds = array<i64: 1, 8, 288>}, {transform_indices = @transform_1, window_bounds = array<i64: 1, 288, 64>}, {transform_indices = @transform_2, window_bounds = array<i64: 1, 1, 64>}, {transform_indices = @transform_3, window_bounds = array<i64: 1, 8, 64>}]} {
    %c0 = arith.constant 0 : index
    %c0_0 = arith.constant 0 : index
    %c0_1 = arith.constant 0 : index
    %0 = vector.load %arg1[%c0, %c0_0, %c0_1] : memref<1x8x288xbf16, #tpu.memory_space<vmem>>, vector<1x8x288xbf16>
    %1 = vector.shape_cast %0 : vector<1x8x288xbf16> to vector<8x288xbf16>
    %c0_2 = arith.constant 0 : index
    %c0_3 = arith.constant 0 : index
    %c0_4 = arith.constant 0 : index
    %2 = vector.load %arg2[%c0_2, %c0_3, %c0_4] : memref<1x288x64xbf16, #tpu.memory_space<vmem>>, vector<1x288x64xbf16>
    %3 = vector.shape_cast %2 : vector<1x288x64xbf16> to vector<288x64xbf16>
    %cst = arith.constant dense<0.000000e+00> : vector<8x64xf32>
    %4 = tpu.matmul %1, %3, %cst {dimension_numbers = #tpu.dot_dimension_numbers<[1], [0], [0], [1], [0, 0, 1, 1], [], []>} : vector<8x288xbf16>, vector<288x64xbf16>, vector<8x64xf32> -> vector<8x64xf32>
    %c0_5 = arith.constant 0 : index
    %c0_6 = arith.constant 0 : index
    %c0_7 = arith.constant 0 : index
    %5 = vector.load %arg3[%c0_5, %c0_6, %c0_7] : memref<1x1x64xf32, #tpu.memory_space<vmem>>, vector<1x1x64xf32>
    %6 = vector.shape_cast %5 : vector<1x1x64xf32> to vector<1x64xf32>
    %7 = vector.broadcast %6 : vector<1x64xf32> to vector<8x64xf32>
    %8 = arith.addf %4, %7 : vector<8x64xf32>
    %cst_8 = arith.constant 0.000000e+00 : f32
    %9 = vector.broadcast %cst_8 : f32 to vector<8x64xf32>
    %10 = arith.cmpf ogt, %8, %9 : vector<8x64xf32>
    %11 = math.exp %8 : vector<8x64xf32>
    %cst_9 = arith.constant 1.000000e+00 : f32
    %12 = vector.broadcast %cst_9 : f32 to vector<8x64xf32>
    %13 = arith.subf %11, %12 : vector<8x64xf32>
    %14 = arith.select %10, %8, %13 : vector<8x64xi1>, vector<8x64xf32>
    %15 = arith.truncf %14 : vector<8x64xf32> to vector<8x64xbf16>
    %c0_10 = arith.constant 0 : index
    %c0_11 = arith.constant 0 : index
    %c0_12 = arith.constant 0 : index
    %16 = vector.load %arg4[%c0_10, %c0_11, %c0_12] : memref<1x8x64xbf16, #tpu.memory_space<vmem>>, vector<1x8x64xbf16>
    %17 = vector.shape_cast %16 : vector<1x8x64xbf16> to vector<8x64xbf16>
    %18 = vector.shape_cast %15 : vector<8x64xbf16> to vector<1x8x64xbf16>
    tpu.vector_store %arg4[%c0_10, %c0_11, %c0_12], %18 {strides = array<i32>} : memref<1x8x64xbf16, #tpu.memory_space<vmem>>, vector<1x8x64xbf16>,
    return
  }
  func.func @transform_0(%arg0: i32) -> (i32, i32, i32) {
    %c0_i32 = arith.constant 0 : i32
    %c0_i32_0 = arith.constant 0 : i32
    %c0_i32_1 = arith.constant 0 : i32
    return %arg0, %c0_i32, %c0_i32_0 : i32, i32, i32
  }
  func.func @transform_1(%arg0: i32) -> (i32, i32, i32) {
    %c0_i32 = arith.constant 0 : i32
    %c0_i32_0 = arith.constant 0 : i32
    %c0_i32_1 = arith.constant 0 : i32
    return %arg0, %c0_i32, %c0_i32_0 : i32, i32, i32
  }
  func.func @transform_2(%arg0: i32) -> (i32, i32, i32) {
    %c0_i32 = arith.constant 0 : i32
    %c0_i32_0 = arith.constant 0 : i32
    %c0_i32_1 = arith.constant 0 : i32
    return %arg0, %c0_i32, %c0_i32_0 : i32, i32, i32
  }
  func.func @transform_3(%arg0: i32) -> (i32, i32, i32) {
    %c0_i32 = arith.constant 0 : i32
    %c0_i32_0 = arith.constant 0 : i32
    %c0_i32_1 = arith.constant 0 : i32
    return %arg0, %c0_i32, %c0_i32_0 : i32, i32, i32
  }
}

module attributes {stable_mosaic.version = 11 : i64} {
  func.func @_conv_towers_kernel(%arg0: i32, %arg1: memref<1x8x576xbf16, #tpu.memory_space<vmem>>, %arg2: memref<1x576x64xbf16, #tpu.memory_space<vmem>>, %arg3: memref<1x1x64xf32, #tpu.memory_space<vmem>>, %arg4: memref<1x8x64xbf16, #tpu.memory_space<vmem>>) attributes {dimension_semantics = [#tpu.dimension_semantics<parallel>], iteration_bounds = array<i64: 2>, scalar_prefetch = 0 : i64, scratch_operands = 0 : i64, tpu.core_type = #tpu.core_type<tc>, window_params = [{transform_indices = @transform_0, window_bounds = array<i64: 1, 8, 576>}, {transform_indices = @transform_1, window_bounds = array<i64: 1, 576, 64>}, {transform_indices = @transform_2, window_bounds = array<i64: 1, 1, 64>}, {transform_indices = @transform_3, window_bounds = array<i64: 1, 8, 64>}]} {
    %c0 = arith.constant 0 : index
    %c0_0 = arith.constant 0 : index
    %c0_1 = arith.constant 0 : index
    %0 = vector.load %arg1[%c0, %c0_0, %c0_1] : memref<1x8x576xbf16, #tpu.memory_space<vmem>>, vector<1x8x576xbf16>
    %1 = vector.shape_cast %0 : vector<1x8x576xbf16> to vector<8x576xbf16>
    %c0_2 = arith.constant 0 : index
    %c0_3 = arith.constant 0 : index
    %c0_4 = arith.constant 0 : index
    %2 = vector.load %arg2[%c0_2, %c0_3, %c0_4] : memref<1x576x64xbf16, #tpu.memory_space<vmem>>, vector<1x576x64xbf16>
    %3 = vector.shape_cast %2 : vector<1x576x64xbf16> to vector<576x64xbf16>
    %cst = arith.constant dense<0.000000e+00> : vector<8x64xf32>
    %4 = tpu.matmul %1, %3, %cst {dimension_numbers = #tpu.dot_dimension_numbers<[1], [0], [0], [1], [0, 0, 1, 1], [], []>} : vector<8x576xbf16>, vector<576x64xbf16>, vector<8x64xf32> -> vector<8x64xf32>
    %c0_5 = arith.constant 0 : index
    %c0_6 = arith.constant 0 : index
    %c0_7 = arith.constant 0 : index
    %5 = vector.load %arg3[%c0_5, %c0_6, %c0_7] : memref<1x1x64xf32, #tpu.memory_space<vmem>>, vector<1x1x64xf32>
    %6 = vector.shape_cast %5 : vector<1x1x64xf32> to vector<1x64xf32>
    %7 = vector.broadcast %6 : vector<1x64xf32> to vector<8x64xf32>
    %8 = arith.addf %4, %7 : vector<8x64xf32>
    %cst_8 = arith.constant 0.000000e+00 : f32
    %9 = vector.broadcast %cst_8 : f32 to vector<8x64xf32>
    %10 = arith.cmpf ogt, %8, %9 : vector<8x64xf32>
    %11 = math.exp %8 : vector<8x64xf32>
    %cst_9 = arith.constant 1.000000e+00 : f32
    %12 = vector.broadcast %cst_9 : f32 to vector<8x64xf32>
    %13 = arith.subf %11, %12 : vector<8x64xf32>
    %14 = arith.select %10, %8, %13 : vector<8x64xi1>, vector<8x64xf32>
    %15 = arith.truncf %14 : vector<8x64xf32> to vector<8x64xbf16>
    %c0_10 = arith.constant 0 : index
    %c0_11 = arith.constant 0 : index
    %c0_12 = arith.constant 0 : index
    %16 = vector.load %arg4[%c0_10, %c0_11, %c0_12] : memref<1x8x64xbf16, #tpu.memory_space<vmem>>, vector<1x8x64xbf16>
    %17 = vector.shape_cast %16 : vector<1x8x64xbf16> to vector<8x64xbf16>
    %18 = vector.shape_cast %15 : vector<8x64xbf16> to vector<1x8x64xbf16>
    tpu.vector_store %arg4[%c0_10, %c0_11, %c0_12], %18 {strides = array<i32>} : memref<1x8x64xbf16, #tpu.memory_space<vmem>>, vector<1x8x64xbf16>,
    return
  }
  func.func @transform_0(%arg0: i32) -> (i32, i32, i32) {
    %c0_i32 = arith.constant 0 : i32
    %c0_i32_0 = arith.constant 0 : i32
    %c0_i32_1 = arith.constant 0 : i32
    return %arg0, %c0_i32, %c0_i32_0 : i32, i32, i32
  }
  func.func @transform_1(%arg0: i32) -> (i32, i32, i32) {
    %c0_i32 = arith.constant 0 : i32
    %c0_i32_0 = arith.constant 0 : i32
    %c0_i32_1 = arith.constant 0 : i32
    return %arg0, %c0_i32, %c0_i32_0 : i32, i32, i32
  }
  func.func @transform_2(%arg0: i32) -> (i32, i32, i32) {
    %c0_i32 = arith.constant 0 : i32
    %c0_i32_0 = arith.constant 0 : i32
    %c0_i32_1 = arith.constant 0 : i32
    return %arg0, %c0_i32, %c0_i32_0 : i32, i32, i32
  }
  func.func @transform_3(%arg0: i32) -> (i32, i32, i32) {
    %c0_i32 = arith.constant 0 : i32
    %c0_i32_0 = arith.constant 0 : i32
    %c0_i32_1 = arith.constant 0 : i32
    return %arg0, %c0_i32, %c0_i32_0 : i32, i32, i32
  }
}

module attributes {stable_mosaic.version = 11 : i64} {
  func.func @_fused_heads_kernel(%arg0: memref<2x256xbf16, #tpu.memory_space<vmem>>, %arg1: memref<2x256xbf16, #tpu.memory_space<vmem>>, %arg2: memref<256x512xbf16, #tpu.memory_space<vmem>>, %arg3: memref<1x512xf32, #tpu.memory_space<vmem>>, %arg4: memref<256x512xbf16, #tpu.memory_space<vmem>>, %arg5: memref<1x512xf32, #tpu.memory_space<vmem>>, %arg6: memref<512x512xbf16, #tpu.memory_space<vmem>>, %arg7: memref<1x512xf32, #tpu.memory_space<vmem>>, %arg8: memref<512x512xbf16, #tpu.memory_space<vmem>>, %arg9: memref<1x512xf32, #tpu.memory_space<vmem>>, %arg10: memref<2x512xf32, #tpu.memory_space<vmem>>, %arg11: memref<2x512xf32, #tpu.memory_space<vmem>>) attributes {dimension_semantics = [], scalar_prefetch = 0 : i64, scratch_operands = 0 : i64, tpu.core_type = #tpu.core_type<tc>} {
    %c0 = arith.constant 0 : index
    %c0_0 = arith.constant 0 : index
    %0 = vector.load %arg0[%c0, %c0_0] : memref<2x256xbf16, #tpu.memory_space<vmem>>, vector<2x256xbf16>
    %c0_1 = arith.constant 0 : index
    %c0_2 = arith.constant 0 : index
    %1 = vector.load %arg2[%c0_1, %c0_2] : memref<256x512xbf16, #tpu.memory_space<vmem>>, vector<256x512xbf16>
    %cst = arith.constant dense<0.000000e+00> : vector<2x512xf32>
    %2 = tpu.matmul %0, %1, %cst {dimension_numbers = #tpu.dot_dimension_numbers<[1], [0], [0], [1], [0, 0, 1, 1], [], []>} : vector<2x256xbf16>, vector<256x512xbf16>, vector<2x512xf32> -> vector<2x512xf32>
    %c0_3 = arith.constant 0 : index
    %c0_4 = arith.constant 0 : index
    %3 = vector.load %arg3[%c0_3, %c0_4] : memref<1x512xf32, #tpu.memory_space<vmem>>, vector<1x512xf32>
    %4 = vector.broadcast %3 : vector<1x512xf32> to vector<2x512xf32>
    %5 = arith.addf %2, %4 : vector<2x512xf32>
    %c0_5 = arith.constant 0 : index
    %c0_6 = arith.constant 0 : index
    %6 = vector.load %arg10[%c0_5, %c0_6] : memref<2x512xf32, #tpu.memory_space<vmem>>, vector<2x512xf32>
    tpu.vector_store %arg10[%c0_5, %c0_6], %5 {strides = array<i32>} : memref<2x512xf32, #tpu.memory_space<vmem>>, vector<2x512xf32>,
    %c0_7 = arith.constant 0 : index
    %c0_8 = arith.constant 0 : index
    %7 = vector.load %arg1[%c0_7, %c0_8] : memref<2x256xbf16, #tpu.memory_space<vmem>>, vector<2x256xbf16>
    %c0_9 = arith.constant 0 : index
    %c0_10 = arith.constant 0 : index
    %8 = vector.load %arg4[%c0_9, %c0_10] : memref<256x512xbf16, #tpu.memory_space<vmem>>, vector<256x512xbf16>
    %cst_11 = arith.constant dense<0.000000e+00> : vector<2x512xf32>
    %9 = tpu.matmul %7, %8, %cst_11 {dimension_numbers = #tpu.dot_dimension_numbers<[1], [0], [0], [1], [0, 0, 1, 1], [], []>} : vector<2x256xbf16>, vector<256x512xbf16>, vector<2x512xf32> -> vector<2x512xf32>
    %c0_12 = arith.constant 0 : index
    %c0_13 = arith.constant 0 : index
    %10 = vector.load %arg5[%c0_12, %c0_13] : memref<1x512xf32, #tpu.memory_space<vmem>>, vector<1x512xf32>
    %11 = vector.broadcast %10 : vector<1x512xf32> to vector<2x512xf32>
    %12 = arith.addf %9, %11 : vector<2x512xf32>
    %cst_14 = arith.constant 0.000000e+00 : f32
    %13 = vector.broadcast %cst_14 : f32 to vector<2x512xf32>
    %14 = arith.cmpf ogt, %12, %13 : vector<2x512xf32>
    %15 = math.exp %12 : vector<2x512xf32>
    %cst_15 = arith.constant 1.000000e+00 : f32
    %16 = vector.broadcast %cst_15 : f32 to vector<2x512xf32>
    %17 = arith.subf %15, %16 : vector<2x512xf32>
    %18 = arith.select %14, %12, %17 : vector<2x512xi1>, vector<2x512xf32>
    %19 = arith.truncf %18 : vector<2x512xf32> to vector<2x512xbf16>
    %c0_16 = arith.constant 0 : index
    %c0_17 = arith.constant 0 : index
    %20 = vector.load %arg6[%c0_16, %c0_17] : memref<512x512xbf16, #tpu.memory_space<vmem>>, vector<512x512xbf16>
    %cst_18 = arith.constant dense<0.000000e+00> : vector<2x512xf32>
    %21 = tpu.matmul %19, %20, %cst_18 {dimension_numbers = #tpu.dot_dimension_numbers<[1], [0], [0], [1], [0, 0, 1, 1], [], []>} : vector<2x512xbf16>, vector<512x512xbf16>, vector<2x512xf32> -> vector<2x512xf32>
    %c0_19 = arith.constant 0 : index
    %c0_20 = arith.constant 0 : index
    %22 = vector.load %arg7[%c0_19, %c0_20] : memref<1x512xf32, #tpu.memory_space<vmem>>, vector<1x512xf32>
    %23 = vector.broadcast %22 : vector<1x512xf32> to vector<2x512xf32>
    %24 = arith.addf %21, %23 : vector<2x512xf32>
    %cst_21 = arith.constant 0.000000e+00 : f32
    %25 = vector.broadcast %cst_21 : f32 to vector<2x512xf32>
    %26 = arith.cmpf ogt, %24, %25 : vector<2x512xf32>
    %27 = math.exp %24 : vector<2x512xf32>
    %cst_22 = arith.constant 1.000000e+00 : f32
    %28 = vector.broadcast %cst_22 : f32 to vector<2x512xf32>
    %29 = arith.subf %27, %28 : vector<2x512xf32>
    %30 = arith.select %26, %24, %29 : vector<2x512xi1>, vector<2x512xf32>
    %31 = arith.truncf %30 : vector<2x512xf32> to vector<2x512xbf16>
    %c0_23 = arith.constant 0 : index
    %c0_24 = arith.constant 0 : index
    %32 = vector.load %arg8[%c0_23, %c0_24] : memref<512x512xbf16, #tpu.memory_space<vmem>>, vector<512x512xbf16>
    %cst_25 = arith.constant dense<0.000000e+00> : vector<2x512xf32>
    %33 = tpu.matmul %31, %32, %cst_25 {dimension_numbers = #tpu.dot_dimension_numbers<[1], [0], [0], [1], [0, 0, 1, 1], [], []>} : vector<2x512xbf16>, vector<512x512xbf16>, vector<2x512xf32> -> vector<2x512xf32>
    %c0_26 = arith.constant 0 : index
    %c0_27 = arith.constant 0 : index
    %34 = vector.load %arg9[%c0_26, %c0_27] : memref<1x512xf32, #tpu.memory_space<vmem>>, vector<1x512xf32>
    %35 = vector.broadcast %34 : vector<1x512xf32> to vector<2x512xf32>
    %36 = arith.addf %33, %35 : vector<2x512xf32>
    %c0_28 = arith.constant 0 : index
    %c0_29 = arith.constant 0 : index
    %37 = vector.load %arg11[%c0_28, %c0_29] : memref<2x512xf32, #tpu.memory_space<vmem>>, vector<2x512xf32>
    tpu.vector_store %arg11[%c0_28, %c0_29], %36 {strides = array<i32>} : memref<2x512xf32, #tpu.memory_space<vmem>>, vector<2x512xf32>,
    return
  }
}

</mosaic_0001>

<bundles_post_ra>
// kernel: forward.5
= control target key start
LH: loop header
LB: loop body
LE: loop exit
PB: predicated region body
PF: predicated region fallthrough
CT: control target
= control target key end

     0   :  { %vm110_vm0 = vcmask 1043456   ;;  %vm111_vm1 = vcmask 1044480   ;;  %vm85_vm2 = vcmask 72704   ;;  %v516_v1 = vmov 65535   ;;  %s751_s1 = inlined_call_operand.vmem [shape: bf16[1,9,32], index: 1, kind: input, shape index: {}]   ;;  %s752_s0 = inlined_call_operand.vmem [shape: bf16[1,128,9], index: 0, kind: input, shape index: {}]   ;;  %s753_s2 = inlined_call_operand.vmem [shape: f32[1,1,32], index: 2, kind: input, shape index: {}]   ;;  %s754_s3 = inlined_call_operand.vmem [shape: bf16[1,128,32], index: 3, kind: output, shape index: {}]  }
   0x1   :  { %v475_v0 = vld [vmem:[%s751_s1] sm:$0x1f]   ;;  %v112_v2 = vsel %vm110_vm0, 4294967295, %v516_v1  ;;  %v478_v7 = vld [vmem:[%s752_s0 + $0x8] sm:$0xff]   ;;  %v480_v9 = vld [vmem:[%s752_s0 + $0x10] sm:$0xff]   ;;  %vm358_vm3 = vcmask 257024  }
   0x2   :  { %v476_v3 = vld [vmem:[%s752_s0] sm:$0xff]   ;;  %v113_v4 = vsel %vm111_vm1, %v112_v2, 0  ;;  %v479_v8 = vld [vmem:[%s752_s0 + $0x28] sm:$0xff]   ;;  %v481_v10 = vld [vmem:[%s752_s0 + $0x30] sm:$0xff]  }
   0x3   :  { %v477_v5 = vld [vmem:[%s752_s0 + $0x20] sm:$0xff]   ;;  %v115_v6 = vand.u32 %v475_v0, %v113_v4  ;;  %456 = vmatprep.mubr.msk.bf16.mxu0 %vm85_vm2, %v476_v3  ;;  %v482_v11 = vld [vmem:[%s752_s0 + $0x18] sm:$0xff]  }
   0x4   :  { %464 = vmatprep.mubr.msk.bf16.mxu1 %vm85_vm2, %v477_v5  ;;  %v483_v12 = vld [vmem:[%s752_s0 + $0x38] sm:$0xff]   ;;  %v575_v13 = vld [vmem:[%s753_s2] ss:$0 sm:$0xff] }
   0x5   :  { %454 = vmatprep.subr.bf16.mxu0 %v115_v6  ;;  %472 = vmatprep.subr.bf16.mxu1 %v115_v6 }
   0x6   :  { %455 = vmatpush3.bf16.msra.mxu0 %v115_v6  ;;  %473 = vmatpush3.bf16.msra.mxu1 %v115_v6 }
   0x9   :  { %457 = vmatmul.mubr.msk.bf16.vlgmr.msra.gmra.mrb[0].mxu0 %vm85_vm2, %v478_v7  ;;  %465 = vmatmul.mubr.msk.bf16.vlgmr.msra.gmra.mrb[0].mxu1 %vm85_vm2, %v479_v8 }
   0xa   :  { %460 = vmatprep.mubr.msk.bf16.mxu0 %vm85_vm2, %v480_v9  ;;  %468 = vmatprep.mubr.msk.bf16.mxu1 %vm85_vm2, %v481_v10 }
  0x11   :  { %461 = vmatmul.mubr.msk.bf16.gmra.mrb[4].mxu0 %vm85_vm2, %v482_v11  ;;  %469 = vmatmul.mubr.msk.bf16.gmra.mrb[4].mxu1 %vm85_vm2, %v483_v12 }
  0xdc   :  { %v458_v14 = vpop.f32.mrb[0].mxu0  ;;  %v466_v15 = vpop.f32.mrb[0].mxu1 }
  0xdd   :  { %v578_v16 = vadd.f32 %v458_v14, %v575_v13  ;;  %v581_v17 = vadd.f32 %v466_v15, %v575_v13  ;;  %v151_v18 = vpop.f32.mrb[1].mxu0  ;;  %v183_v19 = vpop.f32.mrb[1].mxu1 }
  0xde   :  { %v584_v20 = vadd.f32 %v575_v13, %v151_v18  ;;  %v587_v21 = vadd.f32 %v575_v13, %v183_v19  ;;  %v459_v22 = vpop.f32.mrb[2].mxu0  ;;  %v467_v23 = vpop.f32.mrb[2].mxu1 }
  0xdf   :  { %v234_v24 = vmul.f32 1.442695, %v578_v16  ;;  %v250_v25 = vmul.f32 1.442695, %v581_v17  ;;  %v594_v28 = vadd.f32 %v459_v22, %v575_v13  ;;  %v597_v29 = vadd.f32 %v467_v23, %v575_v13  ;;  %v154_v30 = vpop.f32.mrb[3].mxu0  ;;  %v186_v31 = vpop.f32.mrb[3].mxu1 }
  0xe0   :  { %v230_v26 = vmul.f32 1.442695, %v584_v20  ;;  %v246_v27 = vmul.f32 1.442695, %v587_v21  ;;  %v600_v32 = vadd.f32 %v575_v13, %v154_v30  ;;  %v603_v33 = vadd.f32 %v575_v13, %v186_v31 }
  0xe1   :  { %484 = vpow2.f32 %v234_v24  ;;  %v236_v34 = vmul.f32 1.442695, %v594_v28  ;;  %v252_v35 = vmul.f32 1.442695, %v597_v29  ;;  %vm216_vm4 = vcmp.gt.f32.partialorder %v578_v16, 0.0 }
  0xe2   :  { %486 = vpow2.f32 %v250_v25  ;;  %v232_v36 = vmul.f32 1.442695, %v600_v32  ;;  %v248_v38 = vmul.f32 1.442695, %v603_v33  ;;  %vm224_vm5 = vcmp.gt.f32.partialorder %v581_v17, 0.0 }
  0xe3   :  { %488 = vpow2.f32 %v230_v26  ;;  %vm214_vm6 = vcmp.gt.f32.partialorder %v584_v20, 0.0  ;;  %vm222_vm7 = vcmp.gt.f32.partialorder %v587_v21, 0.0  ;;  %vm217_vm8 = vcmp.gt.f32.partialorder %v594_v28, 0.0 }
  0xe4   :  { %490 = vpow2.f32 %v246_v27  ;;  %v462_v37 = vpop.f32.mrb[4].mxu0  ;;  %v470_v40 = vpop.f32.mrb[4].mxu1  ;;  %vm225_vm9 = vcmp.gt.f32.partialorder %v597_v29, 0.0  ;;  %vm215_vm10 = vcmp.gt.f32.partialorder %v600_v32, 0.0  ;;  %vm223_vm11 = vcmp.gt.f32.partialorder %v603_v33, 0.0 }
  0xe5   :  { %492 = vpow2.f32 %v236_v34  ;;  %v610_v39 = vadd.f32 %v462_v37, %v575_v13  ;;  %v167_v41 = vpop.f32.mrb[5].mxu0  ;;  %v613_v42 = vadd.f32 %v470_v40, %v575_v13  ;;  %v199_v44 = vpop.f32.mrb[5].mxu1 }
  0xe6   :  { %494 = vpow2.f32 %v252_v35  ;;  %v616_v43 = vadd.f32 %v575_v13, %v167_v41  ;;  %v463_v45 = vpop.f32.mrb[6].mxu0  ;;  %v620_v47 = vadd.f32 %v575_v13, %v199_v44  ;;  %v471_v48 = vpop.f32.mrb[6].mxu1 }
  0xe7   :  { %496 = vpow2.f32 %v232_v36  ;;  %v242_v46 = vmul.f32 1.442695, %v610_v39  ;;  %v170_v49 = vpop.f32.mrb[7].mxu0  ;;  %v258_v50 = vmul.f32 1.442695, %v613_v42  ;;  %v202_v51 = vpop.f32.mrb[7].mxu1  ;;  %v627_v54 = vadd.f32 %v463_v45, %v575_v13 }
  0xe8   :  { %498 = vpow2.f32 %v248_v38  ;;  %v238_v52 = vmul.f32 1.442695, %v616_v43  ;;  %v254_v53 = vmul.f32 1.442695, %v620_v47  ;;  %v630_v55 = vadd.f32 %v471_v48, %v575_v13 }
  0xe9   :  { %500 = vpow2.f32 %v242_v46  ;;  %v633_v56 = vadd.f32 %v575_v13, %v170_v49  ;;  %v244_v60 = vmul.f32 1.442695, %v627_v54  ;;  %v643_v0 = vadd.f32 %v575_v13, %v202_v51 }
  0xea   :  { %502 = vpow2.f32 %v258_v50  ;;  %v260_v63 = vmul.f32 1.442695, %v630_v55  ;;  %vm220_vm12 = vcmp.gt.f32.partialorder %v610_v39, 0.0  ;;  %vm228_vm13 = vcmp.gt.f32.partialorder %v613_v42, 0.0 }
  0xeb   :  { %v485_v57 = vpop.eup %484  ;;  %504 = vpow2.f32 %v238_v52  ;;  %v240_v4 = vmul.f32 1.442695, %v633_v56  ;;  %v256_v22 = vmul.f32 1.442695, %v643_v0  ;;  %vm218_vm14 = vcmp.gt.f32.partialorder %v616_v43, 0.0 }
  0xec   :  { %v487_v58 = vpop.eup %486  ;;  %v399_v59 = vadd.f32 -1.0, %v485_v57  ;;  %506 = vpow2.f32 %v254_v53  ;;  %vm226_vm15 = vcmp.gt.f32.partialorder %v620_v47, 0.0  ;;  %vm221_vm0 = vcmp.gt.f32.partialorder %v627_v54, 0.0 }
  0xed   :  { %v489_v61 = vpop.eup %488  ;;  %v407_v62 = vadd.f32 -1.0, %v487_v58  ;;  %508 = vpow2.f32 %v244_v60  ;;  %vm229_vm1 = vcmp.gt.f32.partialorder %v630_v55, 0.0  ;;  %vm219_vm2 = vcmp.gt.f32.partialorder %v633_v56, 0.0 }
  0xee   :  { %v491_v1 = vpop.eup %490  ;;  %v280_v2 = vsel %vm216_vm4, %v578_v16, %v399_v59  ;;  %v397_v3 = vadd.f32 -1.0, %v489_v61  ;;  %510 = vpow2.f32 %v260_v63  ;;  %vm227_vm4 = vcmp.gt.f32.partialorder %v643_v0, 0.0 }
  0xef   :  { %v493_v5 = vpop.eup %492  ;;  %v431_v6 = vpack.c.bf16 %v280_v2, %v280_v2  ;;  %v288_v7 = vsel %vm224_vm5, %v581_v17, %v407_v62  ;;  %v405_v8 = vadd.f32 -1.0, %v491_v1  ;;  %512 = vpow2.f32 %v240_v4 }
  0xf0   :  { %v495_v9 = vpop.eup %494  ;;  %v439_v10 = vpack.c.bf16 %v288_v7, %v288_v7  ;;  %v278_v11 = vsel %vm214_vm6, %v584_v20, %v397_v3  ;;  %v400_v12 = vadd.f32 -1.0, %v493_v5  ;;  %514 = vpow2.f32 %v256_v22 }
  0xf1   :  { %v497_v13 = vpop.eup %496  ;;  %361 = vst.msk [vmem:[%s754_s3 + $0x8] sm:$0xf] %vm358_vm3, %v431_v6  ;;  %v429_v14 = vpack.c.bf16 %v278_v11, %v278_v11  ;;  %v286_v15 = vsel %vm222_vm7, %v587_v21, %v405_v8  ;;  %v408_v16 = vadd.f32 -1.0, %v495_v9 }
  0xf2   :  { %v499_v17 = vpop.eup %498  ;;  %369 = vst.msk [vmem:[%s754_s3 + $0x28] sm:$0xf] %vm358_vm3, %v439_v10  ;;  %v437_v18 = vpack.c.bf16 %v286_v15, %v286_v15  ;;  %v281_v19 = vsel %vm217_vm8, %v594_v28, %v400_v12  ;;  %v398_v20 = vadd.f32 -1.0, %v497_v13 }
  0xf3   :  { %v501_v23 = vpop.eup %500  ;;  %359 = vst.msk [vmem:[%s754_s3] sm:$0xf] %vm358_vm3, %v429_v14  ;;  %v432_v21 = vpack.c.bf16 %v281_v19, %v281_v19  ;;  %v289_v24 = vsel %vm225_vm9, %v597_v29, %v408_v16  ;;  %v406_v25 = vadd.f32 -1.0, %v499_v17 }
  0xf4   :  { %v503_v26 = vpop.eup %502  ;;  %367 = vst.msk [vmem:[%s754_s3 + $0x20] sm:$0xf] %vm358_vm3, %v437_v18  ;;  %v440_v27 = vpack.c.bf16 %v289_v24, %v289_v24  ;;  %v279_v28 = vsel %vm215_vm10, %v600_v32, %v398_v20  ;;  %v403_v30 = vadd.f32 -1.0, %v501_v23 }
  0xf5   :  { %v505_v31 = vpop.eup %504  ;;  %362 = vst.msk [vmem:[%s754_s3 + $0xc] sm:$0xf] %vm358_vm3, %v432_v21  ;;  %v430_v29 = vpack.c.bf16 %v279_v28, %v279_v28  ;;  %v287_v34 = vsel %vm223_vm11, %v603_v33, %v406_v25  ;;  %v411_v35 = vadd.f32 -1.0, %v503_v26 }
  0xf6   :  { %v507_v36 = vpop.eup %506  ;;  %370 = vst.msk [vmem:[%s754_s3 + $0x2c] sm:$0xf] %vm358_vm3, %v440_v27  ;;  %v438_v32 = vpack.c.bf16 %v287_v34, %v287_v34  ;;  %v284_v37 = vsel %vm220_vm12, %v610_v39, %v403_v30  ;;  %v401_v38 = vadd.f32 -1.0, %v505_v31 }
  0xf7   :  { %360 = vst.msk [vmem:[%s754_s3 + $0x4] sm:$0xf] %vm358_vm3, %v430_v29  ;;  %v435_v33 = vpack.c.bf16 %v284_v37, %v284_v37  ;;  %v292_v40 = vsel %vm228_vm13, %v613_v42, %v411_v35  ;;  %v409_v41 = vadd.f32 -1.0, %v507_v36  ;;  %v509_v44 = vpop.eup %508 }
  0xf8   :  { %368 = vst.msk [vmem:[%s754_s3 + $0x24] sm:$0xf] %vm358_vm3, %v438_v32  ;;  %v443_v39 = vpack.c.bf16 %v292_v40, %v292_v40  ;;  %v282_v45 = vsel %vm218_vm14, %v616_v43, %v401_v38  ;;  %v511_v46 = vpop.eup %510  ;;  %v404_v49 = vadd.f32 -1.0, %v509_v44 }
  0xf9   :  { %365 = vst.msk [vmem:[%s754_s3 + $0x18] sm:$0xf] %vm358_vm3, %v435_v33  ;;  %v433_v42 = vpack.c.bf16 %v282_v45, %v282_v45  ;;  %v290_v48 = vsel %vm226_vm15, %v620_v47, %v409_v41  ;;  %v513_v50 = vpop.eup %512  ;;  %v412_v43 = vadd.f32 -1.0, %v511_v46 }
  0xfa   :  { %373 = vst.msk [vmem:[%s754_s3 + $0x38] sm:$0xf] %vm358_vm3, %v443_v39  ;;  %v441_v51 = vpack.c.bf16 %v290_v48, %v290_v48  ;;  %v285_v52 = vsel %vm221_vm0, %v627_v54, %v404_v49  ;;  %v402_v47 = vadd.f32 -1.0, %v513_v50  ;;  %v515_v60 = vpop.eup %514 }
  0xfb   :  { %363 = vst.msk [vmem:[%s754_s3 + $0x10] sm:$0xf] %vm358_vm3, %v433_v42  ;;  %v436_v53 = vpack.c.bf16 %v285_v52, %v285_v52  ;;  %v293_v57 = vsel %vm229_vm1, %v630_v55, %v412_v43  ;;  %v410_v61 = vadd.f32 -1.0, %v515_v60 }
  0xfc   :  { %371 = vst.msk [vmem:[%s754_s3 + $0x30] sm:$0xf] %vm358_vm3, %v441_v51  ;;  %v444_v58 = vpack.c.bf16 %v293_v57, %v293_v57  ;;  %v283_v59 = vsel %vm219_vm2, %v633_v56, %v402_v47 }
  0xfd   :  { %366 = vst.msk [vmem:[%s754_s3 + $0x1c] sm:$0xf] %vm358_vm3, %v436_v53  ;;  %v434_v54 = vpack.c.bf16 %v283_v59, %v283_v59  ;;  %v291_v55 = vsel %vm227_vm4, %v643_v0, %v410_v61 }
  0xfe   :  { %374 = vst.msk [vmem:[%s754_s3 + $0x3c] sm:$0xf] %vm358_vm3, %v444_v58  ;;  %v442_v56 = vpack.c.bf16 %v291_v55, %v291_v55 }
  0xff   :  { %364 = vst.msk [vmem:[%s754_s3 + $0x14] sm:$0xf] %vm358_vm3, %v434_v54 }
 0x100   :  { %372 = vst.msk [vmem:[%s754_s3 + $0x34] sm:$0xf] %vm358_vm3, %v442_v56 }

// kernel: forward.6
= control target key start
LH: loop header
LB: loop body
LE: loop exit
PB: predicated region body
PF: predicated region fallthrough
CT: control target
= control target key end

     0   :  { %s602_s12 = smov 0   ;;  %s652_s0 = inlined_call_operand.vmem [shape: bf16[2,32,144], index: 0, kind: input, shape index: {}]   ;;  %s653_s1 = inlined_call_operand.vmem [shape: bf16[2,144,32], index: 1, kind: input, shape index: {}]   ;;  %s654_s2 = inlined_call_operand.vmem [shape: f32[2,1,32], index: 2, kind: input, shape index: {}]   ;;  %s655_s3 = inlined_call_operand.vmem [shape: bf16[2,32,32], index: 3, kind: output, shape index: {}]  }
   0x1 LB: > { %s480_s13 = sadd.s32 4294967295, %s579_s12   ;;  %p484_p0 = scmp.ge.s32.totalorder %s579_s12, 1  ;;  %s579_s12 = sphi %s602_s12, %s13_s12  }
   0x2   : > { %p155_p1 = scmp.lt.s32.totalorder %s579_s12, 3 }
   0x4   : > { %p156_p2 = pnand %p484_p0, %p155_p1 }
   0x5   : > { %p187_p3 = scmp.lt.s32.totalorder (!%p156_p2), %s480_s13, 1  ;;  %v581_v0 = vmov (!%p156_p2), 0   ;;  %vm307_vm0 = vcmask (!%p156_p2), 130048   ;;  %vm399_vm2 = vcmask (!%p156_p2), 257024  }
   0x6   : > { %159 = sbr.rel (%p156_p2) target bundleno = 289 (0x121), region = 32  ;;  %314 = vmatprep.subr.bf16.mxu0 (!%p156_p2), %v581_v0  ;;  %522 = vmatprep.subr.bf16.mxu1 (!%p156_p2), %v581_v0 }
   0xd   : > { %s657_s13 = smov (!%p187_p3, %s480_s13), 1 }
   0xe   : > { %s540_s14 = smul.u32 72, %s657_s13  ;;  %s516_s15 = sshll.u32 %s657_s13, 5 }
   0xf   : > { %s617_s18 = scalar_lea.vmem %s652_s0, %s516_s15  ;;  %s199_s24 = scalar_lea.vmem %s654_s2, %s657_s13 }
  0x10   : > { %s622_s21 = scalar_lea.vmem %s653_s1, %s540_s14  ;;  %v561_v4 = vld [vmem:[%s617_s18 + $0x4] ss:$8 sps:$4 sm:$0xff]   ;;  %v564_v6 = vld [vmem:[%s617_s18 + $0x14] ss:$8 sps:$4 sm:$0xff]   ;;  %v559_v12 = vld [vmem:[%s617_s18] ss:$8 sps:$4 sm:$0xff]  }
  0x11   : > { %v550_v1 = vld [vmem:[%s622_s21] sm:$0xff]   ;;  %v551_v2 = vld [vmem:[%s622_s21 + $0x8] sm:$0xff]   ;;  %v552_v3 = vld [vmem:[%s622_s21 + $0x10] sm:$0xff]   ;;  %504 = vmatprep.mubr.msk.bf16.mxu0 %vm307_vm0, %v561_v4  ;;  %505 = vmatprep.mubr.msk.bf16.mxu1 %vm307_vm0, %v564_v6  ;;  %s517_s25 = sshll.u32 %s657_s13, 4 }
  0x12   : > { %315 = vmatpush1.bf16.msra.mxu0 %v550_v1  ;;  %531 = vmatpush1.bf16.msra.mxu1 %v550_v1  ;;  %v553_v5 = vld [vmem:[%s622_s21 + $0x18] sm:$0xff]   ;;  %v554_v7 = vld [vmem:[%s622_s21 + $0x20] sm:$0xff]   ;;  %v555_v8 = vld [vmem:[%s622_s21 + $0x28] sm:$0xff]   ;;  %s204_s28 = scalar_lea.vmem %s655_s3, %s517_s25 }
  0x13   : > { %316 = vmatprep.subr.bf16.mxu0 %v581_v0  ;;  %523 = vmatprep.subr.bf16.mxu1 %v581_v0  ;;  %v556_v9 = vld [vmem:[%s622_s21 + $0x30] sm:$0xff]   ;;  %v557_v10 = vld [vmem:[%s622_s21 + $0x38] sm:$0xff]   ;;  %v558_v11 = vld [vmem:[%s622_s21 + $0x40] sm:$0xff]  }
  0x14   : > { %v562_v13 = vld [vmem:[%s617_s18 + $0x10] ss:$8 sps:$4 sm:$0xff]   ;;  %v490_v14 = vld [vmem:[%s199_s24] ss:$0 sm:$0xff] }
  0x16   : > { %317 = vmatpush1.bf16.msra.mxu0 %v551_v2  ;;  %532 = vmatpush1.bf16.msra.mxu1 %v551_v2 }
  0x17   : > { %318 = vmatprep.subr.bf16.mxu0 %v581_v0  ;;  %524 = vmatprep.subr.bf16.mxu1 %v581_v0 }
  0x1a   : > { %319 = vmatpush1.bf16.msra.mxu0 %v552_v3  ;;  %533 = vmatpush1.bf16.msra.mxu1 %v552_v3 }
  0x1b   : > { %320 = vmatprep.subr.bf16.mxu0 %v581_v0  ;;  %525 = vmatprep.subr.bf16.mxu1 %v581_v0 }
  0x1e   : > { %321 = vmatpush1.bf16.msra.mxu0 %v553_v5  ;;  %534 = vmatpush1.bf16.msra.mxu1 %v553_v5 }
  0x1f   : > { %322 = vmatprep.subr.bf16.mxu0 %v581_v0  ;;  %526 = vmatprep.subr.bf16.mxu1 %v581_v0 }
  0x22   : > { %323 = vmatpush1.bf16.msra.mxu0 %v554_v7  ;;  %535 = vmatpush1.bf16.msra.mxu1 %v554_v7 }
  0x23   : > { %324 = vmatprep.subr.bf16.mxu0 %v581_v0  ;;  %527 = vmatprep.subr.bf16.mxu1 %v581_v0 }
  0x26   : > { %325 = vmatpush1.bf16.msra.mxu0 %v555_v8  ;;  %536 = vmatpush1.bf16.msra.mxu1 %v555_v8 }
  0x27   : > { %326 = vmatprep.subr.bf16.mxu0 %v581_v0  ;;  %528 = vmatprep.subr.bf16.mxu1 %v581_v0 }
  0x2a   : > { %327 = vmatpush1.bf16.msra.mxu0 %v556_v9  ;;  %537 = vmatpush1.bf16.msra.mxu1 %v556_v9 }
  0x2b   : > { %328 = vmatprep.subr.bf16.mxu0 %v581_v0  ;;  %529 = vmatprep.subr.bf16.mxu1 %v581_v0 }
  0x2e   : > { %329 = vmatpush1.bf16.msra.mxu0 %v557_v10  ;;  %538 = vmatpush1.bf16.msra.mxu1 %v557_v10 }
  0x2f   : > { %330 = vmatprep.subr.bf16.mxu0 %v581_v0  ;;  %530 = vmatprep.subr.bf16.mxu1 %v581_v0 }
  0x32   : > { %331 = vmatpush1.bf16.msra.mxu0 %v558_v11  ;;  %539 = vmatpush1.bf16.msra.mxu1 %v558_v11 }
  0x35   : > { %347 = vmatmul.mubr.bf16.vlgmr.msra.gmra.mrb[0].mxu0 %v559_v12  ;;  %355 = vmatmul.mubr.bf16.vlgmr.msra.gmra.mrb[0].mxu1 %v562_v13 }
 0x108   : > { %v348_v15 = vpop.f32.mrb[0].mxu0  ;;  %v356_v16 = vpop.f32.mrb[0].mxu1 }
 0x109   : > { %v349_v17 = vadd.f32 %v490_v14, %v348_v15  ;;  %v357_v18 = vadd.f32 %v490_v14, %v356_v16  ;;  %v350_v19 = vpop.f32.mrb[1].mxu0  ;;  %v358_v20 = vpop.f32.mrb[1].mxu1 }
 0x10a   : > { %v351_v21 = vpop.f32.mrb[2].mxu0  ;;  %v359_v22 = vpop.f32.mrb[2].mxu1 }
 0x10b   : > { %v367_v23 = vmul.f32 1.442695, %v349_v17  ;;  %v371_v24 = vmul.f32 1.442695, %v357_v18  ;;  %v352_v25 = vadd.f32 %v490_v14, %v351_v21  ;;  %v360_v26 = vadd.f32 %v490_v14, %v359_v22  ;;  %v353_v27 = vpop.f32.mrb[3].mxu0  ;;  %v361_v28 = vpop.f32.mrb[3].mxu1 }
 0x10c   : > { %vm363_vm1 = vcmp.gt.f32.partialorder %v349_v17, 0.0  ;;  %vm365_vm3 = vcmp.gt.f32.partialorder %v357_v18, 0.0 }
 0x10d   : > { %565 = vpow2.f32 %v367_v23  ;;  %v369_v29 = vmul.f32 1.442695, %v352_v25  ;;  %v373_v30 = vmul.f32 1.442695, %v360_v26  ;;  %vm364_vm4 = vcmp.gt.f32.partialorder %v352_v25, 0.0 }
 0x10e   : > { %567 = vpow2.f32 %v371_v24  ;;  %vm366_vm5 = vcmp.gt.f32.partialorder %v360_v26, 0.0 }
 0x10f   : > { %569 = vpow2.f32 %v369_v29 }
 0x110   : > { %571 = vpow2.f32 %v373_v30 }
 0x117   : > { %v566_v31 = vpop.eup %565 }
 0x118   : > { %v568_v32 = vpop.eup %567  ;;  %v506_v33 = vadd.f32 -1.0, %v566_v31 }
 0x119   : > { %v508_v34 = vadd.f32 -1.0, %v568_v32  ;;  %v570_v35 = vpop.eup %569 }
 0x11a   : > { %v379_v36 = vsel %vm363_vm1, %v349_v17, %v506_v33  ;;  %v572_v37 = vpop.eup %571  ;;  %v507_v40 = vadd.f32 -1.0, %v570_v35 }
 0x11b   : > { %v518_v38 = vpack.c.bf16 %v379_v36, %v379_v36  ;;  %v381_v39 = vsel %vm365_vm3, %v357_v18, %v508_v34  ;;  %v509_v42 = vadd.f32 -1.0, %v572_v37 }
 0x11c   : > { %v520_v41 = vpack.c.bf16 %v381_v39, %v381_v39  ;;  %v380_v43 = vsel %vm364_vm4, %v352_v25, %v507_v40 }
 0x11d   : > { %400 = vst.msk [vmem:[%s204_s28] sm:$0xf] %vm399_vm2, %v518_v38  ;;  %v519_v44 = vpack.c.bf16 %v380_v43, %v380_v43  ;;  %v382_v45 = vsel %vm366_vm5, %v360_v26, %v509_v42 }
 0x11e   : > { %402 = vst.msk [vmem:[%s204_s28 + $0x8] sm:$0xf] %vm399_vm2, %v520_v41  ;;  %v521_v46 = vpack.c.bf16 %v382_v45, %v382_v45 }
 0x11f   : > { %401 = vst.msk [vmem:[%s204_s28 + $0x4] sm:$0xf] %vm399_vm2, %v519_v44 }
 0x120   : > { %403 = vst.msk [vmem:[%s204_s28 + $0xc] sm:$0xf] %vm399_vm2, %v521_v46 }
 0x121 PF: > { %s13_s12 = sadd.s32 1, %s579_s12  }
 0x122   : > { %p10_p4 = scmp.ge.s32.totalorder %s13_s12, 4  }
 0x124   :  { %12 = sbr.rel (!%p10_p4) target bundleno = 1 (0x1), region = 68 }

// kernel: squeeze.13
= control target key start
LH: loop header
LB: loop body
LE: loop exit
PB: predicated region body
PF: predicated region fallthrough
CT: control target
= control target key end

     0   :  { %vm19_vm0 = vcmask 523264   ;;  %vm27_vm1 = vcmask 1048064   ;;  %v49_v7 = vmov 0.0   ;;  %s69_s0 = inlined_call_operand.vmem [shape: bf16[1,8,64], index: 0, kind: input, shape index: {}]   ;;  %s70_s1 = inlined_call_operand.vmem [shape: bf16[2,256], index: 1, kind: output, shape index: {}]  }
   0x1   :  { %v14_v0 = vld [vmem:[%s69_s0] sm:$0xf]  ;;  %s48_s0 = smov 64  }
   0x2   :  { %v15_v1 = vunpack.c.l.bf16 %v14_v0 }
   0x4   :  { %17 = vst [vmem:[#allocation1] sm:$0xff] %v15_v1 }
   0xb   :  { %v18_v2 = vld [vmem:[#allocation1] ss:$2 sm:$0xf]   ;;  %v24_v3 = vld.sshfl [vmem:[#allocation1 + $0x1] sm:$0xff pattern:$0x66666240]  }
   0xc   :  { %25 = vrot.lane.b32.xlu0 %v24_v3, %s48_s0  ;;  %20 = vst.msk [vmem:[#allocation0] ss:$8 sm:$0x3] %vm19_vm0, %v18_v2   ;;  %22 = vst.msk [vmem:[#allocation0 - $0xf] ss:$8 sm:$0xc] %vm19_vm0, %v18_v2  }
  0x7e   :  { %v26_v4 = vpop.permute.xlu0 %25  }
  0x7f   :  { %28 = vst.msk [vmem:[#allocation0] sm:$0x3] %vm27_vm1, %v26_v4   ;;  %30 = vst.msk [vmem:[#allocation0 + $0x6] sm:$0xc] %vm27_vm1, %v26_v4  }
  0x86   :  { %v35_v5 = vld [vmem:[#allocation0] sm:$0x3]  ;;  %v40_v6 = vld [vmem:[#allocation0 + $0x8] sm:$0x3] }
  0x87   :  { %v36_v8 = vpack.c.bf16 %v49_v7, %v35_v5  ;;  %v41_v9 = vpack.c.bf16 %v49_v7, %v40_v6 }
  0x89   :  { %38 = vst [vmem:[%s70_s1] sm:$0x1] %v36_v8  ;;  %45 = vst [vmem:[%s70_s1 + $0x1] sm:$0x1] %v41_v9 }

// kernel: forward.7
= control target key start
LH: loop header
LB: loop body
LE: loop exit
PB: predicated region body
PF: predicated region fallthrough
CT: control target
= control target key end

     0   :  { %s665_s12 = smov 0   ;;  %s714_s0 = inlined_call_operand.vmem [shape: bf16[2,8,288], index: 0, kind: input, shape index: {}]   ;;  %s715_s1 = inlined_call_operand.vmem [shape: bf16[2,288,64], index: 1, kind: input, shape index: {}]   ;;  %s716_s2 = inlined_call_operand.vmem [shape: f32[2,1,64], index: 2, kind: input, shape index: {}]   ;;  %s717_s3 = inlined_call_operand.vmem [shape: bf16[2,8,64], index: 3, kind: output, shape index: {}]  }
   0x1 LB: > { %s533_s13 = sadd.s32 4294967295, %s641_s12   ;;  %p537_p0 = scmp.ge.s32.totalorder %s641_s12, 1  ;;  %s641_s12 = sphi %s665_s12, %s13_s12  }
   0x2   : > { %p155_p1 = scmp.lt.s32.totalorder %s641_s12, 3 }
   0x4   : > { %p156_p2 = pnand %p537_p0, %p155_p1 }
   0x5   : > { %p186_p3 = scmp.lt.s32.totalorder (!%p156_p2), %s533_s13, 1  ;;  %v643_v0 = vmov (!%p156_p2), 0.0   ;;  %vm644_vm0 = vmmov (!%p156_p2), 0   ;;  %vm367_vm1 = vcmask (!%p156_p2), 261120   ;;  %vm457_vm3 = vcmask (!%p156_p2), 519168  }
   0x6   : > { %159 = sbr.rel (%p156_p2) target bundleno = 288 (0x120), region = 32  ;;  %592 = vmatprep.subr.bf16.mxu1 (!%p156_p2), %v643_v0  ;;  %596 = vmatprep.mubr.msk.bf16.mxu1 (!%p156_p2), %vm644_vm0, %v643_v0 }
   0xd   : > { %s719_s13 = smov (!%p186_p3, %s533_s13), 1 }
   0xe   : > { %s601_s14 = smul.u32 144, %s719_s13  ;;  %s198_s24 = scalar_lea.vmem %s716_s2, %s719_s13 }
   0xf   : > { %s600_s18 = smul.u32 12, %s719_s13  ;;  %v541_v29 = vld [vmem:[%s198_s24] ss:$0 sm:$0xff]  ;;  %s540_s25 = sshll.u32 %s719_s13, 2 }
  0x10   : > { %s679_s17 = scalar_lea.vmem %s715_s1, %s601_s14  ;;  %s202_s28 = scalar_lea.vmem %s717_s3, %s540_s25 }
  0x11   : > { %v612_v1 = vld [vmem:[%s679_s17 + $0x40] sm:$0xff]   ;;  %v614_v3 = vld [vmem:[%s679_s17 + $0x48] sm:$0xff]   ;;  %v616_v5 = vld [vmem:[%s679_s17 + $0x50] sm:$0xff]   ;;  %s190_s21 = scalar_lea.vmem %s714_s0, %s600_s18 }
  0x12   : > { %v613_v2 = vld [vmem:[%s679_s17] sm:$0xff]   ;;  %567 = vmatprep.subr.bf16.mxu0 %v612_v1  ;;  %v615_v4 = vld [vmem:[%s679_s17 + $0x8] sm:$0xff]   ;;  %v617_v6 = vld [vmem:[%s679_s17 + $0x10] sm:$0xff]  }
  0x13   : > { %568 = vmatpush3.bf16.msra.mxu0 %v613_v2  ;;  %v618_v7 = vld [vmem:[%s679_s17 + $0x58] sm:$0xff]   ;;  %v620_v9 = vld [vmem:[%s679_s17 + $0x60] sm:$0xff]   ;;  %v622_v12 = vld [vmem:[%s679_s17 + $0x68] sm:$0xff]  }
  0x14   : > { %569 = vmatprep.subr.bf16.mxu0 %v614_v3  ;;  %v619_v8 = vld [vmem:[%s679_s17 + $0x18] sm:$0xff]   ;;  %v626_v10 = vld [vmem:[%s679_s17 + $0x80] sm:$0xff]   ;;  %v632_v15 = vld [vmem:[%s679_s17 + $0x88] sm:$0xff]  }
  0x15   : > { %v621_v11 = vld [vmem:[%s679_s17 + $0x20] sm:$0xff]   ;;  %593 = vmatpush3.bf16.msra.mxu1 %v626_v10  ;;  %v623_v16 = vld [vmem:[%s679_s17 + $0x28] sm:$0xff]   ;;  %v624_v17 = vld [vmem:[%s679_s17 + $0x70] sm:$0xff]  }
  0x16   : > { %594 = vmatprep.subr.bf16.mxu1 %v643_v0  ;;  %v204_v13 = vld [vmem:[%s190_s21] sm:$0xff]  ;;  %v631_v18 = vld [vmem:[%s190_s21 + $0x8] ss:$0 sps:$4 sm:$0xff]   ;;  %v625_v19 = vld [vmem:[%s679_s17 + $0x30] sm:$0xff]  }
  0x17   : > { %570 = vmatpush3.bf16.msra.mxu0 %v615_v4  ;;  %v543_v14 = vcombine.high %v204_v13, %v204_v13  ;;  %v627_v20 = vld [vmem:[%s679_s17 + $0x78] sm:$0xff]   ;;  %v542_v22 = vcombine.low %v204_v13, %v204_v13 }
  0x18   : > { %571 = vmatprep.subr.bf16.mxu0 %v616_v5  ;;  %v628_v21 = vld [vmem:[%s679_s17 + $0x38] sm:$0xff]  }
  0x19   : > { %403 = vmatprep.mubr.bf16.mxu0 %v543_v14  ;;  %595 = vmatpush3.bf16.msra.mxu1 %v632_v15 }
  0x1b   : > { %572 = vmatpush3.bf16.msra.mxu0 %v617_v6 }
  0x1c   : > { %573 = vmatprep.subr.bf16.mxu0 %v618_v7  ;;  %597 = vmatmul.mubr.msk.bf16.vlgmr.msra.gmra.mrb[0].mxu1 %vm367_vm1, %v631_v18 }
  0x1f   : > { %574 = vmatpush3.bf16.msra.mxu0 %v619_v8 }
  0x20   : > { %575 = vmatprep.subr.bf16.mxu0 %v620_v9 }
  0x23   : > { %576 = vmatpush3.bf16.msra.mxu0 %v621_v11 }
  0x24   : > { %577 = vmatprep.subr.bf16.mxu0 %v622_v12 }
  0x27   : > { %578 = vmatpush3.bf16.msra.mxu0 %v623_v16 }
  0x28   : > { %579 = vmatprep.subr.bf16.mxu0 %v624_v17 }
  0x2b   : > { %580 = vmatpush3.bf16.msra.mxu0 %v625_v19 }
  0x2c   : > { %581 = vmatprep.subr.bf16.mxu0 %v627_v20 }
  0x2f   : > { %582 = vmatpush3.bf16.msra.mxu0 %v628_v21 }
  0x32   : > { %404 = vmatmul.mubr.bf16.vlgmr.msra.gmra.mrb[0].mxu0 %v542_v22 }
  0xef   : > { %v445_v23 = vpop.f32.mrb[0].mxu1 }
  0xf0   : > { %v598_v24 = vpop.f32.mrb[1].mxu1 }
  0xf1   : > { %v448_v25 = vpop.f32.mrb[2].mxu1 }
  0xf2   : > { %v599_v26 = vpop.f32.mrb[3].mxu1 }
 0x105   : > { %v583_v27 = vpop.f32.mrb[0].mxu0 }
 0x106   : > { %v584_v28 = vpop.f32.mrb[1].mxu0 }
 0x107   : > { %v585_v30 = vadd.f32 %v584_v28, %v583_v27  ;;  %v586_v31 = vpop.f32.mrb[2].mxu0 }
 0x108   : > { %v587_v32 = vpop.f32.mrb[3].mxu0 }
 0x109   : > { %v406_v33 = vadd.f32 %v585_v30, %v541_v29 }
 0x10b   : > { %v446_v34 = vadd.f32 %v445_v23, %v406_v33 }
 0x10d   : > { %v452_v35 = vmul.f32 1.442695, %v446_v34  ;;  %vm451_vm2 = vcmp.gt.f32.partialorder %v446_v34, 0.0 }
 0x10f   : > { %633 = vpow2.f32 %v452_v35 }
 0x119   : > { %v634_v36 = vpop.eup %633 }
 0x11a   : > { %v564_v37 = vadd.f32 -1.0, %v634_v36 }
 0x11c   : > { %v455_v38 = vsel %vm451_vm2, %v446_v34, %v564_v37 }
 0x11d   : > { %v456_v39 = vpack.c.bf16 %v455_v38, %v455_v38 }
 0x11f   : > { %458 = vst.msk [vmem:[%s202_s28] sm:$0xf] %vm457_vm3, %v456_v39 }
 0x120 PF: > { %s13_s12 = sadd.s32 1, %s641_s12  }
 0x121   : > { %p10_p4 = scmp.ge.s32.totalorder %s13_s12, 4  }
 0x123   :  { %12 = sbr.rel (!%p10_p4) target bundleno = 1 (0x1), region = 68 }

// kernel: forward.8
= control target key start
LH: loop header
LB: loop body
LE: loop exit
PB: predicated region body
PF: predicated region fallthrough
CT: control target
= control target key end

     0   :  { %s925_s12 = smov 0   ;;  %s997_s0 = inlined_call_operand.vmem [shape: bf16[2,8,576], index: 0, kind: input, shape index: {}]   ;;  %s998_s1 = inlined_call_operand.vmem [shape: bf16[2,576,64], index: 1, kind: input, shape index: {}]   ;;  %s999_s2 = inlined_call_operand.vmem [shape: f32[2,1,64], index: 2, kind: input, shape index: {}]   ;;  %s1000_s3 = inlined_call_operand.vmem [shape: bf16[2,8,64], index: 3, kind: output, shape index: {}]  }
   0x1 LB: > { %s725_s13 = sadd.s32 4294967295, %s901_s12   ;;  %p729_p0 = scmp.ge.s32.totalorder %s901_s12, 1  ;;  %s901_s12 = sphi %s925_s12, %s13_s12  }
   0x2   : > { %p155_p1 = scmp.lt.s32.totalorder %s901_s12, 3 }
   0x4   : > { %p156_p2 = pnand %p729_p0, %p155_p1 }
   0x5   : > { %p186_p3 = scmp.lt.s32.totalorder (!%p156_p2), %s725_s13, 1  ;;  %v903_v35 = vmov (!%p156_p2), 0.0   ;;  %vm904_vm0 = vmmov (!%p156_p2), 0   ;;  %vm519_vm1 = vcmask (!%p156_p2), 523264   ;;  %vm649_vm3 = vcmask (!%p156_p2), 519168  }
   0x6   : > { %159 = sbr.rel (%p156_p2) target bundleno = 299 (0x12b), region = 32 }
   0xd   : > { %s1002_s13 = smov (!%p186_p3, %s725_s13), 1 }
   0xe   : > { %s841_s14 = smul.u32 288, %s1002_s13  ;;  %s198_s24 = scalar_lea.vmem %s999_s2, %s1002_s13 }
   0xf   : > { %s840_s18 = smul.u32 20, %s1002_s13  ;;  %v733_v45 = vld [vmem:[%s198_s24] ss:$0 sm:$0xff]  ;;  %s732_s25 = sshll.u32 %s1002_s13, 2 }
  0x10   : > { %s939_s17 = scalar_lea.vmem %s998_s1, %s841_s14  ;;  %s202_s28 = scalar_lea.vmem %s1000_s3, %s732_s25 }
  0x11   : > { %v852_v0 = vld [vmem:[%s939_s17 + $0x40] sm:$0xff]   ;;  %v856_v4 = vld [vmem:[%s939_s17 + $0x48] sm:$0xff]   ;;  %v860_v8 = vld [vmem:[%s939_s17 + $0x50] sm:$0xff]   ;;  %s974_s21 = scalar_lea.vmem %s997_s0, %s840_s18 }
  0x12   : > { %v853_v1 = vld [vmem:[%s939_s17] sm:$0xff]   ;;  %779 = vmatprep.subr.bf16.mxu0 %v852_v0  ;;  %v857_v5 = vld [vmem:[%s939_s17 + $0x8] sm:$0xff]   ;;  %v861_v9 = vld [vmem:[%s939_s17 + $0x10] sm:$0xff]  }
  0x13   : > { %v854_v2 = vld [vmem:[%s939_s17 + $0xc0] sm:$0xff]   ;;  %780 = vmatpush3.bf16.msra.mxu0 %v853_v1  ;;  %v858_v6 = vld [vmem:[%s939_s17 + $0xc8] sm:$0xff]   ;;  %v862_v10 = vld [vmem:[%s939_s17 + $0xd0] sm:$0xff]  }
  0x14   : > { %v855_v3 = vld [vmem:[%s939_s17 + $0x80] sm:$0xff]   ;;  %801 = vmatprep.subr.bf16.mxu1 %v854_v2  ;;  %781 = vmatprep.subr.bf16.mxu0 %v856_v4  ;;  %v859_v7 = vld [vmem:[%s939_s17 + $0x88] sm:$0xff]   ;;  %v863_v11 = vld [vmem:[%s939_s17 + $0x90] sm:$0xff]  }
  0x15   : > { %802 = vmatpush3.bf16.msra.mxu1 %v855_v3  ;;  %v864_v12 = vld [vmem:[%s939_s17 + $0x58] sm:$0xff]   ;;  %v868_v16 = vld [vmem:[%s939_s17 + $0x60] sm:$0xff]   ;;  %v872_v20 = vld [vmem:[%s939_s17 + $0x68] sm:$0xff]  }
  0x16   : > { %803 = vmatprep.subr.bf16.mxu1 %v858_v6  ;;  %v865_v13 = vld [vmem:[%s939_s17 + $0x18] sm:$0xff]   ;;  %v869_v17 = vld [vmem:[%s939_s17 + $0x20] sm:$0xff]   ;;  %v873_v21 = vld [vmem:[%s939_s17 + $0x28] sm:$0xff]  }
  0x17   : > { %782 = vmatpush3.bf16.msra.mxu0 %v857_v5  ;;  %v866_v14 = vld [vmem:[%s939_s17 + $0xd8] sm:$0xff]   ;;  %v870_v18 = vld [vmem:[%s939_s17 + $0xe0] sm:$0xff]   ;;  %v874_v22 = vld [vmem:[%s939_s17 + $0xe8] sm:$0xff]  }
  0x18   : > { %783 = vmatprep.subr.bf16.mxu0 %v860_v8  ;;  %v867_v15 = vld [vmem:[%s939_s17 + $0x98] sm:$0xff]   ;;  %v871_v19 = vld [vmem:[%s939_s17 + $0xa0] sm:$0xff]   ;;  %v875_v23 = vld [vmem:[%s939_s17 + $0xa8] sm:$0xff]  }
  0x19   : > { %804 = vmatpush3.bf16.msra.mxu1 %v859_v7  ;;  %v876_v24 = vld [vmem:[%s939_s17 + $0x70] sm:$0xff]   ;;  %v880_v28 = vld [vmem:[%s939_s17 + $0x78] sm:$0xff]   ;;  %v204_v31 = vld [vmem:[%s974_s21] sm:$0xff] }
  0x1a   : > { %805 = vmatprep.subr.bf16.mxu1 %v862_v10  ;;  %v877_v25 = vld [vmem:[%s939_s17 + $0x30] sm:$0xff]   ;;  %v881_v29 = vld [vmem:[%s939_s17 + $0x38] sm:$0xff]   ;;  %v734_v32 = vcombine.low %v204_v31, %v204_v31  ;;  %v735_v33 = vcombine.high %v204_v31, %v204_v31  ;;  %v205_v36 = vld [vmem:[%s974_s21 + $0x8] sm:$0xff] }
  0x1b   : > { %784 = vmatpush3.bf16.msra.mxu0 %v861_v9  ;;  %v878_v26 = vld [vmem:[%s939_s17 + $0xf0] sm:$0xff]   ;;  %v882_v30 = vld [vmem:[%s939_s17 + $0xf8] sm:$0xff]   ;;  %v736_v37 = vcombine.low %v205_v36, %v205_v36  ;;  %v737_v38 = vcombine.high %v205_v36, %v205_v36  ;;  %v889_v39 = vld [vmem:[%s939_s17 + $0x100] sm:$0xff]  }
  0x1c   : > { %785 = vmatprep.subr.bf16.mxu0 %v864_v12  ;;  %v879_v27 = vld [vmem:[%s939_s17 + $0xb0] sm:$0xff]   ;;  %v886_v34 = vld [vmem:[%s939_s17 + $0xb8] sm:$0xff]   ;;  %555 = vmatprep.mubr.bf16.mxu0 %v735_v33  ;;  %v890_v40 = vld [vmem:[%s939_s17 + $0x108] sm:$0xff]  }
  0x1d   : > { %806 = vmatpush3.bf16.msra.mxu1 %v863_v11  ;;  %595 = vmatprep.mubr.bf16.mxu1 %v737_v38  ;;  %v891_v41 = vld [vmem:[%s939_s17 + $0x110] sm:$0xff]   ;;  %v892_v42 = vld [vmem:[%s939_s17 + $0x118] sm:$0xff]  }
  0x1e   : > { %807 = vmatprep.subr.bf16.mxu1 %v866_v14  ;;  %v885_v43 = vld [vmem:[%s974_s21 + $0x10] ss:$0 sps:$4 sm:$0xff]  }
  0x1f   : > { %786 = vmatpush3.bf16.msra.mxu0 %v865_v13 }
  0x20   : > { %787 = vmatprep.subr.bf16.mxu0 %v868_v16 }
  0x21   : > { %808 = vmatpush3.bf16.msra.mxu1 %v867_v15 }
  0x22   : > { %809 = vmatprep.subr.bf16.mxu1 %v870_v18 }
  0x23   : > { %788 = vmatpush3.bf16.msra.mxu0 %v869_v17 }
  0x24   : > { %789 = vmatprep.subr.bf16.mxu0 %v872_v20 }
  0x25   : > { %810 = vmatpush3.bf16.msra.mxu1 %v871_v19 }
  0x26   : > { %811 = vmatprep.subr.bf16.mxu1 %v874_v22 }
  0x27   : > { %790 = vmatpush3.bf16.msra.mxu0 %v873_v21 }
  0x28   : > { %791 = vmatprep.subr.bf16.mxu0 %v876_v24 }
  0x29   : > { %812 = vmatpush3.bf16.msra.mxu1 %v875_v23 }
  0x2a   : > { %813 = vmatprep.subr.bf16.mxu1 %v878_v26 }
  0x2b   : > { %792 = vmatpush3.bf16.msra.mxu0 %v877_v25 }
  0x2c   : > { %793 = vmatprep.subr.bf16.mxu0 %v880_v28 }
  0x2d   : > { %814 = vmatpush3.bf16.msra.mxu1 %v879_v27 }
  0x2e   : > { %815 = vmatprep.subr.bf16.mxu1 %v882_v30 }
  0x2f   : > { %794 = vmatpush3.bf16.msra.mxu0 %v881_v29 }
  0x30   : > { %828 = vmatprep.subr.bf16.mxu0 %v903_v35 }
  0x31   : > { %816 = vmatpush3.bf16.msra.mxu1 %v886_v34 }
  0x32   : > { %556 = vmatmul.mubr.bf16.vlgmr.msra.gmra.mrb[0].mxu0 %v734_v32 }
  0x33   : > { %829 = vmatpush3.bf16.msra.mxu0 %v889_v39  ;;  %836 = vmatprep.mubr.msk.bf16.mxu0 %vm904_vm0, %v903_v35 }
  0x34   : > { %596 = vmatmul.mubr.bf16.vlgmr.msra.gmra.mrb[0].mxu1 %v736_v37  ;;  %830 = vmatprep.subr.bf16.mxu0 %v903_v35 }
  0x37   : > { %831 = vmatpush3.bf16.msra.mxu0 %v890_v40 }
  0x38   : > { %832 = vmatprep.subr.bf16.mxu0 %v903_v35 }
  0x3b   : > { %833 = vmatpush3.bf16.msra.mxu0 %v891_v41 }
  0x3c   : > { %834 = vmatprep.subr.bf16.mxu0 %v903_v35 }
  0x3f   : > { %835 = vmatpush3.bf16.msra.mxu0 %v892_v42 }
  0x42   : > { %837 = vmatmul.mubr.msk.bf16.vlgmr.msra.gmra.mrb[4].mxu0 %vm519_vm1, %v885_v43 }
 0x105   : > { %v795_v44 = vpop.f32.mrb[0].mxu0 }
 0x106   : > { %v796_v46 = vpop.f32.mrb[1].mxu0 }
 0x107   : > { %v797_v47 = vadd.f32 %v796_v46, %v795_v44  ;;  %v798_v48 = vpop.f32.mrb[2].mxu0  ;;  %v817_v49 = vpop.f32.mrb[0].mxu1 }
 0x108   : > { %v799_v50 = vpop.f32.mrb[3].mxu0  ;;  %v818_v51 = vpop.f32.mrb[1].mxu1 }
 0x109   : > { %v558_v52 = vadd.f32 %v797_v47, %v733_v45  ;;  %v819_v53 = vadd.f32 %v818_v51, %v817_v49  ;;  %v820_v54 = vpop.f32.mrb[2].mxu1 }
 0x10a   : > { %v821_v55 = vpop.f32.mrb[3].mxu1 }
 0x10b   : > { %v598_v56 = vadd.f32 %v819_v53, %v558_v52 }
 0x115   : > { %v637_v57 = vpop.f32.mrb[4].mxu0 }
 0x116   : > { %v638_v58 = vadd.f32 %v637_v57, %v598_v56  ;;  %v838_v59 = vpop.f32.mrb[5].mxu0 }
 0x117   : > { %v640_v60 = vpop.f32.mrb[6].mxu0 }
 0x118   : > { %v644_v61 = vmul.f32 1.442695, %v638_v58  ;;  %v839_v62 = vpop.f32.mrb[7].mxu0  ;;  %vm643_vm2 = vcmp.gt.f32.partialorder %v638_v58, 0.0 }
 0x11a   : > { %893 = vpow2.f32 %v644_v61 }
 0x124   : > { %v894_v63 = vpop.eup %893 }
 0x125   : > { %v776_v0 = vadd.f32 -1.0, %v894_v63 }
 0x127   : > { %v647_v1 = vsel %vm643_vm2, %v638_v58, %v776_v0 }
 0x128   : > { %v648_v2 = vpack.c.bf16 %v647_v1, %v647_v1 }
 0x12a   : > { %650 = vst.msk [vmem:[%s202_s28] sm:$0xf] %vm649_vm3, %v648_v2 }
 0x12b PF: > { %s13_s12 = sadd.s32 1, %s901_s12  }
 0x12c   : > { %p10_p4 = scmp.ge.s32.totalorder %s13_s12, 4  }
 0x12e   :  { %12 = sbr.rel (!%p10_p4) target bundleno = 1 (0x1), region = 68 }

// kernel: forward.9
= control target key start
LH: loop header
LB: loop body
LE: loop exit
PB: predicated region body
PF: predicated region fallthrough
CT: control target
= control target key end

     0   :  { %17 = vsyncpa [#allocation3], 0  ;;  %v106_v38 = vlaneseq  ;;  %v4159_v39 = vmov 1966171168   ;;  %s5484_s0 = inlined_call_operand.vmem [shape: bf16[2,256], index: 0, kind: input, shape index: {}]   ;;  %s5485_s1 = inlined_call_operand.vmem [shape: bf16[2,256], index: 1, kind: input, shape index: {}]   ;;  %s5486_s2 = inlined_call_operand.vmem [shape: bf16[256,512], index: 2, kind: input, shape index: {}]   ;;  %s5487_s3 = inlined_call_operand.vmem [shape: f32[1,512], index: 3, kind: input, shape index: {}]   ;;  %s5488_s4 = inlined_call_operand.vmem [shape: bf16[256,512], index: 4, kind: input, shape index: {}]   ;;  %s5489_s5 = inlined_call_operand.vmem [shape: f32[1,512], index: 5, kind: input, shape index: {}]   ;;  %s5490_s6 = inlined_call_operand.vmem [shape: bf16[512,512], index: 6, kind: input, shape index: {}]   ;;  %s5491_s7 = inlined_call_operand.vmem [shape: f32[1,512], index: 7, kind: input, shape index: {}]   ;;  %s5492_s8 = inlined_call_operand.vmem [shape: bf16[512,512], index: 8, kind: input, shape index: {}]   ;;  %s5493_s9 = inlined_call_operand.vmem [shape: f32[1,512], index: 9, kind: input, shape index: {}]   ;;  %s5494_s10 = inlined_call_operand.hbm [shape: f32[2,512], index: 10, kind: output, shape index: {0}]   ;;  %s5495_s11 = inlined_call_operand.hbm [shape: f32[2,512], index: 11, kind: output, shape index: {1}]  }
   0x1   :  { %v3519_v0 = vld [vmem:[%s5486_s2 + $0x4] ss:$16 sps:$4 sm:$0xff]   ;;  %v3521_v1 = vld [vmem:[%s5486_s2 + $0xc] ss:$16 sps:$4 sm:$0xff]   ;;  %v3523_v2 = vld [vmem:[%s5486_s2] ss:$16 sps:$4 sm:$0xff]   ;;  %v136_v40 = vunpack.c.l.s4 %v4159_v39 }
   0x2   :  { %471 = vmatprep.subr.bf16.mxu0 %v3519_v0  ;;  %v3524_v3 = vld [vmem:[%s5486_s2 + $0x8] ss:$16 sps:$4 sm:$0xff]   ;;  %512 = vmatprep.subr.bf16.mxu1 %v3521_v1  ;;  %v3525_v4 = vld [vmem:[%s5486_s2 + $0x24] ss:$16 sps:$4 sm:$0xff]   ;;  %v3527_v5 = vld [vmem:[%s5486_s2 + $0x2c] ss:$16 sps:$4 sm:$0xff]  }
   0x3   :  { %472 = vmatpush1.bf16.msra.mxu0 %v3523_v2  ;;  %513 = vmatpush1.bf16.msra.mxu1 %v3524_v3  ;;  %v3529_v6 = vld [vmem:[%s5486_s2 + $0x20] ss:$16 sps:$4 sm:$0xff]   ;;  %v3530_v7 = vld [vmem:[%s5486_s2 + $0x28] ss:$16 sps:$4 sm:$0xff]   ;;  %v3531_v8 = vld [vmem:[%s5486_s2 + $0x44] ss:$16 sps:$4 sm:$0xff]   ;;  %v137_v46 = vunpack.c.0.s8 %v136_v40 }
   0x4   :  { %473 = vmatprep.subr.bf16.mxu0 %v3525_v4  ;;  %514 = vmatprep.subr.bf16.mxu1 %v3527_v5  ;;  %v3533_v9 = vld [vmem:[%s5486_s2 + $0x4c] ss:$16 sps:$4 sm:$0xff]   ;;  %v3535_v10 = vld [vmem:[%s5486_s2 + $0x40] ss:$16 sps:$4 sm:$0xff]   ;;  %v3536_v11 = vld [vmem:[%s5486_s2 + $0x48] ss:$16 sps:$4 sm:$0xff]  }
   0x5   :  { %v3537_v12 = vld [vmem:[%s5486_s2 + $0x64] ss:$16 sps:$4 sm:$0xff]   ;;  %v3539_v13 = vld [vmem:[%s5486_s2 + $0x6c] ss:$16 sps:$4 sm:$0xff]   ;;  %v3541_v14 = vld [vmem:[%s5486_s2 + $0x60] ss:$16 sps:$4 sm:$0xff]  }
   0x6   :  { %v3542_v15 = vld [vmem:[%s5486_s2 + $0x68] ss:$16 sps:$4 sm:$0xff]   ;;  %v3543_v16 = vld [vmem:[%s5486_s2 + $0x84] ss:$16 sps:$4 sm:$0xff]   ;;  %v3545_v17 = vld [vmem:[%s5486_s2 + $0x8c] ss:$16 sps:$4 sm:$0xff]  }
   0x7   :  { %474 = vmatpush1.bf16.msra.mxu0 %v3529_v6  ;;  %515 = vmatpush1.bf16.msra.mxu1 %v3530_v7  ;;  %v3547_v18 = vld [vmem:[%s5486_s2 + $0x80] ss:$16 sps:$4 sm:$0xff]   ;;  %v3548_v19 = vld [vmem:[%s5486_s2 + $0x88] ss:$16 sps:$4 sm:$0xff]   ;;  %v3549_v20 = vld [vmem:[%s5486_s2 + $0xa4] ss:$16 sps:$4 sm:$0xff]  }
   0x8   :  { %475 = vmatprep.subr.bf16.mxu0 %v3531_v8  ;;  %516 = vmatprep.subr.bf16.mxu1 %v3533_v9  ;;  %v3551_v21 = vld [vmem:[%s5486_s2 + $0xac] ss:$16 sps:$4 sm:$0xff]   ;;  %v3553_v22 = vld [vmem:[%s5486_s2 + $0xa0] ss:$16 sps:$4 sm:$0xff]   ;;  %v3554_v23 = vld [vmem:[%s5486_s2 + $0xa8] ss:$16 sps:$4 sm:$0xff]  }
   0x9   :  { %v3555_v24 = vld [vmem:[%s5486_s2 + $0xc4] ss:$16 sps:$4 sm:$0xff]   ;;  %v3557_v25 = vld [vmem:[%s5486_s2 + $0xcc] ss:$16 sps:$4 sm:$0xff]   ;;  %v3559_v26 = vld [vmem:[%s5486_s2 + $0xc0] ss:$16 sps:$4 sm:$0xff]  }
   0xa   :  { %v3560_v27 = vld [vmem:[%s5486_s2 + $0xc8] ss:$16 sps:$4 sm:$0xff]   ;;  %v3561_v28 = vld [vmem:[%s5486_s2 + $0xe4] ss:$16 sps:$4 sm:$0xff]   ;;  %v3563_v29 = vld [vmem:[%s5486_s2 + $0xec] ss:$16 sps:$4 sm:$0xff]  }
   0xb   :  { %476 = vmatpush1.bf16.msra.mxu0 %v3535_v10  ;;  %517 = vmatpush1.bf16.msra.mxu1 %v3536_v11  ;;  %v3565_v30 = vld [vmem:[%s5486_s2 + $0xe0] ss:$16 sps:$4 sm:$0xff]   ;;  %v3566_v31 = vld [vmem:[%s5486_s2 + $0xe8] ss:$16 sps:$4 sm:$0xff]   ;;  %v3567_v32 = vld [vmem:[%s5486_s2 + $0x104] ss:$16 sps:$4 sm:$0xff]  }
   0xc   :  { %477 = vmatprep.subr.bf16.mxu0 %v3537_v12  ;;  %518 = vmatprep.subr.bf16.mxu1 %v3539_v13  ;;  %v3569_v33 = vld [vmem:[%s5486_s2 + $0x10c] ss:$16 sps:$4 sm:$0xff]   ;;  %v3571_v34 = vld [vmem:[%s5486_s2 + $0x100] ss:$16 sps:$4 sm:$0xff]   ;;  %v3572_v35 = vld [vmem:[%s5486_s2 + $0x108] ss:$16 sps:$4 sm:$0xff]  }
   0xd   :  { %v3573_v36 = vld [vmem:[%s5486_s2 + $0x124] ss:$16 sps:$4 sm:$0xff]   ;;  %v3575_v37 = vld [vmem:[%s5486_s2 + $0x12c] ss:$16 sps:$4 sm:$0xff]   ;;  %v3577_v41 = vld [vmem:[%s5486_s2 + $0x120] ss:$16 sps:$4 sm:$0xff]  }
   0xe   :  { %v3578_v42 = vld [vmem:[%s5486_s2 + $0x128] ss:$16 sps:$4 sm:$0xff]   ;;  %v3579_v43 = vld [vmem:[%s5486_s2 + $0x144] ss:$16 sps:$4 sm:$0xff]   ;;  %v3581_v44 = vld [vmem:[%s5486_s2 + $0x14c] ss:$16 sps:$4 sm:$0xff]  }
   0xf   :  { %478 = vmatpush1.bf16.msra.mxu0 %v3541_v14  ;;  %519 = vmatpush1.bf16.msra.mxu1 %v3542_v15  ;;  %v4349_v45 = vshrl.u32 %v106_v38, 7  ;;  %v3583_v47 = vld [vmem:[%s5486_s2 + $0x140] ss:$16 sps:$4 sm:$0xff]   ;;  %v3584_v48 = vld [vmem:[%s5486_s2 + $0x148] ss:$16 sps:$4 sm:$0xff]  }
  0x10   :  { %479 = vmatprep.subr.bf16.mxu0 %v3543_v16  ;;  %520 = vmatprep.subr.bf16.mxu1 %v3545_v17  ;;  %v3585_v49 = vld [vmem:[%s5486_s2 + $0x164] ss:$16 sps:$4 sm:$0xff]   ;;  %v3587_v50 = vld [vmem:[%s5486_s2 + $0x16c] ss:$16 sps:$4 sm:$0xff]   ;;  %v3589_v53 = vld [vmem:[%s5486_s2 + $0x160] ss:$16 sps:$4 sm:$0xff]  }
  0x11   :  { %v4364_v51 = vsub.s32 %v137_v46, %v4349_v45  ;;  %v3097_v52 = vld.sshfl [vmem:[%s5484_s0] sm:$0x11 pattern:$0x75316420]  ;;  %v3590_v54 = vld [vmem:[%s5486_s2 + $0x168] ss:$16 sps:$4 sm:$0xff]  }
  0x12   :  { %v134_v55 = vcombine.high %v3097_v52, %v3097_v52  ;;  %v3591_v56 = vld [vmem:[%s5486_s2 + $0x184] ss:$16 sps:$4 sm:$0xff]   ;;  %v3593_v57 = vld [vmem:[%s5486_s2 + $0x18c] ss:$16 sps:$4 sm:$0xff]   ;;  %v3595_v59 = vld [vmem:[%s5486_s2 + $0x180] ss:$16 sps:$4 sm:$0xff]  }
  0x13   :  { %480 = vmatpush1.bf16.msra.mxu0 %v3547_v18  ;;  %521 = vmatpush1.bf16.msra.mxu1 %v3548_v19  ;;  %v3596_v60 = vld [vmem:[%s5486_s2 + $0x188] ss:$16 sps:$4 sm:$0xff]   ;;  %v3597_v61 = vld [vmem:[%s5486_s2 + $0x1a4] ss:$16 sps:$4 sm:$0xff]   ;;  %v3599_v62 = vld [vmem:[%s5486_s2 + $0x1ac] ss:$16 sps:$4 sm:$0xff]   ;;  %v141_v11 = vrot.slane %v3097_v52, %v4364_v51 }
  0x14   :  { %481 = vmatprep.subr.bf16.mxu0 %v3549_v20  ;;  %522 = vmatprep.subr.bf16.mxu1 %v3551_v21  ;;  %v148_v58 = vrot.slane %v134_v55, %v4364_v51  ;;  %v3601_v63 = vld [vmem:[%s5486_s2 + $0x1a0] ss:$16 sps:$4 sm:$0xff]   ;;  %v3602_v0 = vld [vmem:[%s5486_s2 + $0x1a8] ss:$16 sps:$4 sm:$0xff]   ;;  %v3603_v1 = vld [vmem:[%s5486_s2 + $0x1c4] ss:$16 sps:$4 sm:$0xff]  }
  0x15   :  { %v3605_v2 = vld [vmem:[%s5486_s2 + $0x1cc] ss:$16 sps:$4 sm:$0xff]   ;;  %v3607_v3 = vld [vmem:[%s5486_s2 + $0x1c0] ss:$16 sps:$4 sm:$0xff]   ;;  %v3608_v4 = vld [vmem:[%s5486_s2 + $0x1c8] ss:$16 sps:$4 sm:$0xff]  }
  0x16   :  { %503 = vmatprep.mubr.bf16.mxu0 %v148_v58  ;;  %544 = vmatprep.mubr.bf16.mxu1 %v148_v58  ;;  %v3609_v5 = vld [vmem:[%s5486_s2 + $0x1e4] ss:$16 sps:$4 sm:$0xff]   ;;  %v3611_v6 = vld [vmem:[%s5486_s2 + $0x1ec] ss:$16 sps:$4 sm:$0xff]   ;;  %v3613_v7 = vld [vmem:[%s5486_s2 + $0x1e0] ss:$16 sps:$4 sm:$0xff]  }
  0x17   :  { %482 = vmatpush1.bf16.msra.mxu0 %v3553_v22  ;;  %523 = vmatpush1.bf16.msra.mxu1 %v3554_v23  ;;  %v3614_v8 = vld [vmem:[%s5486_s2 + $0x1e8] ss:$16 sps:$4 sm:$0xff]   ;;  %v3617_v9 = vld [vmem:[%s5488_s4 + $0x4] ss:$16 sps:$4 sm:$0xff]   ;;  %v3653_v10 = vld [vmem:[%s5488_s4 + $0xc] ss:$16 sps:$4 sm:$0xff]  }
  0x18   :  { %483 = vmatprep.subr.bf16.mxu0 %v3555_v24  ;;  %524 = vmatprep.subr.bf16.mxu1 %v3557_v25  ;;  %v3615_v12 = vld [vmem:[%s5488_s4] ss:$16 sps:$4 sm:$0xff]   ;;  %v3651_v13 = vld [vmem:[%s5488_s4 + $0x8] ss:$16 sps:$4 sm:$0xff]   ;;  %v3620_v14 = vld [vmem:[%s5488_s4 + $0x24] ss:$16 sps:$4 sm:$0xff]  }
  0x19   :  { %v3659_v15 = vld [vmem:[%s5488_s4 + $0x2c] ss:$16 sps:$4 sm:$0xff]   ;;  %v3618_v16 = vld [vmem:[%s5488_s4 + $0x20] ss:$16 sps:$4 sm:$0xff]   ;;  %v3657_v17 = vld [vmem:[%s5488_s4 + $0x28] ss:$16 sps:$4 sm:$0xff]  }
  0x1a   :  { %v3623_v18 = vld [vmem:[%s5488_s4 + $0x44] ss:$16 sps:$4 sm:$0xff]   ;;  %v3665_v19 = vld [vmem:[%s5488_s4 + $0x4c] ss:$16 sps:$4 sm:$0xff]   ;;  %v3621_v22 = vld [vmem:[%s5488_s4 + $0x40] ss:$16 sps:$4 sm:$0xff]  }
  0x1b   :  { %484 = vmatpush1.bf16.msra.mxu0 %v3559_v26  ;;  %525 = vmatpush1.bf16.msra.mxu1 %v3560_v27  ;;  %v4458_v20 = vld.sshfl [vmem:[%s5485_s1] sm:$0x11 pattern:$0x75316420]  ;;  %v3663_v23 = vld [vmem:[%s5488_s4 + $0x48] ss:$16 sps:$4 sm:$0xff]  }
  0x1c   :  { %485 = vmatprep.subr.bf16.mxu0 %v3561_v28  ;;  %526 = vmatprep.subr.bf16.mxu1 %v3563_v29  ;;  %v671_v21 = vcombine.high %v4458_v20, %v4458_v20  ;;  %v3626_v24 = vld [vmem:[%s5488_s4 + $0x64] ss:$16 sps:$4 sm:$0xff]   ;;  %v3671_v25 = vld [vmem:[%s5488_s4 + $0x6c] ss:$16 sps:$4 sm:$0xff]   ;;  %v3624_v27 = vld [vmem:[%s5488_s4 + $0x60] ss:$16 sps:$4 sm:$0xff]  }
  0x1d   :  { %v3669_v28 = vld [vmem:[%s5488_s4 + $0x68] ss:$16 sps:$4 sm:$0xff]   ;;  %v3629_v29 = vld [vmem:[%s5488_s4 + $0x84] ss:$16 sps:$4 sm:$0xff]   ;;  %v3683_v38 = vld [vmem:[%s5488_s4 + $0xcc] ss:$16 sps:$4 sm:$0xff]  }
  0x1e   :  { %v685_v26 = vrot.slane %v671_v21, %v4364_v51  ;;  %v3633_v39 = vld [vmem:[%s5488_s4 + $0xc0] ss:$16 sps:$4 sm:$0xff]   ;;  %v3681_v40 = vld [vmem:[%s5488_s4 + $0xc8] ss:$16 sps:$4 sm:$0xff]   ;;  %v3641_v46 = vld [vmem:[%s5488_s4 + $0x104] ss:$16 sps:$4 sm:$0xff]  }
  0x1f   :  { %486 = vmatpush1.bf16.msra.mxu0 %v3565_v30  ;;  %527 = vmatpush1.bf16.msra.mxu1 %v3566_v31  ;;  %v3677_v30 = vld [vmem:[%s5488_s4 + $0x8c] ss:$16 sps:$4 sm:$0xff]   ;;  %v3627_v31 = vld [vmem:[%s5488_s4 + $0x80] ss:$16 sps:$4 sm:$0xff]   ;;  %v3647_v55 = vld [vmem:[%s5488_s4 + $0x144] ss:$16 sps:$4 sm:$0xff]  }
  0x20   :  { %487 = vmatprep.subr.bf16.mxu0 %v3567_v32  ;;  %528 = vmatprep.subr.bf16.mxu1 %v3569_v33  ;;  %v3675_v32 = vld [vmem:[%s5488_s4 + $0x88] ss:$16 sps:$4 sm:$0xff]   ;;  %v3632_v33 = vld [vmem:[%s5488_s4 + $0xa4] ss:$16 sps:$4 sm:$0xff]   ;;  %v3692_v52 = vld [vmem:[%s5488_s4 + $0x12c] ss:$16 sps:$4 sm:$0xff]  }
  0x21   :  { %v3693_v58 = vld [vmem:[%s5488_s4 + $0x148] ss:$16 sps:$4 sm:$0xff]   ;;  %v3717_v21 = vld [vmem:[%s5490_s6 + $0x20] ss:$16 sps:$4 sm:$0xff]  }
  0x23   :  { %488 = vmatpush1.bf16.msra.mxu0 %v3571_v34  ;;  %529 = vmatpush1.bf16.msra.mxu1 %v3572_v35  ;;  %v3680_v34 = vld [vmem:[%s5488_s4 + $0xac] ss:$16 sps:$4 sm:$0xff]   ;;  %v3630_v35 = vld [vmem:[%s5488_s4 + $0xa0] ss:$16 sps:$4 sm:$0xff]  }
  0x24   :  { %489 = vmatprep.subr.bf16.mxu0 %v3573_v36  ;;  %530 = vmatprep.subr.bf16.mxu1 %v3575_v37  ;;  %v3678_v36 = vld [vmem:[%s5488_s4 + $0xa8] ss:$16 sps:$4 sm:$0xff]   ;;  %v3635_v37 = vld [vmem:[%s5488_s4 + $0xc4] ss:$16 sps:$4 sm:$0xff]  }
  0x27   :  { %490 = vmatpush1.bf16.msra.mxu0 %v3577_v41  ;;  %531 = vmatpush1.bf16.msra.mxu1 %v3578_v42  ;;  %v3638_v41 = vld [vmem:[%s5488_s4 + $0xe4] ss:$16 sps:$4 sm:$0xff]   ;;  %v3686_v42 = vld [vmem:[%s5488_s4 + $0xec] ss:$16 sps:$4 sm:$0xff]  }
  0x28   :  { %491 = vmatprep.subr.bf16.mxu0 %v3579_v43  ;;  %532 = vmatprep.subr.bf16.mxu1 %v3581_v44  ;;  %v3636_v43 = vld [vmem:[%s5488_s4 + $0xe0] ss:$16 sps:$4 sm:$0xff]   ;;  %v3684_v44 = vld [vmem:[%s5488_s4 + $0xe8] ss:$16 sps:$4 sm:$0xff]  }
  0x2b   :  { %492 = vmatpush1.bf16.msra.mxu0 %v3583_v47  ;;  %533 = vmatpush1.bf16.msra.mxu1 %v3584_v48  ;;  %v3689_v47 = vld [vmem:[%s5488_s4 + $0x10c] ss:$16 sps:$4 sm:$0xff]   ;;  %v3639_v48 = vld [vmem:[%s5488_s4 + $0x100] ss:$16 sps:$4 sm:$0xff]  }
  0x2c   :  { %493 = vmatprep.subr.bf16.mxu0 %v3585_v49  ;;  %534 = vmatprep.subr.bf16.mxu1 %v3587_v50  ;;  %v3687_v49 = vld [vmem:[%s5488_s4 + $0x108] ss:$16 sps:$4 sm:$0xff]   ;;  %v3644_v50 = vld [vmem:[%s5488_s4 + $0x124] ss:$16 sps:$4 sm:$0xff]  }
  0x2f   :  { %494 = vmatpush1.bf16.msra.mxu0 %v3589_v53  ;;  %535 = vmatpush1.bf16.msra.mxu1 %v3590_v54  ;;  %v3642_v53 = vld [vmem:[%s5488_s4 + $0x120] ss:$16 sps:$4 sm:$0xff]   ;;  %v3690_v54 = vld [vmem:[%s5488_s4 + $0x128] ss:$16 sps:$4 sm:$0xff]  }
  0x30   :  { %495 = vmatprep.subr.bf16.mxu0 %v3591_v56  ;;  %536 = vmatprep.subr.bf16.mxu1 %v3593_v57  ;;  %v3695_v56 = vld [vmem:[%s5488_s4 + $0x14c] ss:$16 sps:$4 sm:$0xff]   ;;  %v3645_v57 = vld [vmem:[%s5488_s4 + $0x140] ss:$16 sps:$4 sm:$0xff]  }
  0x33   :  { %496 = vmatpush1.bf16.msra.mxu0 %v3595_v59  ;;  %537 = vmatpush1.bf16.msra.mxu1 %v3596_v60  ;;  %v3650_v59 = vld [vmem:[%s5488_s4 + $0x164] ss:$16 sps:$4 sm:$0xff]   ;;  %v3698_v60 = vld [vmem:[%s5488_s4 + $0x16c] ss:$16 sps:$4 sm:$0xff]  }
  0x34   :  { %497 = vmatprep.subr.bf16.mxu0 %v3597_v61  ;;  %538 = vmatprep.subr.bf16.mxu1 %v3599_v62  ;;  %v3648_v61 = vld [vmem:[%s5488_s4 + $0x160] ss:$16 sps:$4 sm:$0xff]   ;;  %v3696_v62 = vld [vmem:[%s5488_s4 + $0x168] ss:$16 sps:$4 sm:$0xff]  }
  0x37   :  { %498 = vmatpush1.bf16.msra.mxu0 %v3601_v63  ;;  %539 = vmatpush1.bf16.msra.mxu1 %v3602_v0  ;;  %v3656_v63 = vld [vmem:[%s5488_s4 + $0x184] ss:$16 sps:$4 sm:$0xff]   ;;  %v3701_v0 = vld [vmem:[%s5488_s4 + $0x18c] ss:$16 sps:$4 sm:$0xff]  }
  0x38   :  { %499 = vmatprep.subr.bf16.mxu0 %v3603_v1  ;;  %540 = vmatprep.subr.bf16.mxu1 %v3605_v2  ;;  %v3654_v1 = vld [vmem:[%s5488_s4 + $0x180] ss:$16 sps:$4 sm:$0xff]   ;;  %v3699_v2 = vld [vmem:[%s5488_s4 + $0x188] ss:$16 sps:$4 sm:$0xff]  }
  0x3b   :  { %500 = vmatpush1.bf16.msra.mxu0 %v3607_v3  ;;  %541 = vmatpush1.bf16.msra.mxu1 %v3608_v4  ;;  %v3662_v3 = vld [vmem:[%s5488_s4 + $0x1a4] ss:$16 sps:$4 sm:$0xff]   ;;  %v3704_v4 = vld [vmem:[%s5488_s4 + $0x1ac] ss:$16 sps:$4 sm:$0xff]  }
  0x3c   :  { %501 = vmatprep.subr.bf16.mxu0 %v3609_v5  ;;  %542 = vmatprep.subr.bf16.mxu1 %v3611_v6  ;;  %v3660_v5 = vld [vmem:[%s5488_s4 + $0x1a0] ss:$16 sps:$4 sm:$0xff]   ;;  %v3702_v6 = vld [vmem:[%s5488_s4 + $0x1a8] ss:$16 sps:$4 sm:$0xff]  }
  0x3f   :  { %502 = vmatpush1.bf16.msra.mxu0 %v3613_v7  ;;  %543 = vmatpush1.bf16.msra.mxu1 %v3614_v8  ;;  %v3668_v7 = vld [vmem:[%s5488_s4 + $0x1c4] ss:$16 sps:$4 sm:$0xff]   ;;  %v3707_v8 = vld [vmem:[%s5488_s4 + $0x1cc] ss:$16 sps:$4 sm:$0xff]  }
  0x40   :  { %1008 = vmatprep.subr.bf16.mxu0 %v3617_v9  ;;  %1049 = vmatprep.subr.bf16.mxu1 %v3653_v10  ;;  %v3666_v9 = vld [vmem:[%s5488_s4 + $0x1c0] ss:$16 sps:$4 sm:$0xff]   ;;  %v3705_v10 = vld [vmem:[%s5488_s4 + $0x1c8] ss:$16 sps:$4 sm:$0xff]  }
  0x42   :  { %504 = vmatmul.mubr.bf16.vlgmr.msra.gmra.mrb[0].mxu0 %v141_v11  ;;  %545 = vmatmul.mubr.bf16.vlgmr.msra.gmra.mrb[0].mxu1 %v141_v11  ;;  %v3674_v11 = vld [vmem:[%s5488_s4 + $0x1e4] ss:$16 sps:$4 sm:$0xff]  }
  0x43   :  { %1009 = vmatpush1.bf16.msra.mxu0 %v3615_v12  ;;  %1050 = vmatpush1.bf16.msra.mxu1 %v3651_v13  ;;  %v3710_v12 = vld [vmem:[%s5488_s4 + $0x1ec] ss:$16 sps:$4 sm:$0xff]   ;;  %v3672_v13 = vld [vmem:[%s5488_s4 + $0x1e0] ss:$16 sps:$4 sm:$0xff]  }
  0x44   :  { %1010 = vmatprep.subr.bf16.mxu0 %v3620_v14  ;;  %1051 = vmatprep.subr.bf16.mxu1 %v3659_v15  ;;  %v3708_v14 = vld [vmem:[%s5488_s4 + $0x1e8] ss:$16 sps:$4 sm:$0xff]   ;;  %v678_v15 = vrot.slane %v4458_v20, %v4364_v51  ;;  %v3716_v51 = vld [vmem:[%s5490_s6 + $0xc] ss:$16 sps:$4 sm:$0xff]  }
  0x45   :  { %1040 = vmatprep.mubr.bf16.mxu0 %v685_v26  ;;  %1081 = vmatprep.mubr.bf16.mxu1 %v685_v26  ;;  %v3722_v20 = vld [vmem:[%s5490_s6 + $0x2c] ss:$16 sps:$4 sm:$0xff]   ;;  %v3726_v26 = vld [vmem:[%s5490_s6 + $0x48] ss:$16 sps:$4 sm:$0xff]  }
  0x47   :  { %1011 = vmatpush1.bf16.msra.mxu0 %v3618_v16  ;;  %1052 = vmatpush1.bf16.msra.mxu1 %v3657_v17  ;;  %v3711_v16 = vld [vmem:[%s5490_s6] ss:$16 sps:$4 sm:$0xff]   ;;  %v3713_v17 = vld [vmem:[%s5490_s6 + $0x4] ss:$16 sps:$4 sm:$0xff]  }
  0x48   :  { %1012 = vmatprep.subr.bf16.mxu0 %v3623_v18  ;;  %1053 = vmatprep.subr.bf16.mxu1 %v3665_v19  ;;  %v3714_v18 = vld [vmem:[%s5490_s6 + $0x8] ss:$16 sps:$4 sm:$0xff]   ;;  %v3719_v19 = vld [vmem:[%s5490_s6 + $0x24] ss:$16 sps:$4 sm:$0xff]  }
  0x4b   :  { %1013 = vmatpush1.bf16.msra.mxu0 %v3621_v22  ;;  %1054 = vmatpush1.bf16.msra.mxu1 %v3663_v23  ;;  %v3720_v22 = vld [vmem:[%s5490_s6 + $0x28] ss:$16 sps:$4 sm:$0xff]   ;;  %v3725_v23 = vld [vmem:[%s5490_s6 + $0x44] ss:$16 sps:$4 sm:$0xff]  }
  0x4c   :  { %1014 = vmatprep.subr.bf16.mxu0 %v3626_v24  ;;  %1055 = vmatprep.subr.bf16.mxu1 %v3671_v25  ;;  %v3728_v24 = vld [vmem:[%s5490_s6 + $0x4c] ss:$16 sps:$4 sm:$0xff]   ;;  %v3723_v25 = vld [vmem:[%s5490_s6 + $0x40] ss:$16 sps:$4 sm:$0xff]  }
  0x4f   :  { %1015 = vmatpush1.bf16.msra.mxu0 %v3624_v27  ;;  %1056 = vmatpush1.bf16.msra.mxu1 %v3669_v28  ;;  %v3731_v27 = vld [vmem:[%s5490_s6 + $0x64] ss:$16 sps:$4 sm:$0xff]   ;;  %v3734_v28 = vld [vmem:[%s5490_s6 + $0x6c] ss:$16 sps:$4 sm:$0xff]  }
  0x50   :  { %1016 = vmatprep.subr.bf16.mxu0 %v3629_v29  ;;  %1057 = vmatprep.subr.bf16.mxu1 %v3677_v30  ;;  %v3729_v29 = vld [vmem:[%s5490_s6 + $0x60] ss:$16 sps:$4 sm:$0xff]   ;;  %v3732_v30 = vld [vmem:[%s5490_s6 + $0x68] ss:$16 sps:$4 sm:$0xff]  }
  0x53   :  { %1017 = vmatpush1.bf16.msra.mxu0 %v3627_v31  ;;  %1058 = vmatpush1.bf16.msra.mxu1 %v3675_v32  ;;  %v3737_v31 = vld [vmem:[%s5490_s6 + $0x84] ss:$16 sps:$4 sm:$0xff]   ;;  %v3740_v32 = vld [vmem:[%s5490_s6 + $0x8c] ss:$16 sps:$4 sm:$0xff]  }
  0x54   :  { %1018 = vmatprep.subr.bf16.mxu0 %v3632_v33  ;;  %1059 = vmatprep.subr.bf16.mxu1 %v3680_v34  ;;  %v3735_v33 = vld [vmem:[%s5490_s6 + $0x80] ss:$16 sps:$4 sm:$0xff]   ;;  %v3738_v34 = vld [vmem:[%s5490_s6 + $0x88] ss:$16 sps:$4 sm:$0xff]  }
  0x57   :  { %1019 = vmatpush1.bf16.msra.mxu0 %v3630_v35  ;;  %1060 = vmatpush1.bf16.msra.mxu1 %v3678_v36  ;;  %v3743_v35 = vld [vmem:[%s5490_s6 + $0xa4] ss:$16 sps:$4 sm:$0xff]   ;;  %v3746_v36 = vld [vmem:[%s5490_s6 + $0xac] ss:$16 sps:$4 sm:$0xff]  }
  0x58   :  { %1020 = vmatprep.subr.bf16.mxu0 %v3635_v37  ;;  %1061 = vmatprep.subr.bf16.mxu1 %v3683_v38  ;;  %v3741_v37 = vld [vmem:[%s5490_s6 + $0xa0] ss:$16 sps:$4 sm:$0xff]   ;;  %v3744_v38 = vld [vmem:[%s5490_s6 + $0xa8] ss:$16 sps:$4 sm:$0xff]  }
  0x5b   :  { %1021 = vmatpush1.bf16.msra.mxu0 %v3633_v39  ;;  %1062 = vmatpush1.bf16.msra.mxu1 %v3681_v40  ;;  %v3749_v39 = vld [vmem:[%s5490_s6 + $0xc4] ss:$16 sps:$4 sm:$0xff]   ;;  %v3752_v40 = vld [vmem:[%s5490_s6 + $0xcc] ss:$16 sps:$4 sm:$0xff]  }
  0x5c   :  { %1022 = vmatprep.subr.bf16.mxu0 %v3638_v41  ;;  %1063 = vmatprep.subr.bf16.mxu1 %v3686_v42  ;;  %v3747_v41 = vld [vmem:[%s5490_s6 + $0xc0] ss:$16 sps:$4 sm:$0xff]   ;;  %v3750_v42 = vld [vmem:[%s5490_s6 + $0xc8] ss:$16 sps:$4 sm:$0xff]  }
  0x5f   :  { %1023 = vmatpush1.bf16.msra.mxu0 %v3636_v43  ;;  %1064 = vmatpush1.bf16.msra.mxu1 %v3684_v44  ;;  %v3755_v43 = vld [vmem:[%s5490_s6 + $0xe4] ss:$16 sps:$4 sm:$0xff]   ;;  %v3758_v44 = vld [vmem:[%s5490_s6 + $0xec] ss:$16 sps:$4 sm:$0xff]  }
  0x60   :  { %1024 = vmatprep.subr.bf16.mxu0 %v3641_v46  ;;  %1065 = vmatprep.subr.bf16.mxu1 %v3689_v47  ;;  %v3753_v46 = vld [vmem:[%s5490_s6 + $0xe0] ss:$16 sps:$4 sm:$0xff]   ;;  %v3756_v47 = vld [vmem:[%s5490_s6 + $0xe8] ss:$16 sps:$4 sm:$0xff]  }
  0x63   :  { %1025 = vmatpush1.bf16.msra.mxu0 %v3639_v48  ;;  %1066 = vmatpush1.bf16.msra.mxu1 %v3687_v49  ;;  %v3761_v48 = vld [vmem:[%s5490_s6 + $0x104] ss:$16 sps:$4 sm:$0xff]   ;;  %v3764_v49 = vld [vmem:[%s5490_s6 + $0x10c] ss:$16 sps:$4 sm:$0xff]  }
  0x64   :  { %1026 = vmatprep.subr.bf16.mxu0 %v3644_v50  ;;  %1067 = vmatprep.subr.bf16.mxu1 %v3692_v52  ;;  %v3759_v50 = vld [vmem:[%s5490_s6 + $0x100] ss:$16 sps:$4 sm:$0xff]   ;;  %v3762_v52 = vld [vmem:[%s5490_s6 + $0x108] ss:$16 sps:$4 sm:$0xff]  }
  0x67   :  { %1027 = vmatpush1.bf16.msra.mxu0 %v3642_v53  ;;  %1068 = vmatpush1.bf16.msra.mxu1 %v3690_v54  ;;  %v3767_v53 = vld [vmem:[%s5490_s6 + $0x124] ss:$16 sps:$4 sm:$0xff]  }
  0x68   :  { %1028 = vmatprep.subr.bf16.mxu0 %v3647_v55  ;;  %1069 = vmatprep.subr.bf16.mxu1 %v3695_v56 }
  0x6b   :  { %1029 = vmatpush1.bf16.msra.mxu0 %v3645_v57  ;;  %1070 = vmatpush1.bf16.msra.mxu1 %v3693_v58 }
  0x6c   :  { %1030 = vmatprep.subr.bf16.mxu0 %v3650_v59  ;;  %1071 = vmatprep.subr.bf16.mxu1 %v3698_v60 }
  0x6f   :  { %1031 = vmatpush1.bf16.msra.mxu0 %v3648_v61  ;;  %1072 = vmatpush1.bf16.msra.mxu1 %v3696_v62 }
  0x70   :  { %1032 = vmatprep.subr.bf16.mxu0 %v3656_v63  ;;  %1073 = vmatprep.subr.bf16.mxu1 %v3701_v0 }
  0x73   :  { %1033 = vmatpush1.bf16.msra.mxu0 %v3654_v1  ;;  %1074 = vmatpush1.bf16.msra.mxu1 %v3699_v2 }
  0x74   :  { %1034 = vmatprep.subr.bf16.mxu0 %v3662_v3  ;;  %1075 = vmatprep.subr.bf16.mxu1 %v3704_v4 }
  0x77   :  { %1035 = vmatpush1.bf16.msra.mxu0 %v3660_v5  ;;  %1076 = vmatpush1.bf16.msra.mxu1 %v3702_v6 }
  0x78   :  { %1036 = vmatprep.subr.bf16.mxu0 %v3668_v7  ;;  %1077 = vmatprep.subr.bf16.mxu1 %v3707_v8 }
  0x7b   :  { %1037 = vmatpush1.bf16.msra.mxu0 %v3666_v9  ;;  %1078 = vmatpush1.bf16.msra.mxu1 %v3705_v10 }
  0x7c   :  { %1038 = vmatprep.subr.bf16.mxu0 %v3674_v11  ;;  %1079 = vmatprep.subr.bf16.mxu1 %v3710_v12 }
  0x7f   :  { %1039 = vmatpush1.bf16.msra.mxu0 %v3672_v13  ;;  %1080 = vmatpush1.bf16.msra.mxu1 %v3708_v14 }
  0x80   :  { %1904 = vmatprep.subr.bf16.mxu0 %v3713_v17  ;;  %1986 = vmatprep.subr.bf16.mxu1 %v3716_v51 }
  0x82   :  { %1041 = vmatmul.mubr.bf16.vlgmr.msra.gmra.mrb[4].mxu0 %v678_v15  ;;  %1082 = vmatmul.mubr.bf16.vlgmr.msra.gmra.mrb[4].mxu1 %v678_v15 }
  0x83   :  { %1905 = vmatpush1.bf16.msra.mxu0 %v3711_v16  ;;  %1987 = vmatpush1.bf16.msra.mxu1 %v3714_v18 }
  0x84   :  { %1906 = vmatprep.subr.bf16.mxu0 %v3719_v19  ;;  %1988 = vmatprep.subr.bf16.mxu1 %v3722_v20 }
  0x87   :  { %1907 = vmatpush1.bf16.msra.mxu0 %v3717_v21  ;;  %1989 = vmatpush1.bf16.msra.mxu1 %v3720_v22 }
  0x88   :  { %1908 = vmatprep.subr.bf16.mxu0 %v3725_v23  ;;  %1990 = vmatprep.subr.bf16.mxu1 %v3728_v24 }
  0x8b   :  { %1909 = vmatpush1.bf16.msra.mxu0 %v3723_v25  ;;  %1991 = vmatpush1.bf16.msra.mxu1 %v3726_v26 }
  0x8c   :  { %1910 = vmatprep.subr.bf16.mxu0 %v3731_v27  ;;  %1992 = vmatprep.subr.bf16.mxu1 %v3734_v28 }
  0x8f   :  { %1911 = vmatpush1.bf16.msra.mxu0 %v3729_v29  ;;  %1993 = vmatpush1.bf16.msra.mxu1 %v3732_v30 }
  0x90   :  { %1912 = vmatprep.subr.bf16.mxu0 %v3737_v31  ;;  %1994 = vmatprep.subr.bf16.mxu1 %v3740_v32 }
  0x93   :  { %1913 = vmatpush1.bf16.msra.mxu0 %v3735_v33  ;;  %1995 = vmatpush1.bf16.msra.mxu1 %v3738_v34 }
  0x94   :  { %1914 = vmatprep.subr.bf16.mxu0 %v3743_v35  ;;  %1996 = vmatprep.subr.bf16.mxu1 %v3746_v36 }
  0x97   :  { %1915 = vmatpush1.bf16.msra.mxu0 %v3741_v37  ;;  %1997 = vmatpush1.bf16.msra.mxu1 %v3744_v38 }
  0x98   :  { %1916 = vmatprep.subr.bf16.mxu0 %v3749_v39  ;;  %1998 = vmatprep.subr.bf16.mxu1 %v3752_v40 }
  0x9b   :  { %1917 = vmatpush1.bf16.msra.mxu0 %v3747_v41  ;;  %1999 = vmatpush1.bf16.msra.mxu1 %v3750_v42 }
  0x9c   :  { %1918 = vmatprep.subr.bf16.mxu0 %v3755_v43  ;;  %2000 = vmatprep.subr.bf16.mxu1 %v3758_v44 }
  0x9f   :  { %1919 = vmatpush1.bf16.msra.mxu0 %v3753_v46  ;;  %2001 = vmatpush1.bf16.msra.mxu1 %v3756_v47 }
  0xa0   :  { %1920 = vmatprep.subr.bf16.mxu0 %v3761_v48 }
  0xa1   :  { %18 = vsyncpa [#allocation5], 0  ;;  %2002 = vmatprep.subr.bf16.mxu1 %v3764_v49  ;;  %v3770_v54 = vld [vmem:[%s5490_s6 + $0x12c] ss:$16 sps:$4 sm:$0xff]   ;;  %v3765_v55 = vld [vmem:[%s5490_s6 + $0x120] ss:$16 sps:$4 sm:$0xff]  }
  0xa2   :  { %v3768_v56 = vld [vmem:[%s5490_s6 + $0x128] ss:$16 sps:$4 sm:$0xff]   ;;  %v3773_v57 = vld [vmem:[%s5490_s6 + $0x144] ss:$16 sps:$4 sm:$0xff]   ;;  %v3776_v58 = vld [vmem:[%s5490_s6 + $0x14c] ss:$16 sps:$4 sm:$0xff]  }
  0xa3   :  { %1921 = vmatpush1.bf16.msra.mxu0 %v3759_v50  ;;  %2003 = vmatpush1.bf16.msra.mxu1 %v3762_v52  ;;  %v3771_v59 = vld [vmem:[%s5490_s6 + $0x140] ss:$16 sps:$4 sm:$0xff]   ;;  %v3774_v60 = vld [vmem:[%s5490_s6 + $0x148] ss:$16 sps:$4 sm:$0xff]   ;;  %v3779_v61 = vld [vmem:[%s5490_s6 + $0x164] ss:$16 sps:$4 sm:$0xff]  }
  0xa4   :  { %1922 = vmatprep.subr.bf16.mxu0 %v3767_v53  ;;  %2004 = vmatprep.subr.bf16.mxu1 %v3770_v54  ;;  %v3782_v62 = vld [vmem:[%s5490_s6 + $0x16c] ss:$16 sps:$4 sm:$0xff]   ;;  %v3777_v63 = vld [vmem:[%s5490_s6 + $0x160] ss:$16 sps:$4 sm:$0xff]   ;;  %v3780_v0 = vld [vmem:[%s5490_s6 + $0x168] ss:$16 sps:$4 sm:$0xff]  }
  0xa5   :  { %v3785_v1 = vld [vmem:[%s5490_s6 + $0x184] ss:$16 sps:$4 sm:$0xff]   ;;  %v3788_v2 = vld [vmem:[%s5490_s6 + $0x18c] ss:$16 sps:$4 sm:$0xff]   ;;  %v3783_v3 = vld [vmem:[%s5490_s6 + $0x180] ss:$16 sps:$4 sm:$0xff]  }
  0xa6   :  { %v3786_v4 = vld [vmem:[%s5490_s6 + $0x188] ss:$16 sps:$4 sm:$0xff]   ;;  %v3791_v5 = vld [vmem:[%s5490_s6 + $0x1a4] ss:$16 sps:$4 sm:$0xff]   ;;  %v3794_v6 = vld [vmem:[%s5490_s6 + $0x1ac] ss:$16 sps:$4 sm:$0xff]  }
  0xa7   :  { %1923 = vmatpush1.bf16.msra.mxu0 %v3765_v55  ;;  %2005 = vmatpush1.bf16.msra.mxu1 %v3768_v56  ;;  %v3789_v7 = vld [vmem:[%s5490_s6 + $0x1a0] ss:$16 sps:$4 sm:$0xff]   ;;  %v3792_v8 = vld [vmem:[%s5490_s6 + $0x1a8] ss:$16 sps:$4 sm:$0xff]   ;;  %v3797_v9 = vld [vmem:[%s5490_s6 + $0x1c4] ss:$16 sps:$4 sm:$0xff]  }
  0xa8   :  { %1924 = vmatprep.subr.bf16.mxu0 %v3773_v57  ;;  %2006 = vmatprep.subr.bf16.mxu1 %v3776_v58  ;;  %v3800_v10 = vld [vmem:[%s5490_s6 + $0x1cc] ss:$16 sps:$4 sm:$0xff]   ;;  %v3795_v11 = vld [vmem:[%s5490_s6 + $0x1c0] ss:$16 sps:$4 sm:$0xff]   ;;  %v3798_v12 = vld [vmem:[%s5490_s6 + $0x1c8] ss:$16 sps:$4 sm:$0xff]  }
  0xa9   :  { %v3803_v13 = vld [vmem:[%s5490_s6 + $0x1e4] ss:$16 sps:$4 sm:$0xff]   ;;  %v3806_v14 = vld [vmem:[%s5490_s6 + $0x1ec] ss:$16 sps:$4 sm:$0xff]   ;;  %v3801_v15 = vld [vmem:[%s5490_s6 + $0x1e0] ss:$16 sps:$4 sm:$0xff]  }
  0xaa   :  { %v3804_v16 = vld [vmem:[%s5490_s6 + $0x1e8] ss:$16 sps:$4 sm:$0xff]   ;;  %v3809_v17 = vld [vmem:[%s5490_s6 + $0x204] ss:$16 sps:$4 sm:$0xff]   ;;  %v3812_v18 = vld [vmem:[%s5490_s6 + $0x20c] ss:$16 sps:$4 sm:$0xff]  }
  0xab   :  { %1925 = vmatpush1.bf16.msra.mxu0 %v3771_v59  ;;  %2007 = vmatpush1.bf16.msra.mxu1 %v3774_v60  ;;  %v4826_v51 = vsub.s32 0, %v4349_v45  ;;  %v4829_v19 = vsub.s32 2, %v4349_v45  ;;  %v104_v20 = vld [vmem:[%s5487_s3] sm:$0xf]  ;;  %v4835_v21 = vsub.s32 1, %v4349_v45  ;;  %v4838_v22 = vsub.s32 3, %v4349_v45 }
  0xac   :  { %1926 = vmatprep.subr.bf16.mxu0 %v3779_v61  ;;  %2008 = vmatprep.subr.bf16.mxu1 %v3782_v62  ;;  %v4160_v23 = vmov 1983009808   ;;  %v4852_v49 = vld [vmem:[%s5489_s5] sm:$0xf]  ;;  %s4161_s21 = smov [#allocation2]  }
  0xad   :  { %v560_v24 = vunpack.c.l.s4 %v4160_v23  ;;  %v109_v25 = vrot.slane %v104_v20, %v4826_v51  ;;  %v117_v26 = vrot.slane %v104_v20, %v4829_v19  ;;  %v113_v27 = vrot.slane %v104_v20, %v4835_v21  ;;  %v3816_v23 = vld [vmem:[%s5490_s6 + $0x228] ss:$16 sps:$4 sm:$0xff]   ;;  %s3075_s22 = sshll.u32 %s4161_s21, 4  ;;  %s3076_s22 = int_to_ptr.vmem [resolvable:$true] %s3075_s22 }
  0xae   :  { %v121_v28 = vrot.slane %v104_v20, %v4838_v22  ;;  %v646_v50 = vrot.slane %v4852_v49, %v4826_v51  ;;  %v658_v52 = vrot.slane %v4852_v49, %v4838_v22  ;;  %v3813_v20 = vld [vmem:[%s5490_s6 + $0x220] ss:$16 sps:$4 sm:$0xff]   ;;  %s4111_s23 = scalar_lea.vmem %s3076_s22, 128  ;;  %p4116_p1 = scmp.lt.s32.totalorder %s3076_s22, %s3076_s22 }
  0xaf   :  { %1927 = vmatpush1.bf16.msra.mxu0 %v3777_v63  ;;  %2009 = vmatpush1.bf16.msra.mxu1 %v3780_v0  ;;  %v561_v29 = vunpack.c.0.s8 %v560_v24  ;;  %v3821_v24 = vld [vmem:[%s5490_s6 + $0x244] ss:$16 sps:$4 sm:$0xff]   ;;  %p4112_p0 = scmp.ne.s32.totalorder %s3076_s22, %s4111_s23  ;;  %p4117_p2 = scmp.lt.s32.totalorder %s4111_s23, %s4111_s23 }
  0xb0   :  { %1928 = vmatprep.subr.bf16.mxu0 %v3785_v1  ;;  %2010 = vmatprep.subr.bf16.mxu1 %v3788_v2 }
  0xb1   :  { %v4845_v40 = vsub.s32 %v561_v29, %v4349_v45  ;;  %v650_v45 = vrot.slane %v4852_v49, %v4835_v21  ;;  %v3830_v29 = vld [vmem:[%s5490_s6 + $0x26c] ss:$16 sps:$4 sm:$0xff]   ;;  %p4118_p3 = por %p4117_p2, %p4116_p1 }
  0xb3   :  { %1929 = vmatpush1.bf16.msra.mxu0 %v3783_v3  ;;  %2011 = vmatpush1.bf16.msra.mxu1 %v3786_v4  ;;  %p4119_p4 = pnand %p4118_p3, %p4112_p0 }
  0xb4   :  { %1930 = vmatprep.subr.bf16.mxu0 %v3791_v5  ;;  %2012 = vmatprep.subr.bf16.mxu1 %v3794_v6 }
  0xb7   :  { %1931 = vmatpush1.bf16.msra.mxu0 %v3789_v7  ;;  %2013 = vmatpush1.bf16.msra.mxu1 %v3792_v8 }
  0xb8   :  { %1932 = vmatprep.subr.bf16.mxu0 %v3797_v9  ;;  %2014 = vmatprep.subr.bf16.mxu1 %v3800_v10 }
  0xbb   :  { %1933 = vmatpush1.bf16.msra.mxu0 %v3795_v11  ;;  %2015 = vmatpush1.bf16.msra.mxu1 %v3798_v12  ;;  %v3807_v12 = vld [vmem:[%s5490_s6 + $0x200] ss:$16 sps:$4 sm:$0xff]  }
  0xbc   :  { %1934 = vmatprep.subr.bf16.mxu0 %v3803_v13  ;;  %2016 = vmatprep.subr.bf16.mxu1 %v3806_v14  ;;  %v3810_v13 = vld [vmem:[%s5490_s6 + $0x208] ss:$16 sps:$4 sm:$0xff]  }
  0xbf   :  { %1935 = vmatpush1.bf16.msra.mxu0 %v3801_v15  ;;  %2017 = vmatpush1.bf16.msra.mxu1 %v3804_v16  ;;  %v3815_v15 = vld [vmem:[%s5490_s6 + $0x224] ss:$16 sps:$4 sm:$0xff]   ;;  %v3818_v16 = vld [vmem:[%s5490_s6 + $0x22c] ss:$16 sps:$4 sm:$0xff]  }
  0xc0   :  { %1945 = vmatprep.subr.bf16.mxu0 %v3809_v17  ;;  %2027 = vmatprep.subr.bf16.mxu1 %v3812_v18 }
 0x115   :  { %v505_v30 = vpop.f32.mrb[0].mxu0  ;;  %v546_v31 = vpop.f32.mrb[0].mxu1 }
 0x116   :  { %v506_v32 = vadd.f32 %v505_v30, %v109_v25  ;;  %v547_v33 = vadd.f32 %v546_v31, %v117_v26  ;;  %v507_v34 = vpop.f32.mrb[1].mxu0  ;;  %v548_v35 = vpop.f32.mrb[1].mxu1  ;;  %v3824_v25 = vld [vmem:[%s5490_s6 + $0x24c] ss:$16 sps:$4 sm:$0xff]   ;;  %v3819_v26 = vld [vmem:[%s5490_s6 + $0x240] ss:$16 sps:$4 sm:$0xff]  }
 0x117   :  { %v508_v36 = vadd.f32 %v507_v34, %v113_v27  ;;  %v549_v37 = vadd.f32 %v548_v35, %v121_v28  ;;  %v509_v38 = vpop.f32.mrb[2].mxu0  ;;  %v550_v39 = vpop.f32.mrb[2].mxu1  ;;  %v3822_v27 = vld [vmem:[%s5490_s6 + $0x248] ss:$16 sps:$4 sm:$0xff]   ;;  %v3827_v28 = vld [vmem:[%s5490_s6 + $0x264] ss:$16 sps:$4 sm:$0xff]  }
 0x118   :  { %v510_v41 = vpop.f32.mrb[3].mxu0  ;;  %v551_v42 = vpop.f32.mrb[3].mxu1  ;;  %v3825_v30 = vld [vmem:[%s5490_s6 + $0x260] ss:$16 sps:$4 sm:$0xff]   ;;  %v3828_v31 = vld [vmem:[%s5490_s6 + $0x268] ss:$16 sps:$4 sm:$0xff]  }
 0x119   :  { %v557_v43 = vcombine.low %v506_v32, %v508_v36  ;;  %v558_v44 = vcombine.low %v547_v33, %v549_v37  ;;  %v3833_v32 = vld [vmem:[%s5490_s6 + $0x284] ss:$16 sps:$4 sm:$0xff]   ;;  %v3836_v33 = vld [vmem:[%s5490_s6 + $0x28c] ss:$16 sps:$4 sm:$0xff]   ;;  %v3831_v34 = vld [vmem:[%s5490_s6 + $0x280] ss:$16 sps:$4 sm:$0xff]  }
 0x11a   :  { %v3834_v35 = vld [vmem:[%s5490_s6 + $0x288] ss:$16 sps:$4 sm:$0xff]   ;;  %v3839_v36 = vld [vmem:[%s5490_s6 + $0x2a4] ss:$16 sps:$4 sm:$0xff]   ;;  %v3842_v37 = vld [vmem:[%s5490_s6 + $0x2ac] ss:$16 sps:$4 sm:$0xff]  }
 0x11b   :  { %v565_v46 = vrot.slane %v557_v43, %v4845_v40  ;;  %v572_v47 = vrot.slane %v558_v44, %v4845_v40  ;;  %v3837_v38 = vld [vmem:[%s5490_s6 + $0x2a0] ss:$16 sps:$4 sm:$0xff]   ;;  %v3840_v39 = vld [vmem:[%s5490_s6 + $0x2a8] ss:$16 sps:$4 sm:$0xff]   ;;  %v3845_v41 = vld [vmem:[%s5490_s6 + $0x2c4] ss:$16 sps:$4 sm:$0xff]  }
 0x11c   :  { %v3848_v42 = vld [vmem:[%s5490_s6 + $0x2cc] ss:$16 sps:$4 sm:$0xff]   ;;  %v3843_v43 = vld [vmem:[%s5490_s6 + $0x2c0] ss:$16 sps:$4 sm:$0xff]   ;;  %v3846_v44 = vld [vmem:[%s5490_s6 + $0x2c8] ss:$16 sps:$4 sm:$0xff]  }
 0x11d   :  { %v573_v48 = vcombine.low %v565_v46, %v572_v47  ;;  %v3851_v46 = vld [vmem:[%s5490_s6 + $0x2e4] ss:$16 sps:$4 sm:$0xff]   ;;  %v3854_v47 = vld [vmem:[%s5490_s6 + $0x2ec] ss:$16 sps:$4 sm:$0xff]  }
 0x11f   :  { %575 = vst [vmem:[#allocation2] sm:$0xff] %v573_v48  ;;  %v3849_v48 = vld [vmem:[%s5490_s6 + $0x2e0] ss:$16 sps:$4 sm:$0xff]  }
 0x155   :  { %v1042_v53 = vpop.f32.mrb[4].mxu0  ;;  %v4860_v54 = vpop.f32.mrb[4].mxu1 }
 0x156   :  { %v1043_v55 = vadd.f32 %v1042_v53, %v646_v50  ;;  %v1044_v56 = vpop.f32.mrb[5].mxu0  ;;  %v1085_v57 = vpop.f32.mrb[5].mxu1  ;;  %v3852_v50 = vld [vmem:[%s5490_s6 + $0x2e8] ss:$16 sps:$4 sm:$0xff]   ;;  %v3855_v53 = vld [vmem:[%s5490_s6 + $0x300] ss:$16 sps:$4 sm:$0xff]  }
 0x157   :  { %v1045_v58 = vadd.f32 %v1044_v56, %v650_v45  ;;  %v1046_v59 = vpop.f32.mrb[6].mxu0  ;;  %v1086_v60 = vadd.f32 %v1085_v57, %v658_v52  ;;  %v1087_v61 = vpop.f32.mrb[6].mxu1  ;;  %v3857_v45 = vld [vmem:[%s5490_s6 + $0x304] ss:$16 sps:$4 sm:$0xff]   ;;  %v3860_v52 = vld [vmem:[%s5490_s6 + $0x30c] ss:$16 sps:$4 sm:$0xff]   ;;  %v654_v56 = vrot.slane %v4852_v49, %v4829_v19 }
 0x158   :  { %v1094_v62 = vmul.f32 1.442695, %v1043_v55  ;;  %v1047_v63 = vpop.f32.mrb[7].mxu0  ;;  %v1088_v0 = vpop.f32.mrb[7].mxu1  ;;  %vm1090_vm0 = vcmp.gt.f32.partialorder %v1043_v55, 0.0 }
 0x159   :  { %v1096_v1 = vmul.f32 1.442695, %v1045_v58  ;;  %v1100_v2 = vmul.f32 1.442695, %v1086_v60  ;;  %vm1091_vm1 = vcmp.gt.f32.partialorder %v1045_v58, 0.0  ;;  %vm1093_vm2 = vcmp.gt.f32.partialorder %v1086_v60, 0.0 }
 0x15a   :  { %4095 = vpow2.f32 %v1094_v62  ;;  %v3863_v57 = vld [vmem:[%s5490_s6 + $0x324] ss:$16 sps:$4 sm:$0xff]   ;;  %v3861_v59 = vld [vmem:[%s5490_s6 + $0x320] ss:$16 sps:$4 sm:$0xff]   ;;  %v3864_v49 = vld [vmem:[%s5490_s6 + $0x328] ss:$16 sps:$4 sm:$0xff]  }
 0x15b   :  { %4097 = vpow2.f32 %v1096_v1  ;;  %v3869_v61 = vld [vmem:[%s5490_s6 + $0x344] ss:$16 sps:$4 sm:$0xff]   ;;  %v3872_v62 = vld [vmem:[%s5490_s6 + $0x34c] ss:$16 sps:$4 sm:$0xff]   ;;  %v3867_v63 = vld [vmem:[%s5490_s6 + $0x340] ss:$16 sps:$4 sm:$0xff]  }
 0x15c   :  { %4099 = vpow2.f32 %v1100_v2  ;;  %v3875_v1 = vld [vmem:[%s5490_s6 + $0x364] ss:$16 sps:$4 sm:$0xff]   ;;  %v3878_v2 = vld [vmem:[%s5490_s6 + $0x36c] ss:$16 sps:$4 sm:$0xff]  }
 0x164   :  { %v4096_v3 = vpop.eup %4095 }
 0x165   :  { %v4098_v4 = vpop.eup %4097  ;;  %v3227_v5 = vadd.f32 -1.0, %v4096_v3  ;;  %v3873_v3 = vld [vmem:[%s5490_s6 + $0x360] ss:$16 sps:$4 sm:$0xff]  }
 0x166   :  { %v3228_v6 = vadd.f32 -1.0, %v4098_v4  ;;  %v4100_v7 = vpop.eup %4099  ;;  %v3876_v4 = vld [vmem:[%s5490_s6 + $0x368] ss:$16 sps:$4 sm:$0xff]  }
 0x167   :  { %v1106_v8 = vsel %vm1090_vm0, %v1043_v55, %v3227_v5  ;;  %v3230_v10 = vadd.f32 -1.0, %v4100_v7  ;;  %v3858_v55 = vld [vmem:[%s5490_s6 + $0x308] ss:$16 sps:$4 sm:$0xff]   ;;  %v3881_v5 = vld [vmem:[%s5490_s6 + $0x384] ss:$16 sps:$4 sm:$0xff]  }
 0x168   :  { %v1107_v9 = vsel %vm1091_vm1, %v1045_v58, %v3228_v6  ;;  %v1110_v14 = vpack.c.bf16 %v1106_v8, %v1106_v8  ;;  %v3866_v58 = vld [vmem:[%s5490_s6 + $0x32c] ss:$16 sps:$4 sm:$0xff]   ;;  %v3879_v7 = vld [vmem:[%s5490_s6 + $0x380] ss:$16 sps:$4 sm:$0xff]   ;;  %v3882_v8 = vld [vmem:[%s5490_s6 + $0x388] ss:$16 sps:$4 sm:$0xff]  }
 0x169   :  { %v1111_v11 = vpack.c.bf16 %v1107_v9, %v1107_v9  ;;  %v1109_v17 = vsel %vm1093_vm2, %v1086_v60, %v3230_v10  ;;  %v1084_v60 = vadd.f32 %v4860_v54, %v654_v56  ;;  %v3870_v54 = vld [vmem:[%s5490_s6 + $0x348] ss:$16 sps:$4 sm:$0xff]   ;;  %v3884_v6 = vld [vmem:[%s5490_s6 + $0x38c] ss:$16 sps:$4 sm:$0xff]   ;;  %v3887_v9 = vld [vmem:[%s5490_s6 + $0x3a4] ss:$16 sps:$4 sm:$0xff]  }
 0x16a   :  { %v1113_v18 = vpack.c.bf16 %v1109_v17, %v1109_v17  ;;  %v3890_v10 = vld [vmem:[%s5490_s6 + $0x3ac] ss:$16 sps:$4 sm:$0xff]   ;;  %v3894_v17 = vld [vmem:[%s5490_s6 + $0x3c8] ss:$16 sps:$4 sm:$0xff]   ;;  %v3941_v56 = vld [vmem:[%s5492_s8 + $0xc4] ss:$16 sps:$4 sm:$0xff]  }
 0x16b   :  { %1936 = vmatprep.mubr.bf16.mxu0 %v1111_v11  ;;  %2018 = vmatprep.mubr.bf16.mxu1 %v1111_v11  ;;  %v1098_v0 = vmul.f32 1.442695, %v1084_v60  ;;  %v3885_v11 = vld [vmem:[%s5490_s6 + $0x3a0] ss:$16 sps:$4 sm:$0xff]   ;;  %vm1092_vm3 = vcmp.gt.f32.partialorder %v1084_v60, 0.0 }
 0x16c   :  { %1937 = vmatmul.mubr.bf16.vlgmr.msra.gmra.mrb[8].mxu0 %v1110_v14  ;;  %2019 = vmatmul.mubr.bf16.vlgmr.msra.gmra.mrb[8].mxu1 %v1110_v14  ;;  %v3896_v14 = vld [vmem:[%s5490_s6 + $0x3cc] ss:$16 sps:$4 sm:$0xff]  }
 0x16d   :  { %1946 = vmatpush1.bf16.msra.mxu0 %v3807_v12  ;;  %2028 = vmatpush1.bf16.msra.mxu1 %v3810_v13  ;;  %4101 = vpow2.f32 %v1098_v0  ;;  %v3888_v12 = vld [vmem:[%s5490_s6 + $0x3a8] ss:$16 sps:$4 sm:$0xff]   ;;  %v3893_v13 = vld [vmem:[%s5490_s6 + $0x3c4] ss:$16 sps:$4 sm:$0xff]   ;;  %v3951_v0 = vld [vmem:[%s5492_s8 + $0x100] ss:$16 sps:$4 sm:$0xff]  }
 0x16e   :  { %1947 = vmatprep.subr.bf16.mxu0 %v3815_v15  ;;  %2029 = vmatprep.subr.bf16.mxu1 %v3818_v16  ;;  %v3891_v16 = vld [vmem:[%s5490_s6 + $0x3c0] ss:$16 sps:$4 sm:$0xff]  }
 0x16f   :  { %1977 = vmatprep.mubr.bf16.mxu0 %v1113_v18  ;;  %2059 = vmatprep.mubr.bf16.mxu1 %v1113_v18  ;;  %v3899_v18 = vld [vmem:[%s5490_s6 + $0x3e4] ss:$16 sps:$4 sm:$0xff]  }
 0x171   :  { %1948 = vmatpush1.bf16.msra.mxu0 %v3813_v20  ;;  %2030 = vmatpush1.bf16.msra.mxu1 %v3816_v23  ;;  %v3902_v20 = vld [vmem:[%s5490_s6 + $0x3ec] ss:$16 sps:$4 sm:$0xff]  }
 0x172   :  { %1949 = vmatprep.subr.bf16.mxu0 %v3821_v24  ;;  %2031 = vmatprep.subr.bf16.mxu1 %v3824_v25  ;;  %v3897_v24 = vld [vmem:[%s5490_s6 + $0x3e0] ss:$16 sps:$4 sm:$0xff]   ;;  %v3900_v25 = vld [vmem:[%s5490_s6 + $0x3e8] ss:$16 sps:$4 sm:$0xff]  }
 0x175   :  { %1950 = vmatpush1.bf16.msra.mxu0 %v3819_v26  ;;  %2032 = vmatpush1.bf16.msra.mxu1 %v3822_v27  ;;  %v3905_v26 = vld [vmem:[%s5492_s8 + $0x4] ss:$16 sps:$4 sm:$0xff]   ;;  %v3908_v27 = vld [vmem:[%s5492_s8 + $0xc] ss:$16 sps:$4 sm:$0xff]  }
 0x176   :  { %1951 = vmatprep.subr.bf16.mxu0 %v3827_v28  ;;  %2033 = vmatprep.subr.bf16.mxu1 %v3830_v29  ;;  %v3903_v29 = vld [vmem:[%s5492_s8] ss:$16 sps:$4 sm:$0xff]  }
 0x177   :  { %v4102_v15 = vpop.eup %4101 }
 0x178   :  { %v3229_v23 = vadd.f32 -1.0, %v4102_v15  ;;  %v3980_v15 = vld [vmem:[%s5492_s8 + $0x18c] ss:$16 sps:$4 sm:$0xff]  }
 0x179   :  { %1952 = vmatpush1.bf16.msra.mxu0 %v3825_v30  ;;  %2034 = vmatpush1.bf16.msra.mxu1 %v3828_v31  ;;  %v3906_v30 = vld [vmem:[%s5492_s8 + $0x8] ss:$16 sps:$4 sm:$0xff]  }
 0x17a   :  { %1953 = vmatprep.subr.bf16.mxu0 %v3833_v32  ;;  %2035 = vmatprep.subr.bf16.mxu1 %v3836_v33  ;;  %v1108_v28 = vsel %vm1092_vm3, %v1084_v60, %v3229_v23  ;;  %v3911_v32 = vld [vmem:[%s5492_s8 + $0x24] ss:$16 sps:$4 sm:$0xff]   ;;  %v3914_v33 = vld [vmem:[%s5492_s8 + $0x2c] ss:$16 sps:$4 sm:$0xff]   ;;  %v3981_v23 = vld [vmem:[%s5492_s8 + $0x1a0] ss:$16 sps:$4 sm:$0xff]  }
 0x17b   :  { %v1112_v31 = vpack.c.bf16 %v1108_v28, %v1108_v28  ;;  %v3950_v60 = vld [vmem:[%s5492_s8 + $0xec] ss:$16 sps:$4 sm:$0xff]   ;;  %v3990_v28 = vld [vmem:[%s5492_s8 + $0x1c8] ss:$16 sps:$4 sm:$0xff]  }
 0x17d   :  { %1954 = vmatpush1.bf16.msra.mxu0 %v3831_v34  ;;  %2036 = vmatpush1.bf16.msra.mxu1 %v3834_v35  ;;  %v3909_v34 = vld [vmem:[%s5492_s8 + $0x20] ss:$16 sps:$4 sm:$0xff]   ;;  %v3912_v35 = vld [vmem:[%s5492_s8 + $0x28] ss:$16 sps:$4 sm:$0xff]  }
 0x17e   :  { %1955 = vmatprep.subr.bf16.mxu0 %v3839_v36  ;;  %2037 = vmatprep.subr.bf16.mxu1 %v3842_v37  ;;  %v3917_v36 = vld [vmem:[%s5492_s8 + $0x44] ss:$16 sps:$4 sm:$0xff]   ;;  %v3920_v37 = vld [vmem:[%s5492_s8 + $0x4c] ss:$16 sps:$4 sm:$0xff]  }
 0x181   :  { %1956 = vmatpush1.bf16.msra.mxu0 %v3837_v38  ;;  %2038 = vmatpush1.bf16.msra.mxu1 %v3840_v39  ;;  %v3915_v38 = vld [vmem:[%s5492_s8 + $0x40] ss:$16 sps:$4 sm:$0xff]   ;;  %v3918_v39 = vld [vmem:[%s5492_s8 + $0x48] ss:$16 sps:$4 sm:$0xff]  }
 0x182   :  { %1957 = vmatprep.subr.bf16.mxu0 %v3845_v41  ;;  %2039 = vmatprep.subr.bf16.mxu1 %v3848_v42  ;;  %v3923_v41 = vld [vmem:[%s5492_s8 + $0x64] ss:$16 sps:$4 sm:$0xff]   ;;  %v3926_v42 = vld [vmem:[%s5492_s8 + $0x6c] ss:$16 sps:$4 sm:$0xff]  }
 0x185   :  { %1958 = vmatpush1.bf16.msra.mxu0 %v3843_v43  ;;  %2040 = vmatpush1.bf16.msra.mxu1 %v3846_v44  ;;  %v3921_v43 = vld [vmem:[%s5492_s8 + $0x60] ss:$16 sps:$4 sm:$0xff]   ;;  %v3924_v44 = vld [vmem:[%s5492_s8 + $0x68] ss:$16 sps:$4 sm:$0xff]  }
 0x186   :  { %1959 = vmatprep.subr.bf16.mxu0 %v3851_v46  ;;  %2041 = vmatprep.subr.bf16.mxu1 %v3854_v47  ;;  %v3929_v46 = vld [vmem:[%s5492_s8 + $0x84] ss:$16 sps:$4 sm:$0xff]   ;;  %v3932_v47 = vld [vmem:[%s5492_s8 + $0x8c] ss:$16 sps:$4 sm:$0xff]  }
 0x189   :  { %1960 = vmatpush1.bf16.msra.mxu0 %v3849_v48  ;;  %2042 = vmatpush1.bf16.msra.mxu1 %v3852_v50  ;;  %v3927_v48 = vld [vmem:[%s5492_s8 + $0x80] ss:$16 sps:$4 sm:$0xff]   ;;  %v3930_v50 = vld [vmem:[%s5492_s8 + $0x88] ss:$16 sps:$4 sm:$0xff]  }
 0x18a   :  { %1961 = vmatprep.subr.bf16.mxu0 %v3857_v45  ;;  %2043 = vmatprep.subr.bf16.mxu1 %v3860_v52  ;;  %v3935_v45 = vld [vmem:[%s5492_s8 + $0xa4] ss:$16 sps:$4 sm:$0xff]   ;;  %v3938_v52 = vld [vmem:[%s5492_s8 + $0xac] ss:$16 sps:$4 sm:$0xff]  }
 0x18d   :  { %1962 = vmatpush1.bf16.msra.mxu0 %v3855_v53  ;;  %2044 = vmatpush1.bf16.msra.mxu1 %v3858_v55  ;;  %v3933_v53 = vld [vmem:[%s5492_s8 + $0xa0] ss:$16 sps:$4 sm:$0xff]   ;;  %v3936_v55 = vld [vmem:[%s5492_s8 + $0xa8] ss:$16 sps:$4 sm:$0xff]  }
 0x18e   :  { %1963 = vmatprep.subr.bf16.mxu0 %v3863_v57  ;;  %2045 = vmatprep.subr.bf16.mxu1 %v3866_v58  ;;  %v3944_v57 = vld [vmem:[%s5492_s8 + $0xcc] ss:$16 sps:$4 sm:$0xff]   ;;  %v3939_v58 = vld [vmem:[%s5492_s8 + $0xc0] ss:$16 sps:$4 sm:$0xff]  }
 0x191   :  { %1964 = vmatpush1.bf16.msra.mxu0 %v3861_v59  ;;  %2046 = vmatpush1.bf16.msra.mxu1 %v3864_v49  ;;  %v3942_v59 = vld [vmem:[%s5492_s8 + $0xc8] ss:$16 sps:$4 sm:$0xff]   ;;  %v3947_v49 = vld [vmem:[%s5492_s8 + $0xe4] ss:$16 sps:$4 sm:$0xff]  }
 0x192   :  { %1965 = vmatprep.subr.bf16.mxu0 %v3869_v61  ;;  %2047 = vmatprep.subr.bf16.mxu1 %v3872_v62  ;;  %v3945_v61 = vld [vmem:[%s5492_s8 + $0xe0] ss:$16 sps:$4 sm:$0xff]   ;;  %v3948_v62 = vld [vmem:[%s5492_s8 + $0xe8] ss:$16 sps:$4 sm:$0xff]  }
 0x195   :  { %1966 = vmatpush1.bf16.msra.mxu0 %v3867_v63  ;;  %2048 = vmatpush1.bf16.msra.mxu1 %v3870_v54  ;;  %v3953_v63 = vld [vmem:[%s5492_s8 + $0x104] ss:$16 sps:$4 sm:$0xff]   ;;  %v3956_v54 = vld [vmem:[%s5492_s8 + $0x10c] ss:$16 sps:$4 sm:$0xff]  }
 0x196   :  { %1967 = vmatprep.subr.bf16.mxu0 %v3875_v1  ;;  %2049 = vmatprep.subr.bf16.mxu1 %v3878_v2  ;;  %v3954_v1 = vld [vmem:[%s5492_s8 + $0x108] ss:$16 sps:$4 sm:$0xff]   ;;  %v3959_v2 = vld [vmem:[%s5492_s8 + $0x124] ss:$16 sps:$4 sm:$0xff]  }
 0x199   :  { %1968 = vmatpush1.bf16.msra.mxu0 %v3873_v3  ;;  %2050 = vmatpush1.bf16.msra.mxu1 %v3876_v4  ;;  %v3962_v3 = vld [vmem:[%s5492_s8 + $0x12c] ss:$16 sps:$4 sm:$0xff]   ;;  %v3957_v4 = vld [vmem:[%s5492_s8 + $0x120] ss:$16 sps:$4 sm:$0xff]  }
 0x19a   :  { %1969 = vmatprep.subr.bf16.mxu0 %v3881_v5  ;;  %2051 = vmatprep.subr.bf16.mxu1 %v3884_v6  ;;  %v3960_v5 = vld [vmem:[%s5492_s8 + $0x128] ss:$16 sps:$4 sm:$0xff]   ;;  %v3965_v6 = vld [vmem:[%s5492_s8 + $0x144] ss:$16 sps:$4 sm:$0xff]  }
 0x19d   :  { %1970 = vmatpush1.bf16.msra.mxu0 %v3879_v7  ;;  %2052 = vmatpush1.bf16.msra.mxu1 %v3882_v8  ;;  %v3968_v7 = vld [vmem:[%s5492_s8 + $0x14c] ss:$16 sps:$4 sm:$0xff]   ;;  %v3963_v8 = vld [vmem:[%s5492_s8 + $0x140] ss:$16 sps:$4 sm:$0xff]  }
 0x19e   :  { %1971 = vmatprep.subr.bf16.mxu0 %v3887_v9  ;;  %2053 = vmatprep.subr.bf16.mxu1 %v3890_v10  ;;  %v3966_v9 = vld [vmem:[%s5492_s8 + $0x148] ss:$16 sps:$4 sm:$0xff]   ;;  %v3971_v10 = vld [vmem:[%s5492_s8 + $0x164] ss:$16 sps:$4 sm:$0xff]  }
 0x1a1   :  { %1972 = vmatpush1.bf16.msra.mxu0 %v3885_v11  ;;  %2054 = vmatpush1.bf16.msra.mxu1 %v3888_v12  ;;  %v3974_v11 = vld [vmem:[%s5492_s8 + $0x16c] ss:$16 sps:$4 sm:$0xff]   ;;  %v3969_v12 = vld [vmem:[%s5492_s8 + $0x160] ss:$16 sps:$4 sm:$0xff]  }
 0x1a2   :  { %1973 = vmatprep.subr.bf16.mxu0 %v3893_v13  ;;  %2055 = vmatprep.subr.bf16.mxu1 %v3896_v14  ;;  %v3972_v13 = vld [vmem:[%s5492_s8 + $0x168] ss:$16 sps:$4 sm:$0xff]   ;;  %v3977_v14 = vld [vmem:[%s5492_s8 + $0x184] ss:$16 sps:$4 sm:$0xff]  }
 0x1a5   :  { %1974 = vmatpush1.bf16.msra.mxu0 %v3891_v16  ;;  %2056 = vmatpush1.bf16.msra.mxu1 %v3894_v17  ;;  %v3975_v16 = vld [vmem:[%s5492_s8 + $0x180] ss:$16 sps:$4 sm:$0xff]   ;;  %v3978_v17 = vld [vmem:[%s5492_s8 + $0x188] ss:$16 sps:$4 sm:$0xff]  }
 0x1a6   :  { %1975 = vmatprep.subr.bf16.mxu0 %v3899_v18  ;;  %2057 = vmatprep.subr.bf16.mxu1 %v3902_v20  ;;  %v3983_v18 = vld [vmem:[%s5492_s8 + $0x1a4] ss:$16 sps:$4 sm:$0xff]   ;;  %v3986_v20 = vld [vmem:[%s5492_s8 + $0x1ac] ss:$16 sps:$4 sm:$0xff]  }
 0x1a9   :  { %1976 = vmatpush1.bf16.msra.mxu0 %v3897_v24  ;;  %2058 = vmatpush1.bf16.msra.mxu1 %v3900_v25  ;;  %v3984_v24 = vld [vmem:[%s5492_s8 + $0x1a8] ss:$16 sps:$4 sm:$0xff]   ;;  %v3989_v25 = vld [vmem:[%s5492_s8 + $0x1c4] ss:$16 sps:$4 sm:$0xff]  }
 0x1aa   :  { %2882 = vmatprep.subr.bf16.mxu0 %v3905_v26  ;;  %2964 = vmatprep.subr.bf16.mxu1 %v3908_v27  ;;  %v3992_v26 = vld [vmem:[%s5492_s8 + $0x1cc] ss:$16 sps:$4 sm:$0xff]   ;;  %v3987_v27 = vld [vmem:[%s5492_s8 + $0x1c0] ss:$16 sps:$4 sm:$0xff]  }
 0x1ac   :  { %1978 = vmatmul.mubr.bf16.vlgmr.msra.gmra.mrb[8].mxu0 %v1112_v31  ;;  %2060 = vmatmul.mubr.bf16.vlgmr.msra.gmra.mrb[8].mxu1 %v1112_v31  ;;  %v3993_v31 = vld [vmem:[%s5492_s8 + $0x1e0] ss:$16 sps:$4 sm:$0xff]  }
 0x1ad   :  { %2883 = vmatpush1.bf16.msra.mxu0 %v3903_v29  ;;  %2965 = vmatpush1.bf16.msra.mxu1 %v3906_v30  ;;  %v3995_v29 = vld [vmem:[%s5492_s8 + $0x1e4] ss:$16 sps:$4 sm:$0xff]   ;;  %v3998_v30 = vld [vmem:[%s5492_s8 + $0x1ec] ss:$16 sps:$4 sm:$0xff]  }
 0x1ae   :  { %2884 = vmatprep.subr.bf16.mxu0 %v3911_v32  ;;  %2966 = vmatprep.subr.bf16.mxu1 %v3914_v33  ;;  %v3996_v32 = vld [vmem:[%s5492_s8 + $0x1e8] ss:$16 sps:$4 sm:$0xff]   ;;  %v4001_v33 = vld [vmem:[%s5492_s8 + $0x204] ss:$16 sps:$4 sm:$0xff]  }
 0x1b1   :  { %2885 = vmatpush1.bf16.msra.mxu0 %v3909_v34  ;;  %2967 = vmatpush1.bf16.msra.mxu1 %v3912_v35  ;;  %v4004_v34 = vld [vmem:[%s5492_s8 + $0x20c] ss:$16 sps:$4 sm:$0xff]   ;;  %v5252_v35 = vld [vmem:[%s5491_s7] sm:$0xf] }
 0x1b2   :  { %2886 = vmatprep.subr.bf16.mxu0 %v3917_v36  ;;  %2968 = vmatprep.subr.bf16.mxu1 %v3920_v37  ;;  %v1247_v36 = vrot.slane %v5252_v35, %v4826_v51  ;;  %v1251_v37 = vrot.slane %v5252_v35, %v4835_v21 }
 0x1b5   :  { %2887 = vmatpush1.bf16.msra.mxu0 %v3915_v38  ;;  %2969 = vmatpush1.bf16.msra.mxu1 %v3918_v39  ;;  %v1259_v38 = vrot.slane %v5252_v35, %v4838_v22 }
 0x1b6   :  { %2888 = vmatprep.subr.bf16.mxu0 %v3923_v41  ;;  %2970 = vmatprep.subr.bf16.mxu1 %v3926_v42 }
 0x1b9   :  { %2889 = vmatpush1.bf16.msra.mxu0 %v3921_v43  ;;  %2971 = vmatpush1.bf16.msra.mxu1 %v3924_v44 }
 0x1ba   :  { %2890 = vmatprep.subr.bf16.mxu0 %v3929_v46  ;;  %2972 = vmatprep.subr.bf16.mxu1 %v3932_v47 }
 0x1bd   :  { %2891 = vmatpush1.bf16.msra.mxu0 %v3927_v48  ;;  %2973 = vmatpush1.bf16.msra.mxu1 %v3930_v50 }
 0x1be   :  { %2892 = vmatprep.subr.bf16.mxu0 %v3935_v45  ;;  %2974 = vmatprep.subr.bf16.mxu1 %v3938_v52 }
 0x1c1   :  { %2893 = vmatpush1.bf16.msra.mxu0 %v3933_v53  ;;  %2975 = vmatpush1.bf16.msra.mxu1 %v3936_v55 }
 0x1c2   :  { %2894 = vmatprep.subr.bf16.mxu0 %v3941_v56  ;;  %2976 = vmatprep.subr.bf16.mxu1 %v3944_v57 }
 0x1c5   :  { %2895 = vmatpush1.bf16.msra.mxu0 %v3939_v58  ;;  %2977 = vmatpush1.bf16.msra.mxu1 %v3942_v59 }
 0x1c6   :  { %2896 = vmatprep.subr.bf16.mxu0 %v3947_v49  ;;  %2978 = vmatprep.subr.bf16.mxu1 %v3950_v60 }
 0x1c9   :  { %2897 = vmatpush1.bf16.msra.mxu0 %v3945_v61  ;;  %2979 = vmatpush1.bf16.msra.mxu1 %v3948_v62 }
 0x1ca   :  { %2898 = vmatprep.subr.bf16.mxu0 %v3953_v63  ;;  %2980 = vmatprep.subr.bf16.mxu1 %v3956_v54 }
 0x1cd   :  { %2899 = vmatpush1.bf16.msra.mxu0 %v3951_v0  ;;  %2981 = vmatpush1.bf16.msra.mxu1 %v3954_v1  ;;  %v3999_v0 = vld [vmem:[%s5492_s8 + $0x200] ss:$16 sps:$4 sm:$0xff]   ;;  %v4002_v1 = vld [vmem:[%s5492_s8 + $0x208] ss:$16 sps:$4 sm:$0xff]  }
 0x1ce   :  { %2900 = vmatprep.subr.bf16.mxu0 %v3959_v2  ;;  %2982 = vmatprep.subr.bf16.mxu1 %v3962_v3 }
 0x1d1   :  { %2901 = vmatpush1.bf16.msra.mxu0 %v3957_v4  ;;  %2983 = vmatpush1.bf16.msra.mxu1 %v3960_v5  ;;  %v4007_v4 = vld [vmem:[%s5492_s8 + $0x224] ss:$16 sps:$4 sm:$0xff]   ;;  %v4010_v5 = vld [vmem:[%s5492_s8 + $0x22c] ss:$16 sps:$4 sm:$0xff]  }
 0x1d2   :  { %2902 = vmatprep.subr.bf16.mxu0 %v3965_v6  ;;  %2984 = vmatprep.subr.bf16.mxu1 %v3968_v7  ;;  %v4005_v7 = vld [vmem:[%s5492_s8 + $0x220] ss:$16 sps:$4 sm:$0xff]  }
 0x1d5   :  { %2903 = vmatpush1.bf16.msra.mxu0 %v3963_v8  ;;  %2985 = vmatpush1.bf16.msra.mxu1 %v3966_v9  ;;  %v4008_v8 = vld [vmem:[%s5492_s8 + $0x228] ss:$16 sps:$4 sm:$0xff]   ;;  %v4013_v9 = vld [vmem:[%s5492_s8 + $0x244] ss:$16 sps:$4 sm:$0xff]  }
 0x1d6   :  { %2904 = vmatprep.subr.bf16.mxu0 %v3971_v10  ;;  %2986 = vmatprep.subr.bf16.mxu1 %v3974_v11  ;;  %v4016_v10 = vld [vmem:[%s5492_s8 + $0x24c] ss:$16 sps:$4 sm:$0xff]   ;;  %v4011_v11 = vld [vmem:[%s5492_s8 + $0x240] ss:$16 sps:$4 sm:$0xff]  }
 0x1d9   :  { %2905 = vmatpush1.bf16.msra.mxu0 %v3969_v12  ;;  %2987 = vmatpush1.bf16.msra.mxu1 %v3972_v13  ;;  %v4014_v12 = vld [vmem:[%s5492_s8 + $0x248] ss:$16 sps:$4 sm:$0xff]   ;;  %v4019_v13 = vld [vmem:[%s5492_s8 + $0x264] ss:$16 sps:$4 sm:$0xff]  }
 0x1da   :  { %2906 = vmatprep.subr.bf16.mxu0 %v3977_v14  ;;  %2988 = vmatprep.subr.bf16.mxu1 %v3980_v15  ;;  %v4022_v14 = vld [vmem:[%s5492_s8 + $0x26c] ss:$16 sps:$4 sm:$0xff]   ;;  %v4017_v15 = vld [vmem:[%s5492_s8 + $0x260] ss:$16 sps:$4 sm:$0xff]  }
 0x1dd   :  { %2907 = vmatpush1.bf16.msra.mxu0 %v3975_v16  ;;  %2989 = vmatpush1.bf16.msra.mxu1 %v3978_v17  ;;  %v4020_v16 = vld [vmem:[%s5492_s8 + $0x268] ss:$16 sps:$4 sm:$0xff]   ;;  %v4025_v17 = vld [vmem:[%s5492_s8 + $0x284] ss:$16 sps:$4 sm:$0xff]  }
 0x1de   :  { %2908 = vmatprep.subr.bf16.mxu0 %v3983_v18  ;;  %2990 = vmatprep.subr.bf16.mxu1 %v3986_v20  ;;  %v4028_v18 = vld [vmem:[%s5492_s8 + $0x28c] ss:$16 sps:$4 sm:$0xff]   ;;  %v4023_v20 = vld [vmem:[%s5492_s8 + $0x280] ss:$16 sps:$4 sm:$0xff]  }
 0x1e1   :  { %2909 = vmatpush1.bf16.msra.mxu0 %v3981_v23  ;;  %2991 = vmatpush1.bf16.msra.mxu1 %v3984_v24  ;;  %v4026_v23 = vld [vmem:[%s5492_s8 + $0x288] ss:$16 sps:$4 sm:$0xff]   ;;  %v4031_v24 = vld [vmem:[%s5492_s8 + $0x2a4] ss:$16 sps:$4 sm:$0xff]  }
 0x1e2   :  { %2910 = vmatprep.subr.bf16.mxu0 %v3989_v25  ;;  %2992 = vmatprep.subr.bf16.mxu1 %v3992_v26  ;;  %v4034_v25 = vld [vmem:[%s5492_s8 + $0x2ac] ss:$16 sps:$4 sm:$0xff]   ;;  %v4029_v26 = vld [vmem:[%s5492_s8 + $0x2a0] ss:$16 sps:$4 sm:$0xff]  }
 0x1e5   :  { %2911 = vmatpush1.bf16.msra.mxu0 %v3987_v27  ;;  %2993 = vmatpush1.bf16.msra.mxu1 %v3990_v28  ;;  %v4032_v27 = vld [vmem:[%s5492_s8 + $0x2a8] ss:$16 sps:$4 sm:$0xff]   ;;  %v4037_v28 = vld [vmem:[%s5492_s8 + $0x2c4] ss:$16 sps:$4 sm:$0xff]  }
 0x1e6   :  { %2912 = vmatprep.subr.bf16.mxu0 %v3995_v29  ;;  %2994 = vmatprep.subr.bf16.mxu1 %v3998_v30  ;;  %v4040_v29 = vld [vmem:[%s5492_s8 + $0x2cc] ss:$16 sps:$4 sm:$0xff]   ;;  %v4035_v30 = vld [vmem:[%s5492_s8 + $0x2c0] ss:$16 sps:$4 sm:$0xff]  }
 0x1e9   :  { %2913 = vmatpush1.bf16.msra.mxu0 %v3993_v31  ;;  %2995 = vmatpush1.bf16.msra.mxu1 %v3996_v32  ;;  %v4038_v31 = vld [vmem:[%s5492_s8 + $0x2c8] ss:$16 sps:$4 sm:$0xff]   ;;  %v4043_v32 = vld [vmem:[%s5492_s8 + $0x2e4] ss:$16 sps:$4 sm:$0xff]  }
 0x1ea   :  { %2923 = vmatprep.subr.bf16.mxu0 %v4001_v33  ;;  %3005 = vmatprep.subr.bf16.mxu1 %v4004_v34  ;;  %v4046_v33 = vld [vmem:[%s5492_s8 + $0x2ec] ss:$16 sps:$4 sm:$0xff]   ;;  %v4041_v34 = vld [vmem:[%s5492_s8 + $0x2e0] ss:$16 sps:$4 sm:$0xff]  }
 0x27f   :  { %v1979_v39 = vpop.f32.mrb[8].mxu0  ;;  %v5260_v41 = vpop.f32.mrb[8].mxu1 }
 0x280   :  { %v3491_v42 = vadd.f32 %v1979_v39, %v1247_v36  ;;  %v1981_v43 = vpop.f32.mrb[9].mxu0  ;;  %v2063_v44 = vpop.f32.mrb[9].mxu1  ;;  %v4044_v36 = vld [vmem:[%s5492_s8 + $0x2e8] ss:$16 sps:$4 sm:$0xff]   ;;  %v4047_v39 = vld [vmem:[%s5492_s8 + $0x300] ss:$16 sps:$4 sm:$0xff]  }
 0x281   :  { %v3492_v46 = vadd.f32 %v1981_v43, %v1251_v37  ;;  %v3494_v47 = vadd.f32 %v2063_v44, %v1259_v38  ;;  %v1983_v48 = vpop.f32.mrb[10].mxu0  ;;  %v2065_v50 = vpop.f32.mrb[10].mxu1  ;;  %v4049_v37 = vld [vmem:[%s5492_s8 + $0x304] ss:$16 sps:$4 sm:$0xff]   ;;  %v4052_v38 = vld [vmem:[%s5492_s8 + $0x30c] ss:$16 sps:$4 sm:$0xff]   ;;  %v1255_v43 = vrot.slane %v5252_v35, %v4829_v19 }
 0x282   :  { %v2072_v45 = vmul.f32 1.442695, %v3491_v42  ;;  %v1984_v55 = vpop.f32.mrb[11].mxu0  ;;  %v2066_v56 = vpop.f32.mrb[11].mxu1  ;;  %vm2068_vm4 = vcmp.gt.f32.partialorder %v3491_v42, 0.0 }
 0x283   :  { %v2074_v52 = vmul.f32 1.442695, %v3492_v46  ;;  %v2078_v53 = vmul.f32 1.442695, %v3494_v47  ;;  %vm2069_vm5 = vcmp.gt.f32.partialorder %v3492_v46, 0.0  ;;  %vm2071_vm6 = vcmp.gt.f32.partialorder %v3494_v47, 0.0 }
 0x284   :  { %4103 = vpow2.f32 %v2072_v45  ;;  %v4055_v44 = vld [vmem:[%s5492_s8 + $0x324] ss:$16 sps:$4 sm:$0xff]   ;;  %v4056_v35 = vld [vmem:[%s5492_s8 + $0x328] ss:$16 sps:$4 sm:$0xff]   ;;  %v3493_v48 = vadd.f32 %v5260_v41, %v1255_v43  ;;  %v4064_v45 = vld [vmem:[%s5492_s8 + $0x34c] ss:$16 sps:$4 sm:$0xff]  }
 0x285   :  { %4105 = vpow2.f32 %v2074_v52  ;;  %v4061_v50 = vld [vmem:[%s5492_s8 + $0x344] ss:$16 sps:$4 sm:$0xff]   ;;  %v4059_v52 = vld [vmem:[%s5492_s8 + $0x340] ss:$16 sps:$4 sm:$0xff]   ;;  %v4062_v41 = vld [vmem:[%s5492_s8 + $0x348] ss:$16 sps:$4 sm:$0xff]  }
 0x286   :  { %4107 = vpow2.f32 %v2078_v53  ;;  %v2076_v53 = vmul.f32 1.442695, %v3493_v48  ;;  %v4067_v55 = vld [vmem:[%s5492_s8 + $0x364] ss:$16 sps:$4 sm:$0xff]   ;;  %v4070_v56 = vld [vmem:[%s5492_s8 + $0x36c] ss:$16 sps:$4 sm:$0xff]  }
 0x287   :  { %vm2070_vm7 = vcmp.gt.f32.partialorder %v3493_v48, 0.0 }
 0x288   :  { %4109 = vpow2.f32 %v2076_v53 }
 0x28e   :  { %v4104_v57 = vpop.eup %4103 }
 0x28f   :  { %v3359_v58 = vadd.f32 -1.0, %v4104_v57  ;;  %v4106_v59 = vpop.eup %4105  ;;  %v4065_v57 = vld [vmem:[%s5492_s8 + $0x360] ss:$16 sps:$4 sm:$0xff]  }
 0x290   :  { %v4108_v49 = vpop.eup %4107  ;;  %v3360_v60 = vadd.f32 -1.0, %v4106_v59  ;;  %v4073_v59 = vld [vmem:[%s5492_s8 + $0x384] ss:$16 sps:$4 sm:$0xff]  }
 0x291   :  { %v2084_v61 = vsel %vm2068_vm4, %v3491_v42, %v3359_v58  ;;  %v3362_v62 = vadd.f32 -1.0, %v4108_v49  ;;  %v4050_v42 = vld [vmem:[%s5492_s8 + $0x308] ss:$16 sps:$4 sm:$0xff]   ;;  %v4076_v49 = vld [vmem:[%s5492_s8 + $0x38c] ss:$16 sps:$4 sm:$0xff]  }
 0x292   :  { %v2085_v63 = vsel %vm2069_vm5, %v3492_v46, %v3360_v60  ;;  %v2088_v3 = vpack.c.bf16 %v2084_v61, %v2084_v61  ;;  %v4058_v46 = vld [vmem:[%s5492_s8 + $0x32c] ss:$16 sps:$4 sm:$0xff]   ;;  %v4068_v58 = vld [vmem:[%s5492_s8 + $0x368] ss:$16 sps:$4 sm:$0xff]   ;;  %v4071_v60 = vld [vmem:[%s5492_s8 + $0x380] ss:$16 sps:$4 sm:$0xff]  }
 0x293   :  { %v2089_v54 = vpack.c.bf16 %v2085_v63, %v2085_v63  ;;  %v2087_v2 = vsel %vm2071_vm6, %v3494_v47, %v3362_v62  ;;  %v4053_v47 = vld [vmem:[%s5492_s8 + $0x320] ss:$16 sps:$4 sm:$0xff]   ;;  %v4074_v61 = vld [vmem:[%s5492_s8 + $0x388] ss:$16 sps:$4 sm:$0xff]   ;;  %v4079_v62 = vld [vmem:[%s5492_s8 + $0x3a4] ss:$16 sps:$4 sm:$0xff]  }
 0x294   :  { %v2091_v6 = vpack.c.bf16 %v2087_v2, %v2087_v2  ;;  %v4082_v63 = vld [vmem:[%s5492_s8 + $0x3ac] ss:$16 sps:$4 sm:$0xff]  }
 0x295   :  { %2914 = vmatprep.mubr.bf16.mxu0 %v2089_v54  ;;  %2996 = vmatprep.mubr.bf16.mxu1 %v2089_v54  ;;  %v4077_v54 = vld [vmem:[%s5492_s8 + $0x3a0] ss:$16 sps:$4 sm:$0xff]   ;;  %v4088_v2 = vld [vmem:[%s5492_s8 + $0x3cc] ss:$16 sps:$4 sm:$0xff]  }
 0x296   :  { %2915 = vmatmul.mubr.bf16.vlgmr.msra.gmra.mrb[12].mxu0 %v2088_v3  ;;  %2997 = vmatmul.mubr.bf16.vlgmr.msra.gmra.mrb[12].mxu1 %v2088_v3  ;;  %v4110_v3 = vpop.eup %4109 }
 0x297   :  { %2924 = vmatpush1.bf16.msra.mxu0 %v3999_v0  ;;  %3006 = vmatpush1.bf16.msra.mxu1 %v4002_v1  ;;  %v4080_v0 = vld [vmem:[%s5492_s8 + $0x3a8] ss:$16 sps:$4 sm:$0xff]   ;;  %v4085_v1 = vld [vmem:[%s5492_s8 + $0x3c4] ss:$16 sps:$4 sm:$0xff]  }
 0x298   :  { %2955 = vmatprep.mubr.bf16.mxu0 %v2091_v6  ;;  %3037 = vmatprep.mubr.bf16.mxu1 %v2091_v6  ;;  %v4091_v6 = vld [vmem:[%s5492_s8 + $0x3e4] ss:$16 sps:$4 sm:$0xff]  }
 0x299   :  { %2925 = vmatprep.subr.bf16.mxu0 %v4007_v4  ;;  %3007 = vmatprep.subr.bf16.mxu1 %v4010_v5  ;;  %v4083_v4 = vld [vmem:[%s5492_s8 + $0x3c0] ss:$16 sps:$4 sm:$0xff]   ;;  %v4086_v5 = vld [vmem:[%s5492_s8 + $0x3c8] ss:$16 sps:$4 sm:$0xff]  }
 0x29b   :  { %2926 = vmatpush1.bf16.msra.mxu0 %v4005_v7  ;;  %3008 = vmatpush1.bf16.msra.mxu1 %v4008_v8  ;;  %v4094_v7 = vld [vmem:[%s5492_s8 + $0x3ec] ss:$16 sps:$4 sm:$0xff]   ;;  %v3361_v8 = vadd.f32 -1.0, %v4110_v3 }
 0x29c   :  { %2927 = vmatprep.subr.bf16.mxu0 %v4013_v9  ;;  %3009 = vmatprep.subr.bf16.mxu1 %v4016_v10  ;;  %v4089_v9 = vld [vmem:[%s5492_s8 + $0x3e0] ss:$16 sps:$4 sm:$0xff]   ;;  %v4092_v10 = vld [vmem:[%s5492_s8 + $0x3e8] ss:$16 sps:$4 sm:$0xff]  }
 0x29f   :  { %2928 = vmatpush1.bf16.msra.mxu0 %v4011_v11  ;;  %3010 = vmatpush1.bf16.msra.mxu1 %v4014_v12  ;;  %v2086_v11 = vsel %vm2070_vm7, %v3493_v48, %v3361_v8 }
 0x2a0   :  { %2929 = vmatprep.subr.bf16.mxu0 %v4019_v13  ;;  %3011 = vmatprep.subr.bf16.mxu1 %v4022_v14  ;;  %v2090_v12 = vpack.c.bf16 %v2086_v11, %v2086_v11 }
 0x2a3   :  { %2930 = vmatpush1.bf16.msra.mxu0 %v4017_v15  ;;  %3012 = vmatpush1.bf16.msra.mxu1 %v4020_v16 }
 0x2a4   :  { %2931 = vmatprep.subr.bf16.mxu0 %v4025_v17  ;;  %3013 = vmatprep.subr.bf16.mxu1 %v4028_v18 }
 0x2a7   :  { %2932 = vmatpush1.bf16.msra.mxu0 %v4023_v20  ;;  %3014 = vmatpush1.bf16.msra.mxu1 %v4026_v23 }
 0x2a8   :  { %2933 = vmatprep.subr.bf16.mxu0 %v4031_v24  ;;  %3015 = vmatprep.subr.bf16.mxu1 %v4034_v25 }
 0x2ab   :  { %2934 = vmatpush1.bf16.msra.mxu0 %v4029_v26  ;;  %3016 = vmatpush1.bf16.msra.mxu1 %v4032_v27 }
 0x2ac   :  { %2935 = vmatprep.subr.bf16.mxu0 %v4037_v28  ;;  %3017 = vmatprep.subr.bf16.mxu1 %v4040_v29 }
 0x2af   :  { %2936 = vmatpush1.bf16.msra.mxu0 %v4035_v30  ;;  %3018 = vmatpush1.bf16.msra.mxu1 %v4038_v31 }
 0x2b0   :  { %2937 = vmatprep.subr.bf16.mxu0 %v4043_v32  ;;  %3019 = vmatprep.subr.bf16.mxu1 %v4046_v33 }
 0x2b3   :  { %2938 = vmatpush1.bf16.msra.mxu0 %v4041_v34  ;;  %3020 = vmatpush1.bf16.msra.mxu1 %v4044_v36 }
 0x2b4   :  { %2939 = vmatprep.subr.bf16.mxu0 %v4049_v37  ;;  %3021 = vmatprep.subr.bf16.mxu1 %v4052_v38 }
 0x2b7   :  { %2940 = vmatpush1.bf16.msra.mxu0 %v4047_v39  ;;  %3022 = vmatpush1.bf16.msra.mxu1 %v4050_v42 }
 0x2b8   :  { %2941 = vmatprep.subr.bf16.mxu0 %v4055_v44  ;;  %3023 = vmatprep.subr.bf16.mxu1 %v4058_v46 }
 0x2bb   :  { %2942 = vmatpush1.bf16.msra.mxu0 %v4053_v47  ;;  %3024 = vmatpush1.bf16.msra.mxu1 %v4056_v35 }
 0x2bc   :  { %2943 = vmatprep.subr.bf16.mxu0 %v4061_v50  ;;  %3025 = vmatprep.subr.bf16.mxu1 %v4064_v45 }
 0x2bf   :  { %2944 = vmatpush1.bf16.msra.mxu0 %v4059_v52  ;;  %3026 = vmatpush1.bf16.msra.mxu1 %v4062_v41 }
 0x2c0   :  { %2945 = vmatprep.subr.bf16.mxu0 %v4067_v55  ;;  %3027 = vmatprep.subr.bf16.mxu1 %v4070_v56 }
 0x2c3   :  { %2946 = vmatpush1.bf16.msra.mxu0 %v4065_v57  ;;  %3028 = vmatpush1.bf16.msra.mxu1 %v4068_v58 }
 0x2c4   :  { %2947 = vmatprep.subr.bf16.mxu0 %v4073_v59  ;;  %3029 = vmatprep.subr.bf16.mxu1 %v4076_v49 }
 0x2c7   :  { %2948 = vmatpush1.bf16.msra.mxu0 %v4071_v60  ;;  %3030 = vmatpush1.bf16.msra.mxu1 %v4074_v61 }
 0x2c8   :  { %2949 = vmatprep.subr.bf16.mxu0 %v4079_v62  ;;  %3031 = vmatprep.subr.bf16.mxu1 %v4082_v63 }
 0x2cb   :  { %2950 = vmatpush1.bf16.msra.mxu0 %v4077_v54  ;;  %3032 = vmatpush1.bf16.msra.mxu1 %v4080_v0 }
 0x2cc   :  { %2951 = vmatprep.subr.bf16.mxu0 %v4085_v1  ;;  %3033 = vmatprep.subr.bf16.mxu1 %v4088_v2 }
 0x2cf   :  { %2952 = vmatpush1.bf16.msra.mxu0 %v4083_v4  ;;  %3034 = vmatpush1.bf16.msra.mxu1 %v4086_v5 }
 0x2d0   :  { %2953 = vmatprep.subr.bf16.mxu0 %v4091_v6  ;;  %3035 = vmatprep.subr.bf16.mxu1 %v4094_v7 }
 0x2d3   :  { %2954 = vmatpush1.bf16.msra.mxu0 %v4089_v9  ;;  %3036 = vmatpush1.bf16.msra.mxu1 %v4092_v10 }
 0x2d6   :  { %2956 = vmatmul.mubr.bf16.vlgmr.msra.gmra.mrb[12].mxu0 %v2090_v12  ;;  %3038 = vmatmul.mubr.bf16.vlgmr.msra.gmra.mrb[12].mxu1 %v2090_v12 }
 0x2d7   :  { %4122 = shalt.err (!%p4119_p4)
}
 0x2d8   :  { %s4123_s24 = scalar_lea.hbm %s5494_s10, 128 }
 0x2d9   :  { %p4124_p5 = scmp.ne.s32.totalorder %s5494_s10, %s4123_s24  ;;  %p4127_p6 = scmp.lt.u32.totalorder %s4123_s24, %s5494_s10 }
 0x2db   :  { %p4129_p7 = pnand %p4127_p6, %p4124_p5 }
 0x2dd   :  { %4132 = shalt.err (!%p4129_p7)
}
 0x2de   :  { %3078 = dma.vmem_to_hbm [thread:$0]  %s3076_s22, 128, %s5494_s10, [#allocation3]   ;;  %v2220_v13 = vld [vmem:[%s5493_s9] sm:$0xf] }
 0x2df   :  { %v2225_v14 = vrot.slane %v2220_v13, %v4826_v51  ;;  %v2233_v15 = vrot.slane %v2220_v13, %v4829_v19  ;;  %v2229_v16 = vrot.slane %v2220_v13, %v4835_v21  ;;  %v2237_v17 = vrot.slane %v2220_v13, %v4838_v22  ;;  %s4162_s9 = smov [#allocation4]  }
 0x2e0   :  { %s3085_s10 = sshll.u32 %s4162_s9, 4  ;;  %s3086_s10 = int_to_ptr.vmem [resolvable:$true] %s3085_s10 }
 0x2e1   :  { %s4133_s30 = scalar_lea.vmem %s3086_s10, 128  ;;  %p4138_p9 = scmp.lt.s32.totalorder %s3086_s10, %s3086_s10 }
 0x2e2   :  { %p4134_p8 = scmp.ne.s32.totalorder %s3086_s10, %s4133_s30  ;;  %p4139_p10 = scmp.lt.s32.totalorder %s4133_s30, %s4133_s30 }
 0x2e4   :  { %p4140_p11 = por %p4139_p10, %p4138_p9 }
 0x2e6   :  { %p4141_p12 = pnand %p4140_p11, %p4134_p8 }
 0x3a9   :  { %v2957_v18 = vpop.f32.mrb[12].mxu0  ;;  %v3039_v20 = vpop.f32.mrb[12].mxu1 }
 0x3aa   :  { %v3495_v23 = vadd.f32 %v2957_v18, %v2225_v14  ;;  %v3497_v24 = vadd.f32 %v3039_v20, %v2233_v15  ;;  %v2959_v25 = vpop.f32.mrb[13].mxu0  ;;  %v3041_v26 = vpop.f32.mrb[13].mxu1 }
 0x3ab   :  { %v3496_v27 = vadd.f32 %v2959_v25, %v2229_v16  ;;  %v3498_v28 = vadd.f32 %v3041_v26, %v2237_v17  ;;  %v2961_v29 = vpop.f32.mrb[14].mxu0  ;;  %v3043_v30 = vpop.f32.mrb[14].mxu1 }
 0x3ac   :  { %v2962_v31 = vpop.f32.mrb[15].mxu0  ;;  %v3044_v32 = vpop.f32.mrb[15].mxu1 }
 0x3ad   :  { %v3050_v33 = vcombine.low %v3495_v23, %v3496_v27  ;;  %v3051_v51 = vcombine.low %v3497_v24, %v3498_v28 }
 0x3af   :  { %v3058_v19 = vrot.slane %v3050_v33, %v4845_v40  ;;  %v3065_v21 = vrot.slane %v3051_v51, %v4845_v40 }
 0x3b1   :  { %v3066_v22 = vcombine.low %v3058_v19, %v3065_v21 }
 0x3b3   :  { %3068 = vst [vmem:[#allocation4] sm:$0xff] %v3066_v22 }
 0x3b4   :  { %4144 = shalt.err (!%p4141_p12)
}
 0x3b5   :  { %s4145_s6 = scalar_lea.hbm %s5495_s11, 128 }
 0x3b6   :  { %p4146_p13 = scmp.ne.s32.totalorder %s5495_s11, %s4145_s6  ;;  %p4149_p0 = scmp.lt.u32.totalorder %s4145_s6, %s5495_s11 }
 0x3b8   :  { %p4151_p1 = pnand %p4149_p0, %p4146_p13 }
 0x3ba   :  { %4154 = shalt.err (!%p4151_p1)
}
 0x3bb   :  { %3088 = dma.vmem_to_hbm [thread:$0]  %s3086_s10, 128, %s5495_s11, [#allocation5]  }
 0x3bc   :  { %4155 = dma.done.wait [#allocation3], 128  }
 0x3bd   :  { %4156 = vsyncadd [#allocation3], 4294967168 }
 0x3be   :  { %4157 = dma.done.wait [#allocation5], 128  }
 0x3bf   :  { %4158 = vsyncadd [#allocation5], 4294967168 }
 0x3c0   :  { %3095 = vsyncpa [#allocation3], 1 }
 0x3c1   :  { %3096 = vsyncpa [#allocation5], 1 }

</bundles_post_ra>
